<compile_context>
chip_gen: v7x
topology: tpu7x:2x2x1
jax: 0.10.0
libtpu: 0.0.40
codegen_flags: <defaults>
</compile_context>

<pallas_src>
import functools

import jax
import jax.numpy as jnp
from jax.experimental import pallas as pl
from jax.experimental.pallas import tpu as pltpu

EPS = 1e-5
LANE = 128

# Row indices into the stacked (N_W, Cp, Cp) weight tensor.
NF_WA, NF_WB, NF_WO = 0, 1, 2                       # NodeFeaturePath
EF_WA, EF_WB, EF_WO = 3, 4, 5                       # EdgeFeaturePath
SF_WA, SF_WB, SF_WP, SF_WOX, SF_WOQ = 6, 7, 8, 9, 10  # StructuralFeaturePath
AG_INIT, AG_FEAT0, AG_ATTA, AG_ATTB, AG_AGG = 11, 12, 15, 16, 17  # Aggregation
N_W = 18

# Row indices into the stacked (N_V, Cp) bias/affine tensor.
NF_BL, NF_BO, EF_BL, EF_BO, SF_BC, SF_BP, SF_BO, BN_G, BN_B = range(9)
N_V = 9


def _multipath_kernel(x_ref, coords_ref, row_ref, col_ref, colT_ref, bond_ref,
                      w_ref, v_ref, convw_ref, convb_ref, out_ref, *, n_nodes):
    f32 = jnp.float32
    n_pad, c_pad = x_ref.shape
    e_pad = row_ref.shape[0]

    def W(i):
        return w_ref[i]                      # (Cp, Cp) weight, already (in, out)

    def V(i):
        return v_ref[i:i + 1, :]             # (1, Cp) bias / affine row

    def dot(a, b):
        return jnp.dot(a, b, preferred_element_type=f32)

    def mish(h):                             # x * tanh(softplus(x)), stable
        sp = jnp.maximum(h, 0.0) + jnp.log(1.0 + jnp.exp(-jnp.abs(h)))
        return h * jnp.tanh(sp)

    def onehot(eq):
        return jnp.where(eq, f32(1.0), f32(0.0))

    x = x_ref[...]                           # (Np, Cp), real features in [:, :C]
    coords = coords_ref[...]                 # (Np, 128), real coords in [:, :3]

    # ---- gather / scatter one-hots from edge_index (no dynamic gather) ------
    node_lane = jax.lax.broadcasted_iota(jnp.int32, (e_pad, n_pad), 1)
    s_src = onehot(row_ref[...] == node_lane)      # (E, N): gathers x_j (source)
    s_dst = onehot(col_ref[...] == node_lane)      # (E, N): gathers x_i (target)
    node_sub = jax.lax.broadcasted_iota(jnp.int32, (n_pad, e_pad), 0)
    s_dst_t = onehot(colT_ref[...] == node_sub)    # (N, E): scatter-add to target

    x_i = dot(s_dst, x)                      # per-edge target-node features
    x_j = dot(s_src, x)                      # per-edge source-node features

    # ---- NodeFeaturePath ----------------------------------------------------
    m = mish(dot(x_i, W(NF_WA)) + dot(x_j, W(NF_WB)) + V(NF_BL))
    p = dot(s_dst_t, m)                      # aggr='add' at target nodes
    feat_node = mish(dot(p, W(NF_WO)) + V(NF_BO))

    # ---- EdgeFeaturePath ----------------------------------------------------
    # 1x1 Conv2d over the one-hot bond adjacency collapses to a per-edge
    # bond-weight lookup: norm_e = conv_w[bond_e] + conv_b.
    # TODO(synk): graphs with duplicate (row, col) pairs carrying different
    #             bond types would need the full dense (4, N, N) adjacency.
    bond_lane = jax.lax.broadcasted_iota(jnp.int32, (e_pad, 8), 1)
    bond_oh = onehot(bond_ref[...] == bond_lane)                    # (E, 8)
    norm_e = (jnp.sum(bond_oh * convw_ref[...], axis=1, keepdims=True)
              + convb_ref[...])                                     # (E, 1)
    m = mish(dot(norm_e * x_i, W(EF_WA)) + dot(norm_e * x_j, W(EF_WB))
             + V(EF_BL))
    p = dot(s_dst_t, m)
    feat_edge = mish(dot(p, W(EF_WO)) + V(EF_BO))

    # ---- StructuralFeaturePath ----------------------------------------------
    d = dot(s_src, coords) - dot(s_dst, coords)
    dist2 = jnp.sum(d * d, axis=1, keepdims=True)                   # (E, 1)
    m = dot(dist2 * x_i, W(SF_WA)) + dot(dist2 * x_j, W(SF_WB)) + V(SF_BC)
    q = dot(s_dst_t, m)
    q = mish(dot(q, W(SF_WP)) + V(SF_BP))
    feat_struct = mish(dot(x, W(SF_WOX)) + dot(q, W(SF_WOQ)) + V(SF_BO))

    # ---- FeatureAggregation (mode='att') ------------------------------------
    init_act = mish(dot(x, W(AG_INIT)))      # act(init_lin(x))
    # att() applied to act(cat([act(init), act(feat@feat_lin)])) with the
    # concat split into two matmuls; the init half is identical for every path.
    e_init = dot(mish(init_act), W(AG_ATTA))
    feats = (feat_node, feat_edge, feat_struct)
    logits = []
    for f in range(3):
        lf = mish(dot(feats[f], W(AG_FEAT0 + f)))
        logits.append(e_init + dot(mish(lf), W(AG_ATTB)))
    e0, e1, e2 = logits
    emax = jnp.maximum(jnp.maximum(e0, e1), e2)       # softmax over the 3 paths
    z0 = jnp.exp(e0 - emax)
    z1 = jnp.exp(e1 - emax)
    z2 = jnp.exp(e2 - emax)
    att = (z0 * feats[0] + z1 * feats[1] + z2 * feats[2]) / (z0 + z1 + z2)
    h = dot(att, W(AG_AGG))                  # agg_lin (no bias, no activation)

    # ---- BatchNorm (batch stats over real nodes) + final Mish ---------------
    row_ids = jax.lax.broadcasted_iota(jnp.int32, (n_pad, c_pad), 0)
    hm = jnp.where(row_ids < n_nodes, h, 0.0)         # mask padded node rows
    inv_n = 1.0 / float(n_nodes)
    mean = jnp.sum(hm, axis=0, keepdims=True) * inv_n
    var = jnp.maximum(
        jnp.sum(hm * hm, axis=0, keepdims=True) * inv_n - mean * mean, 0.0)
    scale = V(BN_G) * jax.lax.rsqrt(var + EPS)        # one FMA pass: h*s + t
    shift = V(BN_B) - mean * scale
    out_ref[...] = mish(h * scale + shift).astype(out_ref.dtype)


def _round_up(v, m):
    return ((v + m - 1) // m) * m


def multipath_layer_forward(x, coords, edge_index, bond_types, params):
    """x: (N, C); coords: (N, 3); edge_index: (2, E) int; bond_types: (E,) int.

    params hold PyTorch-layout weights (Linear weight = (out, in))."""
    n, c_in = x.shape
    c = params['nf_w2'].shape[0]
    assert c_in == c, "MultiPathLayer (as written) requires in_channels == out_channels"
    e = edge_index.shape[1]

    n_pad = max(_round_up(n, 8), 8)
    e_pad = max(_round_up(e, 8), 8)
    c_pad = _round_up(c, LANE)

    def pad2(a, r, co):
        z = jnp.zeros((r, co), jnp.float32)
        return z.at[:a.shape[0], :a.shape[1]].set(a.astype(jnp.float32))

    def padv(a, co):
        z = jnp.zeros((co,), jnp.float32)
        return z.at[:a.shape[0]].set(a.astype(jnp.float32))

    def wt(w):                                # (out, in) -> padded (in, out)
        return pad2(w.T, c_pad, c_pad)

    def wsplit(w, half):                      # (out, 2*half) -> two (in, out)
        return pad2(w[:, :half].T, c_pad, c_pad), pad2(w[:, half:].T, c_pad, c_pad)

    # --- data, lane/sublane padded -------------------------------------------
    x_p = pad2(x, n_pad, c_pad)
    coords_p = pad2(coords, n_pad, LANE)

    def pad_idx(v):
        z = jnp.full((e_pad,), -1, jnp.int32)     # -1 == "padded edge"
        return z.at[:v.shape[0]].set(v.astype(jnp.int32))

    row_p = pad_idx(edge_index[0])            # source nodes (x_j)
    col_p = pad_idx(edge_index[1])            # target nodes (x_i, aggregation)
    bond_p = pad_idx(bond_types)
    row_sub = row_p[:, None]                  # (E, 1)
    col_sub = col_p[:, None]                  # (E, 1)
    col_lane = col_p[None, :]                 # (1, E)
    bond_sub = bond_p[:, None]                # (E, 1)

    # --- stacked weights (concat-linears split into per-half matmuls) --------
    nf_wa, nf_wb = wsplit(params['nf_w1'], c_in)
    ef_wa, ef_wb = wsplit(params['ef_w1'], c_in)
    sf_wa, sf_wb = wsplit(params['sf_w1'], c_in)
    sf_wox, sf_woq = wsplit(params['sf_w2'], c)
    ag_atta, ag_attb = wsplit(params['ag_watt'], c)

    w_stack = jnp.stack([
        nf_wa, nf_wb, wt(params['nf_w2']),
        ef_wa, ef_wb, wt(params['ef_w2']),
        sf_wa, sf_wb, wt(params['sf_wp']), sf_wox, sf_woq,
        wt(params['ag_winit']),
        pad2(params['ag_wfeat'][0], c_pad, c_pad),   # feat_lin already (in, out)
        pad2(params['ag_wfeat'][1], c_pad, c_pad),
        pad2(params['ag_wfeat'][2], c_pad, c_pad),
        ag_atta, ag_attb,
        wt(params['ag_wagg']),
    ])
    assert w_stack.shape[0] == N_W

    v_stack = jnp.stack([
        padv(params['nf_b1'], c_pad), padv(params['nf_b2'], c_pad),
        padv(params['ef_b1'], c_pad), padv(params['ef_b2'], c_pad),
        padv(params['sf_b1'], c_pad), padv(params['sf_bp'], c_pad),
        padv(params['sf_b2'], c_pad),
        padv(params['bn_g'], c_pad), padv(params['bn_b'], c_pad),
    ])
    assert v_stack.shape[0] == N_V

    conv_w = jnp.zeros((1, 8), jnp.float32).at[0, :4].set(
        params['ef_convw'].astype(jnp.float32))
    conv_b = jnp.full((1, 1), params['ef_convb'], jnp.float32)

    kernel = functools.partial(_multipath_kernel, n_nodes=n)
    vmem = pl.BlockSpec(memory_space=pltpu.MemorySpace.VMEM)

    out_p = pl.pallas_call(
        kernel,
        out_shape=jax.ShapeDtypeStruct((n_pad, c_pad), jnp.float32),
        in_specs=[vmem] * 10,
        out_specs=vmem,
    )(x_p, coords_p, row_sub, col_sub, col_lane, bond_sub,
      w_stack, v_stack, conv_w, conv_b)

    return out_p[:n, :c]


# ----------------------------- pure-JAX reference ----------------------------
def _reference_forward(x, coords, edge_index, bond_types, p):
    n, _ = x.shape
    row, col = edge_index[0], edge_index[1]

    def mish(v):
        sp = jnp.maximum(v, 0.0) + jnp.log(1.0 + jnp.exp(-jnp.abs(v)))
        return v * jnp.tanh(sp)

    def lin(h, w, b=None):
        y = h @ w.T
        return y if b is None else y + b

    def scatter_add(msgs):
        return jnp.zeros((n, msgs.shape[1]), jnp.float32).at[col].add(msgs)

    x_i, x_j = x[col], x[row]

    # NodeFeaturePath
    m = mish(lin(jnp.concatenate([x_i, x_j], 1), p['nf_w1'], p['nf_b1']))
    feat_node = mish(lin(scatter_add(m), p['nf_w2'], p['nf_b2']))

    # EdgeFeaturePath (faithful dense-adjacency 1x1 conv)
    adj = jnp.zeros((4, n, n), jnp.float32).at[bond_types, row, col].set(1.0)
    e_mat = jnp.einsum('b,bij->ij', p['ef_convw'], adj) + p['ef_convb']
    norm = e_mat[row, col][:, None]
    m = mish(lin(norm * jnp.concatenate([x_i, x_j], 1), p['ef_w1'], p['ef_b1']))
    feat_edge = mish(lin(scatter_add(m), p['ef_w2'], p['ef_b2']))

    # StructuralFeaturePath
    d = coords[row] - coords[col]
    dist2 = jnp.sum(d * d, axis=1, keepdims=True)
    m = lin(dist2 * jnp.concatenate([x_i, x_j], 1), p['sf_w1'], p['sf_b1'])
    q = mish(lin(scatter_add(m), p['sf_wp'], p['sf_bp']))
    feat_struct = mish(lin(jnp.concatenate([x, q], 1), p['sf_w2'], p['sf_b2']))

    # FeatureAggregation (att)
    feats = jnp.stack([feat_node, feat_edge, feat_struct], 0)
    lin_init = jnp.broadcast_to(lin(x, p['ag_winit']), feats.shape)
    lin_feats = jnp.einsum('fnc,fcd->fnd', feats, p['ag_wfeat'])
    cat = jnp.concatenate([mish(lin_init), mish(lin_feats)], axis=2)
    e_att = jnp.einsum('fnk,ck->fnc', mish(cat), p['ag_watt'])
    a = jax.nn.softmax(e_att, axis=0)
    att = jnp.einsum('fnd,fnd->nd', a, feats)
    h = lin(att, p['ag_wagg'])

    # BatchNorm (training-mode batch stats) + final activation
    mean = jnp.mean(h, axis=0, keepdims=True)
    var = jnp.mean((h - mean) ** 2, axis=0, keepdims=True)
    h = (h - mean) / jnp.sqrt(var + EPS) * p['bn_g'] + p['bn_b']
    return mish(h)


if __name__ == "__main__":
    # MultiPathLayer(in_channels=32, out_channels=32, activation='mish',
    #                final=False, batch_norm=True, agg_mode='att',
    #                features=['node', 'edge', 'struct'])
    n_nodes, c = 12, 32

    key = jax.random.PRNGKey(0)
    keys = jax.random.split(key, 24)

    # Simple bidirectional ring graph: 24 unique directed edges.
    src = jnp.arange(n_nodes, dtype=jnp.int32)
    dst = (src + 1) % n_nodes
    edge_index = jnp.stack([jnp.concatenate([src, dst]),
                            jnp.concatenate([dst, src])])
    n_edges = edge_index.shape[1]
    bond_types = jax.random.randint(keys[0], (n_edges,), 0, 4, dtype=jnp.int32)

    x = jax.random.normal(keys[1], (n_nodes, c), jnp.float32) * 0.5
    coords = jax.random.normal(keys[2], (n_nodes, 3), jnp.float32)

    def w(k, shape):
        return jax.random.normal(k, shape, jnp.float32) * 0.1

    params = dict(
        nf_w1=w(keys[3], (c, 2 * c)), nf_b1=w(keys[4], (c,)),
        nf_w2=w(keys[5], (c, c)), nf_b2=w(keys[6], (c,)),
        ef_convw=w(keys[7], (4,)), ef_convb=jnp.float32(0.3),
        ef_w1=w(keys[8], (c, 2 * c)), ef_b1=w(keys[9], (c,)),
        ef_w2=w(keys[10], (c, c)), ef_b2=w(keys[11], (c,)),
        sf_w1=w(keys[12], (c, 2 * c)), sf_b1=w(keys[13], (c,)),
        sf_wp=w(keys[14], (c, c)), sf_bp=w(keys[15], (c,)),
        sf_w2=w(keys[16], (c, 2 * c)), sf_b2=w(keys[17], (c,)),
        ag_winit=w(keys[18], (c, c)), ag_wfeat=w(keys[19], (3, c, c)),
        ag_watt=w(keys[20], (c, 2 * c)), ag_wagg=w(keys[21], (c, c)),
        bn_g=jnp.ones((c,), jnp.float32), bn_b=jnp.zeros((c,), jnp.float32),
    )

    out = multipath_layer_forward(x, coords, edge_index, bond_types, params)
    out = jax.block_until_ready(out)

    ref = _reference_forward(x, coords, edge_index, bond_types, params)
    assert out.shape == (n_nodes, c)
    max_err = float(jnp.max(jnp.abs(out - ref)))
    assert jnp.allclose(out, ref, atol=2e-3, rtol=2e-3), f"mismatch: {max_err}"

    print("KERNEL_OK")
</pallas_src>

<mosaic_0001>
module attributes {stable_mosaic.version = 11 : i64} {
  func.func @_multipath_kernel(%arg0: memref<16x128xf32, #tpu.memory_space<vmem>>, %arg1: memref<16x128xf32, #tpu.memory_space<vmem>>, %arg2: memref<24x1xi32, #tpu.memory_space<vmem>>, %arg3: memref<24x1xi32, #tpu.memory_space<vmem>>, %arg4: memref<1x24xi32, #tpu.memory_space<vmem>>, %arg5: memref<24x1xi32, #tpu.memory_space<vmem>>, %arg6: memref<18x128x128xf32, #tpu.memory_space<vmem>>, %arg7: memref<9x128xf32, #tpu.memory_space<vmem>>, %arg8: memref<1x8xf32, #tpu.memory_space<vmem>>, %arg9: memref<1x1xf32, #tpu.memory_space<vmem>>, %arg10: memref<16x128xf32, #tpu.memory_space<vmem>>) attributes {dimension_semantics = [], scalar_prefetch = 0 : i64, scratch_operands = 0 : i64, tpu.core_type = #tpu.core_type<tc>} {
    %c0 = arith.constant 0 : index
    %c0_0 = arith.constant 0 : index
    %0 = vector.load %arg0[%c0, %c0_0] : memref<16x128xf32, #tpu.memory_space<vmem>>, vector<16x128xf32>
    %c0_1 = arith.constant 0 : index
    %c0_2 = arith.constant 0 : index
    %1 = vector.load %arg1[%c0_1, %c0_2] : memref<16x128xf32, #tpu.memory_space<vmem>>, vector<16x128xf32>
    %2 = tpu.iota {dimensions = array<i32: 1>} : vector<24x16xi32>
    %c0_3 = arith.constant 0 : index
    %c0_4 = arith.constant 0 : index
    %3 = vector.load %arg2[%c0_3, %c0_4] : memref<24x1xi32, #tpu.memory_space<vmem>>, vector<24x1xi32>
    %4 = vector.broadcast %3 : vector<24x1xi32> to vector<24x16xi32>
    %5 = arith.cmpi eq, %4, %2 : vector<24x16xi32>
    %cst = arith.constant 1.000000e+00 : f32
    %cst_5 = arith.constant 0.000000e+00 : f32
    %6 = vector.broadcast %cst : f32 to vector<24x16xf32>
    %7 = vector.broadcast %cst_5 : f32 to vector<24x16xf32>
    %8 = arith.select %5, %6, %7 : vector<24x16xi1>, vector<24x16xf32>
    %c0_6 = arith.constant 0 : index
    %c0_7 = arith.constant 0 : index
    %9 = vector.load %arg3[%c0_6, %c0_7] : memref<24x1xi32, #tpu.memory_space<vmem>>, vector<24x1xi32>
    %10 = vector.broadcast %9 : vector<24x1xi32> to vector<24x16xi32>
    %11 = arith.cmpi eq, %10, %2 : vector<24x16xi32>
    %cst_8 = arith.constant 1.000000e+00 : f32
    %cst_9 = arith.constant 0.000000e+00 : f32
    %12 = vector.broadcast %cst_8 : f32 to vector<24x16xf32>
    %13 = vector.broadcast %cst_9 : f32 to vector<24x16xf32>
    %14 = arith.select %11, %12, %13 : vector<24x16xi1>, vector<24x16xf32>
    %15 = tpu.iota {dimensions = array<i32: 0>} : vector<16x24xi32>
    %c0_10 = arith.constant 0 : index
    %c0_11 = arith.constant 0 : index
    %16 = vector.load %arg4[%c0_10, %c0_11] : memref<1x24xi32, #tpu.memory_space<vmem>>, vector<1x24xi32>
    %17 = vector.broadcast %16 : vector<1x24xi32> to vector<16x24xi32>
    %18 = arith.cmpi eq, %17, %15 : vector<16x24xi32>
    %cst_12 = arith.constant 1.000000e+00 : f32
    %cst_13 = arith.constant 0.000000e+00 : f32
    %19 = vector.broadcast %cst_12 : f32 to vector<16x24xf32>
    %20 = vector.broadcast %cst_13 : f32 to vector<16x24xf32>
    %21 = arith.select %18, %19, %20 : vector<16x24xi1>, vector<16x24xf32>
    %cst_14 = arith.constant dense<0.000000e+00> : vector<24x128xf32>
    %22 = tpu.matmul %14, %0, %cst_14 {dimension_numbers = #tpu.dot_dimension_numbers<[1], [0], [0], [1], [0, 0, 1, 1], [], []>} : vector<24x16xf32>, vector<16x128xf32>, vector<24x128xf32> -> vector<24x128xf32>
    %cst_15 = arith.constant dense<0.000000e+00> : vector<24x128xf32>
    %23 = tpu.matmul %8, %0, %cst_15 {dimension_numbers = #tpu.dot_dimension_numbers<[1], [0], [0], [1], [0, 0, 1, 1], [], []>} : vector<24x16xf32>, vector<16x128xf32>, vector<24x128xf32> -> vector<24x128xf32>
    %c0_16 = arith.constant 0 : index
    %c0_17 = arith.constant 0 : index
    %c0_18 = arith.constant 0 : index
    %24 = vector.load %arg6[%c0_16, %c0_17, %c0_18] : memref<18x128x128xf32, #tpu.memory_space<vmem>>, vector<1x128x128xf32>
    %25 = vector.shape_cast %24 : vector<1x128x128xf32> to vector<128x128xf32>
    %cst_19 = arith.constant dense<0.000000e+00> : vector<24x128xf32>
    %26 = tpu.matmul %22, %25, %cst_19 {dimension_numbers = #tpu.dot_dimension_numbers<[1], [0], [0], [1], [0, 0, 1, 1], [], []>} : vector<24x128xf32>, vector<128x128xf32>, vector<24x128xf32> -> vector<24x128xf32>
    %c1 = arith.constant 1 : index
    %c0_20 = arith.constant 0 : index
    %c0_21 = arith.constant 0 : index
    %27 = vector.load %arg6[%c1, %c0_20, %c0_21] : memref<18x128x128xf32, #tpu.memory_space<vmem>>, vector<1x128x128xf32>
    %28 = vector.shape_cast %27 : vector<1x128x128xf32> to vector<128x128xf32>
    %cst_22 = arith.constant dense<0.000000e+00> : vector<24x128xf32>
    %29 = tpu.matmul %23, %28, %cst_22 {dimension_numbers = #tpu.dot_dimension_numbers<[1], [0], [0], [1], [0, 0, 1, 1], [], []>} : vector<24x128xf32>, vector<128x128xf32>, vector<24x128xf32> -> vector<24x128xf32>
    %30 = arith.addf %26, %29 : vector<24x128xf32>
    %c0_23 = arith.constant 0 : index
    %c0_24 = arith.constant 0 : index
    %31 = vector.load %arg7[%c0_23, %c0_24] : memref<9x128xf32, #tpu.memory_space<vmem>>, vector<1x128xf32>
    %32 = vector.broadcast %31 : vector<1x128xf32> to vector<24x128xf32>
    %33 = arith.addf %30, %32 : vector<24x128xf32>
    %cst_25 = arith.constant 0.000000e+00 : f32
    %34 = vector.broadcast %cst_25 : f32 to vector<24x128xf32>
    %35 = arith.maximumf %33, %34 : vector<24x128xf32>
    %36 = math.absf %33 : vector<24x128xf32>
    %cst_26 = arith.constant 0.000000e+00 : f32
    %37 = vector.broadcast %cst_26 : f32 to vector<24x128xf32>
    %38 = arith.subf %37, %36 : vector<24x128xf32>
    %39 = math.exp %38 : vector<24x128xf32>
    %cst_27 = arith.constant 1.000000e+00 : f32
    %40 = vector.broadcast %cst_27 : f32 to vector<24x128xf32>
    %41 = arith.addf %40, %39 : vector<24x128xf32>
    %42 = math.log %41 : vector<24x128xf32>
    %43 = arith.addf %35, %42 : vector<24x128xf32>
    %44 = math.tanh %43 : vector<24x128xf32>
    %45 = arith.mulf %33, %44 : vector<24x128xf32>
    %cst_28 = arith.constant dense<0.000000e+00> : vector<16x128xf32>
    %46 = tpu.matmul %21, %45, %cst_28 {dimension_numbers = #tpu.dot_dimension_numbers<[1], [0], [0], [1], [0, 0, 1, 1], [], []>} : vector<16x24xf32>, vector<24x128xf32>, vector<16x128xf32> -> vector<16x128xf32>
    %c2 = arith.constant 2 : index
    %c0_29 = arith.constant 0 : index
    %c0_30 = arith.constant 0 : index
    %47 = vector.load %arg6[%c2, %c0_29, %c0_30] : memref<18x128x128xf32, #tpu.memory_space<vmem>>, vector<1x128x128xf32>
    %48 = vector.shape_cast %47 : vector<1x128x128xf32> to vector<128x128xf32>
    %cst_31 = arith.constant dense<0.000000e+00> : vector<16x128xf32>
    %49 = tpu.matmul %46, %48, %cst_31 {dimension_numbers = #tpu.dot_dimension_numbers<[1], [0], [0], [1], [0, 0, 1, 1], [], []>} : vector<16x128xf32>, vector<128x128xf32>, vector<16x128xf32> -> vector<16x128xf32>
    %c1_32 = arith.constant 1 : index
    %c0_33 = arith.constant 0 : index
    %50 = vector.load %arg7[%c1_32, %c0_33] : memref<9x128xf32, #tpu.memory_space<vmem>>, vector<1x128xf32>
    %51 = vector.broadcast %50 : vector<1x128xf32> to vector<16x128xf32>
    %52 = arith.addf %49, %51 : vector<16x128xf32>
    %cst_34 = arith.constant 0.000000e+00 : f32
    %53 = vector.broadcast %cst_34 : f32 to vector<16x128xf32>
    %54 = arith.maximumf %52, %53 : vector<16x128xf32>
    %55 = math.absf %52 : vector<16x128xf32>
    %cst_35 = arith.constant 0.000000e+00 : f32
    %56 = vector.broadcast %cst_35 : f32 to vector<16x128xf32>
    %57 = arith.subf %56, %55 : vector<16x128xf32>
    %58 = math.exp %57 : vector<16x128xf32>
    %cst_36 = arith.constant 1.000000e+00 : f32
    %59 = vector.broadcast %cst_36 : f32 to vector<16x128xf32>
    %60 = arith.addf %59, %58 : vector<16x128xf32>
    %61 = math.log %60 : vector<16x128xf32>
    %62 = arith.addf %54, %61 : vector<16x128xf32>
    %63 = math.tanh %62 : vector<16x128xf32>
    %64 = arith.mulf %52, %63 : vector<16x128xf32>
    %65 = tpu.iota {dimensions = array<i32: 1>} : vector<24x8xi32>
    %c0_37 = arith.constant 0 : index
    %c0_38 = arith.constant 0 : index
    %66 = vector.load %arg5[%c0_37, %c0_38] : memref<24x1xi32, #tpu.memory_space<vmem>>, vector<24x1xi32>
    %67 = vector.broadcast %66 : vector<24x1xi32> to vector<24x8xi32>
    %68 = arith.cmpi eq, %67, %65 : vector<24x8xi32>
    %cst_39 = arith.constant 1.000000e+00 : f32
    %cst_40 = arith.constant 0.000000e+00 : f32
    %69 = vector.broadcast %cst_39 : f32 to vector<24x8xf32>
    %70 = vector.broadcast %cst_40 : f32 to vector<24x8xf32>
    %71 = arith.select %68, %69, %70 : vector<24x8xi1>, vector<24x8xf32>
    %c0_41 = arith.constant 0 : index
    %c0_42 = arith.constant 0 : index
    %72 = vector.load %arg8[%c0_41, %c0_42] : memref<1x8xf32, #tpu.memory_space<vmem>>, vector<1x8xf32>
    %73 = vector.broadcast %72 : vector<1x8xf32> to vector<24x8xf32>
    %74 = arith.mulf %71, %73 : vector<24x8xf32>
    %cst_43 = arith.constant dense<0.000000e+00> : vector<24xf32>
    %75 = vector.multi_reduction <add>, %74, %cst_43 [1] : vector<24x8xf32> to vector<24xf32>
    %76 = vector.shape_cast %75 : vector<24xf32> to vector<24x1xf32>
    %c0_44 = arith.constant 0 : index
    %c0_45 = arith.constant 0 : index
    %77 = vector.load %arg9[%c0_44, %c0_45] : memref<1x1xf32, #tpu.memory_space<vmem>>, vector<1x1xf32>
    %78 = vector.broadcast %77 : vector<1x1xf32> to vector<24x1xf32>
    %79 = arith.addf %76, %78 : vector<24x1xf32>
    %80 = vector.broadcast %79 : vector<24x1xf32> to vector<24x128xf32>
    %81 = arith.mulf %80, %22 : vector<24x128xf32>
    %c3 = arith.constant 3 : index
    %c0_46 = arith.constant 0 : index
    %c0_47 = arith.constant 0 : index
    %82 = vector.load %arg6[%c3, %c0_46, %c0_47] : memref<18x128x128xf32, #tpu.memory_space<vmem>>, vector<1x128x128xf32>
    %83 = vector.shape_cast %82 : vector<1x128x128xf32> to vector<128x128xf32>
    %cst_48 = arith.constant dense<0.000000e+00> : vector<24x128xf32>
    %84 = tpu.matmul %81, %83, %cst_48 {dimension_numbers = #tpu.dot_dimension_numbers<[1], [0], [0], [1], [0, 0, 1, 1], [], []>} : vector<24x128xf32>, vector<128x128xf32>, vector<24x128xf32> -> vector<24x128xf32>
    %85 = vector.broadcast %79 : vector<24x1xf32> to vector<24x128xf32>
    %86 = arith.mulf %85, %23 : vector<24x128xf32>
    %c4 = arith.constant 4 : index
    %c0_49 = arith.constant 0 : index
    %c0_50 = arith.constant 0 : index
    %87 = vector.load %arg6[%c4, %c0_49, %c0_50] : memref<18x128x128xf32, #tpu.memory_space<vmem>>, vector<1x128x128xf32>
    %88 = vector.shape_cast %87 : vector<1x128x128xf32> to vector<128x128xf32>
    %cst_51 = arith.constant dense<0.000000e+00> : vector<24x128xf32>
    %89 = tpu.matmul %86, %88, %cst_51 {dimension_numbers = #tpu.dot_dimension_numbers<[1], [0], [0], [1], [0, 0, 1, 1], [], []>} : vector<24x128xf32>, vector<128x128xf32>, vector<24x128xf32> -> vector<24x128xf32>
    %90 = arith.addf %84, %89 : vector<24x128xf32>
    %c2_52 = arith.constant 2 : index
    %c0_53 = arith.constant 0 : index
    %91 = vector.load %arg7[%c2_52, %c0_53] : memref<9x128xf32, #tpu.memory_space<vmem>>, vector<1x128xf32>
    %92 = vector.broadcast %91 : vector<1x128xf32> to vector<24x128xf32>
    %93 = arith.addf %90, %92 : vector<24x128xf32>
    %cst_54 = arith.constant 0.000000e+00 : f32
    %94 = vector.broadcast %cst_54 : f32 to vector<24x128xf32>
    %95 = arith.maximumf %93, %94 : vector<24x128xf32>
    %96 = math.absf %93 : vector<24x128xf32>
    %cst_55 = arith.constant 0.000000e+00 : f32
    %97 = vector.broadcast %cst_55 : f32 to vector<24x128xf32>
    %98 = arith.subf %97, %96 : vector<24x128xf32>
    %99 = math.exp %98 : vector<24x128xf32>
    %cst_56 = arith.constant 1.000000e+00 : f32
    %100 = vector.broadcast %cst_56 : f32 to vector<24x128xf32>
    %101 = arith.addf %100, %99 : vector<24x128xf32>
    %102 = math.log %101 : vector<24x128xf32>
    %103 = arith.addf %95, %102 : vector<24x128xf32>
    %104 = math.tanh %103 : vector<24x128xf32>
    %105 = arith.mulf %93, %104 : vector<24x128xf32>
    %cst_57 = arith.constant dense<0.000000e+00> : vector<16x128xf32>
    %106 = tpu.matmul %21, %105, %cst_57 {dimension_numbers = #tpu.dot_dimension_numbers<[1], [0], [0], [1], [0, 0, 1, 1], [], []>} : vector<16x24xf32>, vector<24x128xf32>, vector<16x128xf32> -> vector<16x128xf32>
    %c5 = arith.constant 5 : index
    %c0_58 = arith.constant 0 : index
    %c0_59 = arith.constant 0 : index
    %107 = vector.load %arg6[%c5, %c0_58, %c0_59] : memref<18x128x128xf32, #tpu.memory_space<vmem>>, vector<1x128x128xf32>
    %108 = vector.shape_cast %107 : vector<1x128x128xf32> to vector<128x128xf32>
    %cst_60 = arith.constant dense<0.000000e+00> : vector<16x128xf32>
    %109 = tpu.matmul %106, %108, %cst_60 {dimension_numbers = #tpu.dot_dimension_numbers<[1], [0], [0], [1], [0, 0, 1, 1], [], []>} : vector<16x128xf32>, vector<128x128xf32>, vector<16x128xf32> -> vector<16x128xf32>
    %c3_61 = arith.constant 3 : index
    %c0_62 = arith.constant 0 : index
    %110 = vector.load %arg7[%c3_61, %c0_62] : memref<9x128xf32, #tpu.memory_space<vmem>>, vector<1x128xf32>
    %111 = vector.broadcast %110 : vector<1x128xf32> to vector<16x128xf32>
    %112 = arith.addf %109, %111 : vector<16x128xf32>
    %cst_63 = arith.constant 0.000000e+00 : f32
    %113 = vector.broadcast %cst_63 : f32 to vector<16x128xf32>
    %114 = arith.maximumf %112, %113 : vector<16x128xf32>
    %115 = math.absf %112 : vector<16x128xf32>
    %cst_64 = arith.constant 0.000000e+00 : f32
    %116 = vector.broadcast %cst_64 : f32 to vector<16x128xf32>
    %117 = arith.subf %116, %115 : vector<16x128xf32>
    %118 = math.exp %117 : vector<16x128xf32>
    %cst_65 = arith.constant 1.000000e+00 : f32
    %119 = vector.broadcast %cst_65 : f32 to vector<16x128xf32>
    %120 = arith.addf %119, %118 : vector<16x128xf32>
    %121 = math.log %120 : vector<16x128xf32>
    %122 = arith.addf %114, %121 : vector<16x128xf32>
    %123 = math.tanh %122 : vector<16x128xf32>
    %124 = arith.mulf %112, %123 : vector<16x128xf32>
    %cst_66 = arith.constant dense<0.000000e+00> : vector<24x128xf32>
    %125 = tpu.matmul %8, %1, %cst_66 {dimension_numbers = #tpu.dot_dimension_numbers<[1], [0], [0], [1], [0, 0, 1, 1], [], []>} : vector<24x16xf32>, vector<16x128xf32>, vector<24x128xf32> -> vector<24x128xf32>
    %cst_67 = arith.constant dense<0.000000e+00> : vector<24x128xf32>
    %126 = tpu.matmul %14, %1, %cst_67 {dimension_numbers = #tpu.dot_dimension_numbers<[1], [0], [0], [1], [0, 0, 1, 1], [], []>} : vector<24x16xf32>, vector<16x128xf32>, vector<24x128xf32> -> vector<24x128xf32>
    %127 = arith.subf %125, %126 : vector<24x128xf32>
    %128 = arith.mulf %127, %127 : vector<24x128xf32>
    %cst_68 = arith.constant dense<0.000000e+00> : vector<24xf32>
    %129 = vector.multi_reduction <add>, %128, %cst_68 [1] : vector<24x128xf32> to vector<24xf32>
    %130 = vector.shape_cast %129 : vector<24xf32> to vector<24x1xf32>
    %131 = vector.broadcast %130 : vector<24x1xf32> to vector<24x128xf32>
    %132 = arith.mulf %131, %22 : vector<24x128xf32>
    %c6 = arith.constant 6 : index
    %c0_69 = arith.constant 0 : index
    %c0_70 = arith.constant 0 : index
    %133 = vector.load %arg6[%c6, %c0_69, %c0_70] : memref<18x128x128xf32, #tpu.memory_space<vmem>>, vector<1x128x128xf32>
    %134 = vector.shape_cast %133 : vector<1x128x128xf32> to vector<128x128xf32>
    %cst_71 = arith.constant dense<0.000000e+00> : vector<24x128xf32>
    %135 = tpu.matmul %132, %134, %cst_71 {dimension_numbers = #tpu.dot_dimension_numbers<[1], [0], [0], [1], [0, 0, 1, 1], [], []>} : vector<24x128xf32>, vector<128x128xf32>, vector<24x128xf32> -> vector<24x128xf32>
    %136 = vector.broadcast %130 : vector<24x1xf32> to vector<24x128xf32>
    %137 = arith.mulf %136, %23 : vector<24x128xf32>
    %c7 = arith.constant 7 : index
    %c0_72 = arith.constant 0 : index
    %c0_73 = arith.constant 0 : index
    %138 = vector.load %arg6[%c7, %c0_72, %c0_73] : memref<18x128x128xf32, #tpu.memory_space<vmem>>, vector<1x128x128xf32>
    %139 = vector.shape_cast %138 : vector<1x128x128xf32> to vector<128x128xf32>
    %cst_74 = arith.constant dense<0.000000e+00> : vector<24x128xf32>
    %140 = tpu.matmul %137, %139, %cst_74 {dimension_numbers = #tpu.dot_dimension_numbers<[1], [0], [0], [1], [0, 0, 1, 1], [], []>} : vector<24x128xf32>, vector<128x128xf32>, vector<24x128xf32> -> vector<24x128xf32>
    %141 = arith.addf %135, %140 : vector<24x128xf32>
    %c4_75 = arith.constant 4 : index
    %c0_76 = arith.constant 0 : index
    %142 = vector.load %arg7[%c4_75, %c0_76] : memref<9x128xf32, #tpu.memory_space<vmem>>, vector<1x128xf32>
    %143 = vector.broadcast %142 : vector<1x128xf32> to vector<24x128xf32>
    %144 = arith.addf %141, %143 : vector<24x128xf32>
    %cst_77 = arith.constant dense<0.000000e+00> : vector<16x128xf32>
    %145 = tpu.matmul %21, %144, %cst_77 {dimension_numbers = #tpu.dot_dimension_numbers<[1], [0], [0], [1], [0, 0, 1, 1], [], []>} : vector<16x24xf32>, vector<24x128xf32>, vector<16x128xf32> -> vector<16x128xf32>
    %c8 = arith.constant 8 : index
    %c0_78 = arith.constant 0 : index
    %c0_79 = arith.constant 0 : index
    %146 = vector.load %arg6[%c8, %c0_78, %c0_79] : memref<18x128x128xf32, #tpu.memory_space<vmem>>, vector<1x128x128xf32>
    %147 = vector.shape_cast %146 : vector<1x128x128xf32> to vector<128x128xf32>
    %cst_80 = arith.constant dense<0.000000e+00> : vector<16x128xf32>
    %148 = tpu.matmul %145, %147, %cst_80 {dimension_numbers = #tpu.dot_dimension_numbers<[1], [0], [0], [1], [0, 0, 1, 1], [], []>} : vector<16x128xf32>, vector<128x128xf32>, vector<16x128xf32> -> vector<16x128xf32>
    %c5_81 = arith.constant 5 : index
    %c0_82 = arith.constant 0 : index
    %149 = vector.load %arg7[%c5_81, %c0_82] : memref<9x128xf32, #tpu.memory_space<vmem>>, vector<1x128xf32>
    %150 = vector.broadcast %149 : vector<1x128xf32> to vector<16x128xf32>
    %151 = arith.addf %148, %150 : vector<16x128xf32>
    %cst_83 = arith.constant 0.000000e+00 : f32
    %152 = vector.broadcast %cst_83 : f32 to vector<16x128xf32>
    %153 = arith.maximumf %151, %152 : vector<16x128xf32>
    %154 = math.absf %151 : vector<16x128xf32>
    %cst_84 = arith.constant 0.000000e+00 : f32
    %155 = vector.broadcast %cst_84 : f32 to vector<16x128xf32>
    %156 = arith.subf %155, %154 : vector<16x128xf32>
    %157 = math.exp %156 : vector<16x128xf32>
    %cst_85 = arith.constant 1.000000e+00 : f32
    %158 = vector.broadcast %cst_85 : f32 to vector<16x128xf32>
    %159 = arith.addf %158, %157 : vector<16x128xf32>
    %160 = math.log %159 : vector<16x128xf32>
    %161 = arith.addf %153, %160 : vector<16x128xf32>
    %162 = math.tanh %161 : vector<16x128xf32>
    %163 = arith.mulf %151, %162 : vector<16x128xf32>
    %c9 = arith.constant 9 : index
    %c0_86 = arith.constant 0 : index
    %c0_87 = arith.constant 0 : index
    %164 = vector.load %arg6[%c9, %c0_86, %c0_87] : memref<18x128x128xf32, #tpu.memory_space<vmem>>, vector<1x128x128xf32>
    %165 = vector.shape_cast %164 : vector<1x128x128xf32> to vector<128x128xf32>
    %cst_88 = arith.constant dense<0.000000e+00> : vector<16x128xf32>
    %166 = tpu.matmul %0, %165, %cst_88 {dimension_numbers = #tpu.dot_dimension_numbers<[1], [0], [0], [1], [0, 0, 1, 1], [], []>} : vector<16x128xf32>, vector<128x128xf32>, vector<16x128xf32> -> vector<16x128xf32>
    %c10 = arith.constant 10 : index
    %c0_89 = arith.constant 0 : index
    %c0_90 = arith.constant 0 : index
    %167 = vector.load %arg6[%c10, %c0_89, %c0_90] : memref<18x128x128xf32, #tpu.memory_space<vmem>>, vector<1x128x128xf32>
    %168 = vector.shape_cast %167 : vector<1x128x128xf32> to vector<128x128xf32>
    %cst_91 = arith.constant dense<0.000000e+00> : vector<16x128xf32>
    %169 = tpu.matmul %163, %168, %cst_91 {dimension_numbers = #tpu.dot_dimension_numbers<[1], [0], [0], [1], [0, 0, 1, 1], [], []>} : vector<16x128xf32>, vector<128x128xf32>, vector<16x128xf32> -> vector<16x128xf32>
    %170 = arith.addf %166, %169 : vector<16x128xf32>
    %c6_92 = arith.constant 6 : index
    %c0_93 = arith.constant 0 : index
    %171 = vector.load %arg7[%c6_92, %c0_93] : memref<9x128xf32, #tpu.memory_space<vmem>>, vector<1x128xf32>
    %172 = vector.broadcast %171 : vector<1x128xf32> to vector<16x128xf32>
    %173 = arith.addf %170, %172 : vector<16x128xf32>
    %cst_94 = arith.constant 0.000000e+00 : f32
    %174 = vector.broadcast %cst_94 : f32 to vector<16x128xf32>
    %175 = arith.maximumf %173, %174 : vector<16x128xf32>
    %176 = math.absf %173 : vector<16x128xf32>
    %cst_95 = arith.constant 0.000000e+00 : f32
    %177 = vector.broadcast %cst_95 : f32 to vector<16x128xf32>
    %178 = arith.subf %177, %176 : vector<16x128xf32>
    %179 = math.exp %178 : vector<16x128xf32>
    %cst_96 = arith.constant 1.000000e+00 : f32
    %180 = vector.broadcast %cst_96 : f32 to vector<16x128xf32>
    %181 = arith.addf %180, %179 : vector<16x128xf32>
    %182 = math.log %181 : vector<16x128xf32>
    %183 = arith.addf %175, %182 : vector<16x128xf32>
    %184 = math.tanh %183 : vector<16x128xf32>
    %185 = arith.mulf %173, %184 : vector<16x128xf32>
    %c11 = arith.constant 11 : index
    %c0_97 = arith.constant 0 : index
    %c0_98 = arith.constant 0 : index
    %186 = vector.load %arg6[%c11, %c0_97, %c0_98] : memref<18x128x128xf32, #tpu.memory_space<vmem>>, vector<1x128x128xf32>
    %187 = vector.shape_cast %186 : vector<1x128x128xf32> to vector<128x128xf32>
    %cst_99 = arith.constant dense<0.000000e+00> : vector<16x128xf32>
    %188 = tpu.matmul %0, %187, %cst_99 {dimension_numbers = #tpu.dot_dimension_numbers<[1], [0], [0], [1], [0, 0, 1, 1], [], []>} : vector<16x128xf32>, vector<128x128xf32>, vector<16x128xf32> -> vector<16x128xf32>
    %cst_100 = arith.constant 0.000000e+00 : f32
    %189 = vector.broadcast %cst_100 : f32 to vector<16x128xf32>
    %190 = arith.maximumf %188, %189 : vector<16x128xf32>
    %191 = math.absf %188 : vector<16x128xf32>
    %cst_101 = arith.constant 0.000000e+00 : f32
    %192 = vector.broadcast %cst_101 : f32 to vector<16x128xf32>
    %193 = arith.subf %192, %191 : vector<16x128xf32>
    %194 = math.exp %193 : vector<16x128xf32>
    %cst_102 = arith.constant 1.000000e+00 : f32
    %195 = vector.broadcast %cst_102 : f32 to vector<16x128xf32>
    %196 = arith.addf %195, %194 : vector<16x128xf32>
    %197 = math.log %196 : vector<16x128xf32>
    %198 = arith.addf %190, %197 : vector<16x128xf32>
    %199 = math.tanh %198 : vector<16x128xf32>
    %200 = arith.mulf %188, %199 : vector<16x128xf32>
    %cst_103 = arith.constant 0.000000e+00 : f32
    %201 = vector.broadcast %cst_103 : f32 to vector<16x128xf32>
    %202 = arith.maximumf %200, %201 : vector<16x128xf32>
    %203 = math.absf %200 : vector<16x128xf32>
    %cst_104 = arith.constant 0.000000e+00 : f32
    %204 = vector.broadcast %cst_104 : f32 to vector<16x128xf32>
    %205 = arith.subf %204, %203 : vector<16x128xf32>
    %206 = math.exp %205 : vector<16x128xf32>
    %cst_105 = arith.constant 1.000000e+00 : f32
    %207 = vector.broadcast %cst_105 : f32 to vector<16x128xf32>
    %208 = arith.addf %207, %206 : vector<16x128xf32>
    %209 = math.log %208 : vector<16x128xf32>
    %210 = arith.addf %202, %209 : vector<16x128xf32>
    %211 = math.tanh %210 : vector<16x128xf32>
    %212 = arith.mulf %200, %211 : vector<16x128xf32>
    %c15 = arith.constant 15 : index
    %c0_106 = arith.constant 0 : index
    %c0_107 = arith.constant 0 : index
    %213 = vector.load %arg6[%c15, %c0_106, %c0_107] : memref<18x128x128xf32, #tpu.memory_space<vmem>>, vector<1x128x128xf32>
    %214 = vector.shape_cast %213 : vector<1x128x128xf32> to vector<128x128xf32>
    %cst_108 = arith.constant dense<0.000000e+00> : vector<16x128xf32>
    %215 = tpu.matmul %212, %214, %cst_108 {dimension_numbers = #tpu.dot_dimension_numbers<[1], [0], [0], [1], [0, 0, 1, 1], [], []>} : vector<16x128xf32>, vector<128x128xf32>, vector<16x128xf32> -> vector<16x128xf32>
    %c12 = arith.constant 12 : index
    %c0_109 = arith.constant 0 : index
    %c0_110 = arith.constant 0 : index
    %216 = vector.load %arg6[%c12, %c0_109, %c0_110] : memref<18x128x128xf32, #tpu.memory_space<vmem>>, vector<1x128x128xf32>
    %217 = vector.shape_cast %216 : vector<1x128x128xf32> to vector<128x128xf32>
    %cst_111 = arith.constant dense<0.000000e+00> : vector<16x128xf32>
    %218 = tpu.matmul %64, %217, %cst_111 {dimension_numbers = #tpu.dot_dimension_numbers<[1], [0], [0], [1], [0, 0, 1, 1], [], []>} : vector<16x128xf32>, vector<128x128xf32>, vector<16x128xf32> -> vector<16x128xf32>
    %cst_112 = arith.constant 0.000000e+00 : f32
    %219 = vector.broadcast %cst_112 : f32 to vector<16x128xf32>
    %220 = arith.maximumf %218, %219 : vector<16x128xf32>
    %221 = math.absf %218 : vector<16x128xf32>
    %cst_113 = arith.constant 0.000000e+00 : f32
    %222 = vector.broadcast %cst_113 : f32 to vector<16x128xf32>
    %223 = arith.subf %222, %221 : vector<16x128xf32>
    %224 = math.exp %223 : vector<16x128xf32>
    %cst_114 = arith.constant 1.000000e+00 : f32
    %225 = vector.broadcast %cst_114 : f32 to vector<16x128xf32>
    %226 = arith.addf %225, %224 : vector<16x128xf32>
    %227 = math.log %226 : vector<16x128xf32>
    %228 = arith.addf %220, %227 : vector<16x128xf32>
    %229 = math.tanh %228 : vector<16x128xf32>
    %230 = arith.mulf %218, %229 : vector<16x128xf32>
    %cst_115 = arith.constant 0.000000e+00 : f32
    %231 = vector.broadcast %cst_115 : f32 to vector<16x128xf32>
    %232 = arith.maximumf %230, %231 : vector<16x128xf32>
    %233 = math.absf %230 : vector<16x128xf32>
    %cst_116 = arith.constant 0.000000e+00 : f32
    %234 = vector.broadcast %cst_116 : f32 to vector<16x128xf32>
    %235 = arith.subf %234, %233 : vector<16x128xf32>
    %236 = math.exp %235 : vector<16x128xf32>
    %cst_117 = arith.constant 1.000000e+00 : f32
    %237 = vector.broadcast %cst_117 : f32 to vector<16x128xf32>
    %238 = arith.addf %237, %236 : vector<16x128xf32>
    %239 = math.log %238 : vector<16x128xf32>
    %240 = arith.addf %232, %239 : vector<16x128xf32>
    %241 = math.tanh %240 : vector<16x128xf32>
    %242 = arith.mulf %230, %241 : vector<16x128xf32>
    %c16 = arith.constant 16 : index
    %c0_118 = arith.constant 0 : index
    %c0_119 = arith.constant 0 : index
    %243 = vector.load %arg6[%c16, %c0_118, %c0_119] : memref<18x128x128xf32, #tpu.memory_space<vmem>>, vector<1x128x128xf32>
    %244 = vector.shape_cast %243 : vector<1x128x128xf32> to vector<128x128xf32>
    %cst_120 = arith.constant dense<0.000000e+00> : vector<16x128xf32>
    %245 = tpu.matmul %242, %244, %cst_120 {dimension_numbers = #tpu.dot_dimension_numbers<[1], [0], [0], [1], [0, 0, 1, 1], [], []>} : vector<16x128xf32>, vector<128x128xf32>, vector<16x128xf32> -> vector<16x128xf32>
    %246 = arith.addf %215, %245 : vector<16x128xf32>
    %c13 = arith.constant 13 : index
    %c0_121 = arith.constant 0 : index
    %c0_122 = arith.constant 0 : index
    %247 = vector.load %arg6[%c13, %c0_121, %c0_122] : memref<18x128x128xf32, #tpu.memory_space<vmem>>, vector<1x128x128xf32>
    %248 = vector.shape_cast %247 : vector<1x128x128xf32> to vector<128x128xf32>
    %cst_123 = arith.constant dense<0.000000e+00> : vector<16x128xf32>
    %249 = tpu.matmul %124, %248, %cst_123 {dimension_numbers = #tpu.dot_dimension_numbers<[1], [0], [0], [1], [0, 0, 1, 1], [], []>} : vector<16x128xf32>, vector<128x128xf32>, vector<16x128xf32> -> vector<16x128xf32>
    %cst_124 = arith.constant 0.000000e+00 : f32
    %250 = vector.broadcast %cst_124 : f32 to vector<16x128xf32>
    %251 = arith.maximumf %249, %250 : vector<16x128xf32>
    %252 = math.absf %249 : vector<16x128xf32>
    %cst_125 = arith.constant 0.000000e+00 : f32
    %253 = vector.broadcast %cst_125 : f32 to vector<16x128xf32>
    %254 = arith.subf %253, %252 : vector<16x128xf32>
    %255 = math.exp %254 : vector<16x128xf32>
    %cst_126 = arith.constant 1.000000e+00 : f32
    %256 = vector.broadcast %cst_126 : f32 to vector<16x128xf32>
    %257 = arith.addf %256, %255 : vector<16x128xf32>
    %258 = math.log %257 : vector<16x128xf32>
    %259 = arith.addf %251, %258 : vector<16x128xf32>
    %260 = math.tanh %259 : vector<16x128xf32>
    %261 = arith.mulf %249, %260 : vector<16x128xf32>
    %cst_127 = arith.constant 0.000000e+00 : f32
    %262 = vector.broadcast %cst_127 : f32 to vector<16x128xf32>
    %263 = arith.maximumf %261, %262 : vector<16x128xf32>
    %264 = math.absf %261 : vector<16x128xf32>
    %cst_128 = arith.constant 0.000000e+00 : f32
    %265 = vector.broadcast %cst_128 : f32 to vector<16x128xf32>
    %266 = arith.subf %265, %264 : vector<16x128xf32>
    %267 = math.exp %266 : vector<16x128xf32>
    %cst_129 = arith.constant 1.000000e+00 : f32
    %268 = vector.broadcast %cst_129 : f32 to vector<16x128xf32>
    %269 = arith.addf %268, %267 : vector<16x128xf32>
    %270 = math.log %269 : vector<16x128xf32>
    %271 = arith.addf %263, %270 : vector<16x128xf32>
    %272 = math.tanh %271 : vector<16x128xf32>
    %273 = arith.mulf %261, %272 : vector<16x128xf32>
    %c16_130 = arith.constant 16 : index
    %c0_131 = arith.constant 0 : index
    %c0_132 = arith.constant 0 : index
    %274 = vector.load %arg6[%c16_130, %c0_131, %c0_132] : memref<18x128x128xf32, #tpu.memory_space<vmem>>, vector<1x128x128xf32>
    %275 = vector.shape_cast %274 : vector<1x128x128xf32> to vector<128x128xf32>
    %cst_133 = arith.constant dense<0.000000e+00> : vector<16x128xf32>
    %276 = tpu.matmul %273, %275, %cst_133 {dimension_numbers = #tpu.dot_dimension_numbers<[1], [0], [0], [1], [0, 0, 1, 1], [], []>} : vector<16x128xf32>, vector<128x128xf32>, vector<16x128xf32> -> vector<16x128xf32>
    %277 = arith.addf %215, %276 : vector<16x128xf32>
    %c14 = arith.constant 14 : index
    %c0_134 = arith.constant 0 : index
    %c0_135 = arith.constant 0 : index
    %278 = vector.load %arg6[%c14, %c0_134, %c0_135] : memref<18x128x128xf32, #tpu.memory_space<vmem>>, vector<1x128x128xf32>
    %279 = vector.shape_cast %278 : vector<1x128x128xf32> to vector<128x128xf32>
    %cst_136 = arith.constant dense<0.000000e+00> : vector<16x128xf32>
    %280 = tpu.matmul %185, %279, %cst_136 {dimension_numbers = #tpu.dot_dimension_numbers<[1], [0], [0], [1], [0, 0, 1, 1], [], []>} : vector<16x128xf32>, vector<128x128xf32>, vector<16x128xf32> -> vector<16x128xf32>
    %cst_137 = arith.constant 0.000000e+00 : f32
    %281 = vector.broadcast %cst_137 : f32 to vector<16x128xf32>
    %282 = arith.maximumf %280, %281 : vector<16x128xf32>
    %283 = math.absf %280 : vector<16x128xf32>
    %cst_138 = arith.constant 0.000000e+00 : f32
    %284 = vector.broadcast %cst_138 : f32 to vector<16x128xf32>
    %285 = arith.subf %284, %283 : vector<16x128xf32>
    %286 = math.exp %285 : vector<16x128xf32>
    %cst_139 = arith.constant 1.000000e+00 : f32
    %287 = vector.broadcast %cst_139 : f32 to vector<16x128xf32>
    %288 = arith.addf %287, %286 : vector<16x128xf32>
    %289 = math.log %288 : vector<16x128xf32>
    %290 = arith.addf %282, %289 : vector<16x128xf32>
    %291 = math.tanh %290 : vector<16x128xf32>
    %292 = arith.mulf %280, %291 : vector<16x128xf32>
    %cst_140 = arith.constant 0.000000e+00 : f32
    %293 = vector.broadcast %cst_140 : f32 to vector<16x128xf32>
    %294 = arith.maximumf %292, %293 : vector<16x128xf32>
    %295 = math.absf %292 : vector<16x128xf32>
    %cst_141 = arith.constant 0.000000e+00 : f32
    %296 = vector.broadcast %cst_141 : f32 to vector<16x128xf32>
    %297 = arith.subf %296, %295 : vector<16x128xf32>
    %298 = math.exp %297 : vector<16x128xf32>
    %cst_142 = arith.constant 1.000000e+00 : f32
    %299 = vector.broadcast %cst_142 : f32 to vector<16x128xf32>
    %300 = arith.addf %299, %298 : vector<16x128xf32>
    %301 = math.log %300 : vector<16x128xf32>
    %302 = arith.addf %294, %301 : vector<16x128xf32>
    %303 = math.tanh %302 : vector<16x128xf32>
    %304 = arith.mulf %292, %303 : vector<16x128xf32>
    %c16_143 = arith.constant 16 : index
    %c0_144 = arith.constant 0 : index
    %c0_145 = arith.constant 0 : index
    %305 = vector.load %arg6[%c16_143, %c0_144, %c0_145] : memref<18x128x128xf32, #tpu.memory_space<vmem>>, vector<1x128x128xf32>
    %306 = vector.shape_cast %305 : vector<1x128x128xf32> to vector<128x128xf32>
    %cst_146 = arith.constant dense<0.000000e+00> : vector<16x128xf32>
    %307 = tpu.matmul %304, %306, %cst_146 {dimension_numbers = #tpu.dot_dimension_numbers<[1], [0], [0], [1], [0, 0, 1, 1], [], []>} : vector<16x128xf32>, vector<128x128xf32>, vector<16x128xf32> -> vector<16x128xf32>
    %308 = arith.addf %215, %307 : vector<16x128xf32>
    %309 = arith.maximumf %246, %277 : vector<16x128xf32>
    %310 = arith.maximumf %309, %308 : vector<16x128xf32>
    %311 = arith.subf %246, %310 : vector<16x128xf32>
    %312 = math.exp %311 : vector<16x128xf32>
    %313 = arith.subf %277, %310 : vector<16x128xf32>
    %314 = math.exp %313 : vector<16x128xf32>
    %315 = arith.subf %308, %310 : vector<16x128xf32>
    %316 = math.exp %315 : vector<16x128xf32>
    %317 = arith.mulf %312, %64 : vector<16x128xf32>
    %318 = arith.mulf %314, %124 : vector<16x128xf32>
    %319 = arith.addf %317, %318 : vector<16x128xf32>
    %320 = arith.mulf %316, %185 : vector<16x128xf32>
    %321 = arith.addf %319, %320 : vector<16x128xf32>
    %322 = arith.addf %312, %314 : vector<16x128xf32>
    %323 = arith.addf %322, %316 : vector<16x128xf32>
    %324 = arith.divf %321, %323 : vector<16x128xf32>
    %c17 = arith.constant 17 : index
    %c0_147 = arith.constant 0 : index
    %c0_148 = arith.constant 0 : index
    %325 = vector.load %arg6[%c17, %c0_147, %c0_148] : memref<18x128x128xf32, #tpu.memory_space<vmem>>, vector<1x128x128xf32>
    %326 = vector.shape_cast %325 : vector<1x128x128xf32> to vector<128x128xf32>
    %cst_149 = arith.constant dense<0.000000e+00> : vector<16x128xf32>
    %327 = tpu.matmul %324, %326, %cst_149 {dimension_numbers = #tpu.dot_dimension_numbers<[1], [0], [0], [1], [0, 0, 1, 1], [], []>} : vector<16x128xf32>, vector<128x128xf32>, vector<16x128xf32> -> vector<16x128xf32>
    %328 = tpu.iota {dimensions = array<i32: 0>} : vector<16x128xi32>
    %c12_i32 = arith.constant 12 : i32
    %329 = vector.broadcast %c12_i32 : i32 to vector<16x128xi32>
    %330 = arith.cmpi slt, %328, %329 : vector<16x128xi32>
    %cst_150 = arith.constant 0.000000e+00 : f32
    %331 = vector.broadcast %cst_150 : f32 to vector<16x128xf32>
    %332 = arith.select %330, %327, %331 : vector<16x128xi1>, vector<16x128xf32>
    %cst_151 = arith.constant dense<0.000000e+00> : vector<128xf32>
    %333 = vector.multi_reduction <add>, %332, %cst_151 [0] : vector<16x128xf32> to vector<128xf32>
    %334 = vector.shape_cast %333 : vector<128xf32> to vector<1x128xf32>
    %cst_152 = arith.constant 0.0833333358 : f32
    %335 = vector.broadcast %cst_152 : f32 to vector<1x128xf32>
    %336 = arith.mulf %334, %335 : vector<1x128xf32>
    %337 = arith.mulf %332, %332 : vector<16x128xf32>
    %cst_153 = arith.constant dense<0.000000e+00> : vector<128xf32>
    %338 = vector.multi_reduction <add>, %337, %cst_153 [0] : vector<16x128xf32> to vector<128xf32>
    %339 = vector.shape_cast %338 : vector<128xf32> to vector<1x128xf32>
    %cst_154 = arith.constant 0.0833333358 : f32
    %340 = vector.broadcast %cst_154 : f32 to vector<1x128xf32>
    %341 = arith.mulf %339, %340 : vector<1x128xf32>
    %342 = arith.mulf %336, %336 : vector<1x128xf32>
    %343 = arith.subf %341, %342 : vector<1x128xf32>
    %cst_155 = arith.constant 0.000000e+00 : f32
    %344 = vector.broadcast %cst_155 : f32 to vector<1x128xf32>
    %345 = arith.maximumf %343, %344 : vector<1x128xf32>
    %c7_156 = arith.constant 7 : index
    %c0_157 = arith.constant 0 : index
    %346 = vector.load %arg7[%c7_156, %c0_157] : memref<9x128xf32, #tpu.memory_space<vmem>>, vector<1x128xf32>
    %cst_158 = arith.constant 9.99999974E-6 : f32
    %347 = vector.broadcast %cst_158 : f32 to vector<1x128xf32>
    %348 = arith.addf %345, %347 : vector<1x128xf32>
    %349 = math.rsqrt %348 : vector<1x128xf32>
    %350 = arith.mulf %346, %349 : vector<1x128xf32>
    %c8_159 = arith.constant 8 : index
    %c0_160 = arith.constant 0 : index
    %351 = vector.load %arg7[%c8_159, %c0_160] : memref<9x128xf32, #tpu.memory_space<vmem>>, vector<1x128xf32>
    %352 = arith.mulf %336, %350 : vector<1x128xf32>
    %353 = arith.subf %351, %352 : vector<1x128xf32>
    %354 = vector.broadcast %350 : vector<1x128xf32> to vector<16x128xf32>
    %355 = arith.mulf %327, %354 : vector<16x128xf32>
    %356 = vector.broadcast %353 : vector<1x128xf32> to vector<16x128xf32>
    %357 = arith.addf %355, %356 : vector<16x128xf32>
    %cst_161 = arith.constant 0.000000e+00 : f32
    %358 = vector.broadcast %cst_161 : f32 to vector<16x128xf32>
    %359 = arith.maximumf %357, %358 : vector<16x128xf32>
    %360 = math.absf %357 : vector<16x128xf32>
    %cst_162 = arith.constant 0.000000e+00 : f32
    %361 = vector.broadcast %cst_162 : f32 to vector<16x128xf32>
    %362 = arith.subf %361, %360 : vector<16x128xf32>
    %363 = math.exp %362 : vector<16x128xf32>
    %cst_163 = arith.constant 1.000000e+00 : f32
    %364 = vector.broadcast %cst_163 : f32 to vector<16x128xf32>
    %365 = arith.addf %364, %363 : vector<16x128xf32>
    %366 = math.log %365 : vector<16x128xf32>
    %367 = arith.addf %359, %366 : vector<16x128xf32>
    %368 = math.tanh %367 : vector<16x128xf32>
    %369 = arith.mulf %357, %368 : vector<16x128xf32>
    %c0_164 = arith.constant 0 : index
    %c0_165 = arith.constant 0 : index
    %370 = vector.load %arg10[%c0_164, %c0_165] : memref<16x128xf32, #tpu.memory_space<vmem>>, vector<16x128xf32>
    tpu.vector_store %arg10[%c0_164, %c0_165], %369 {strides = array<i32>} : memref<16x128xf32, #tpu.memory_space<vmem>>, vector<16x128xf32>,
    return
  }
}

</mosaic_0001>

<bundles_post_ra>
// kernel: tpu_custom_call.1
= control target key start
LH: loop header
LB: loop body
LE: loop exit
PB: predicated region body
PF: predicated region fallthrough
CT: control target
= control target key end

     0   :  { %s6034_s0 = inlined_call_operand.hbm [shape: f32[16,128], index: 0, kind: input, shape index: {}]   ;;  %s6035_s1 = inlined_call_operand.hbm [shape: f32[16,128], index: 1, kind: input, shape index: {}]   ;;  %s6036_s2 = inlined_call_operand.vmem [shape: s32[24,1], index: 2, kind: input, shape index: {}]   ;;  %s6037_s3 = inlined_call_operand.vmem [shape: s32[24,1], index: 3, kind: input, shape index: {}]   ;;  %s6038_s4 = inlined_call_operand.hbm [shape: s32[1,24], index: 4, kind: input, shape index: {}]   ;;  %s6039_s5 = inlined_call_operand.vmem [shape: s32[24,1], index: 5, kind: input, shape index: {}]   ;;  %s6040_s6 = inlined_call_operand.hbm [shape: f32[18,128,128], index: 6, kind: input, shape index: {}]   ;;  %s6041_s7 = inlined_call_operand.hbm [shape: f32[9,128], index: 7, kind: input, shape index: {}]   ;;  %s6042_s8 = inlined_call_operand.hbm [shape: f32[1,8], index: 8, kind: input, shape index: {}]   ;;  %s6043_s9 = inlined_call_operand.<no memory space> [shape: f32[1,1], index: 9, kind: input, shape index: {}]   ;;  %s6044_s10 = inlined_call_operand.hbm [shape: f32[16,128], index: 10, kind: output, shape index: {}]  }
   0x1   :  { %v15_v0 = vstv %s6043_s9 }
   0x2   :  { %16 = vst [vmem:[#allocation2] sm:$0x1] %v15_v0 }
   0x3   :  { %17 = vsyncpa [#allocation4], 0 }
   0x4   :  { %18 = vsyncpa [#allocation7], 0 }
   0x5   :  { %19 = vsyncpa [#allocation10], 0 }
   0x6   :  { %20 = vsyncpa [#allocation13], 0 }
   0x7   :  { %21 = vsyncpa [#allocation5], 0  ;;  %s5426_s15 = smov [#allocation6]   ;;  %s5427_s17 = smov [#allocation9]  }
   0x8   :  { %s39_s16 = sshll.u32 %s5426_s15, 4  ;;  %s67_s18 = sshll.u32 %s5427_s17, 4  ;;  %s40_s16 = int_to_ptr.vmem [resolvable:$true] %s39_s16  ;;  %s5497_s18 = int_to_ptr.vmem [resolvable:$true] %s67_s18 }
   0x9   :  { %s5262_s21 = scalar_lea.hbm %s6035_s1, 256 }
   0xa   :  { %p5263_p0 = scmp.ne.s32.totalorder %s6035_s1, %s5262_s21  ;;  %p5266_p1 = scmp.lt.u32.totalorder %s5262_s21, %s6035_s1 }
   0xc   :  { %p5268_p2 = pnand %p5266_p1, %p5263_p0 }
   0xe   :  { %5271 = shalt.err (!%p5268_p2)
}
   0xf   :  { %s5272_s25 = scalar_lea.vmem %s40_s16, 256  ;;  %p5277_p4 = scmp.lt.s32.totalorder %s40_s16, %s40_s16 }
  0x10   :  { %p5273_p3 = scmp.ne.s32.totalorder %s40_s16, %s5272_s25  ;;  %p5278_p5 = scmp.lt.s32.totalorder %s5272_s25, %s5272_s25 }
  0x12   :  { %p5279_p6 = por %p5278_p5, %p5277_p4 }
  0x14   :  { %p5280_p7 = pnand %p5279_p6, %p5273_p3 }
  0x16   :  { %5283 = shalt.err (!%p5280_p7)
}
  0x17   :  { %s5428_s26 = smov 128   ;;  %s5429_s27 = smov 8  }
  0x18   :  { %45 = dma.hbm_to_vmem [thread:$0]  %s6035_s1, 256, %s40_s16, [#allocation7], %s5428_s26, %s5428_s26, %s5429_s27  }
  0x19   :  { %s5284_s12 = scalar_lea.hbm %s6040_s6, 36864 }
  0x1a   :  { %p5285_p8 = scmp.ne.s32.totalorder %s6040_s6, %s5284_s12  ;;  %p5288_p9 = scmp.lt.u32.totalorder %s5284_s12, %s6040_s6 }
  0x1c   :  { %p5290_p10 = pnand %p5288_p9, %p5285_p8 }
  0x1e   :  { %5293 = shalt.err (!%p5290_p10)
}
  0x1f   :  { %s5294_s19 = scalar_lea.vmem %s5497_s18, 36864  ;;  %p5299_p12 = scmp.lt.s32.totalorder %s5497_s18, %s5497_s18 }
  0x20   :  { %p5295_p11 = scmp.ne.s32.totalorder %s5497_s18, %s5294_s19  ;;  %p5300_p13 = scmp.lt.s32.totalorder %s5294_s19, %s5294_s19 }
  0x22   :  { %p5301_p0 = por %p5300_p13, %p5299_p12 }
  0x24   :  { %p5302_p1 = pnand %p5301_p0, %p5295_p11 }
  0x26   :  { %5305 = shalt.err (!%p5302_p1)
}
  0x27   :  { %73 = dma.hbm_to_vmem [thread:$0]  %s6040_s6, 36864, %s5497_s18, [#allocation10], %s5428_s26, %s5428_s26, %s5429_s27  }
  0x28   :  { %s5430_s20 = smov [#allocation3]   ;;  %s5431_s22 = smov [#allocation8]  }
  0x29   :  { %s27_s21 = sshll.u32 %s5430_s20, 4  ;;  %s56_s23 = sshll.u32 %s5431_s22, 4  ;;  %s28_s21 = int_to_ptr.vmem [resolvable:$true] %s27_s21  ;;  %s57_s23 = int_to_ptr.vmem [resolvable:$true] %s56_s23 }
  0x2a   :  { %s5306_s25 = scalar_lea.hbm %s6034_s0, 256 }
  0x2b   :  { %p5307_p2 = scmp.ne.s32.totalorder %s6034_s0, %s5306_s25  ;;  %p5310_p3 = scmp.lt.u32.totalorder %s5306_s25, %s6034_s0 }
  0x2d   :  { %p5312_p4 = pnand %p5310_p3, %p5307_p2 }
  0x2f   :  { %5315 = shalt.err (!%p5312_p4)
}
  0x30   :  { %s5316_s6 = scalar_lea.vmem %s28_s21, 256  ;;  %p5321_p6 = scmp.lt.s32.totalorder %s28_s21, %s28_s21 }
  0x31   :  { %p5317_p5 = scmp.ne.s32.totalorder %s28_s21, %s5316_s6  ;;  %p5322_p7 = scmp.lt.s32.totalorder %s5316_s6, %s5316_s6 }
  0x33   :  { %p5323_p8 = por %p5322_p7, %p5321_p6 }
  0x35   :  { %p5324_p9 = pnand %p5323_p8, %p5317_p5 }
  0x37   :  { %5327 = shalt.err (!%p5324_p9)
}
  0x38   :  { %33 = dma.hbm_to_vmem [thread:$0]  %s6034_s0, 256, %s28_s21, [#allocation4], %s5428_s26, %s5428_s26, %s5429_s27  }
  0x39   :  { %s5328_s15 = scalar_lea.hbm %s6038_s4, 16 }
  0x3a   :  { %p5329_p10 = scmp.ne.s32.totalorder %s6038_s4, %s5328_s15  ;;  %p5332_p11 = scmp.lt.u32.totalorder %s5328_s15, %s6038_s4 }
  0x3c   :  { %p5334_p12 = pnand %p5332_p11, %p5329_p10 }
  0x3e   :  { %5337 = shalt.err (!%p5334_p12)
}
  0x3f   :  { %s5338_s20 = scalar_lea.vmem %s57_s23, 16  ;;  %s5342_s22 = scalar_lea.vmem %s57_s23, 32 }
  0x40   :  { %p5339_p13 = scmp.ne.s32.totalorder %s57_s23, %s5338_s20  ;;  %p5343_p0 = scmp.lt.s32.totalorder %s57_s23, %s57_s23 }
  0x41   :  { %p5344_p1 = scmp.lt.s32.totalorder %s5342_s22, %s5338_s20 }
  0x43   :  { %p5345_p2 = por %p5344_p1, %p5343_p0 }
  0x45   :  { %p5346_p3 = pnand %p5345_p2, %p5339_p13 }
  0x47   :  { %5349 = shalt.err (!%p5346_p3)
}
  0x48   :  { %59 = dma.hbm_to_vmem [thread:$0]  %s6038_s4, 16, %s57_s23, [#allocation7]  }
  0x49   :  { %s5432_s9 = smov [#allocation11]   ;;  %s5433_s25 = smov [#allocation12]  }
  0x4a   :  { %s79_s24 = sshll.u32 %s5432_s9, 4  ;;  %s92_s28 = sshll.u32 %s5433_s25, 4  ;;  %s80_s24 = int_to_ptr.vmem [resolvable:$true] %s79_s24  ;;  %s93_s28 = int_to_ptr.vmem [resolvable:$true] %s92_s28 }
  0x4b   :  { %s5350_s11 = scalar_lea.hbm %s6041_s7, 256 }
  0x4c   :  { %p5351_p4 = scmp.ne.s32.totalorder %s6041_s7, %s5350_s11  ;;  %p5354_p5 = scmp.lt.u32.totalorder %s5350_s11, %s6041_s7 }
  0x4e   :  { %p5356_p6 = pnand %p5354_p5, %p5351_p4 }
  0x50   :  { %5359 = shalt.err (!%p5356_p6)
}
  0x51   :  { %s5360_s4 = scalar_lea.vmem %s80_s24, 256  ;;  %p5365_p8 = scmp.lt.s32.totalorder %s80_s24, %s80_s24 }
  0x52   :  { %p5361_p7 = scmp.ne.s32.totalorder %s80_s24, %s5360_s4  ;;  %p5366_p9 = scmp.lt.s32.totalorder %s5360_s4, %s5360_s4 }
  0x54   :  { %p5367_p10 = por %p5366_p9, %p5365_p8 }
  0x56   :  { %p5368_p11 = pnand %p5367_p10, %p5361_p7 }
  0x58   :  { %5371 = shalt.err (!%p5368_p11)
}
  0x59   :  { %85 = dma.hbm_to_vmem [thread:$0]  %s6041_s7, 256, %s80_s24, [#allocation10], %s5428_s26, %s5428_s26, %s5429_s27  }
  0x5a   :  { %s5372_s19 = scalar_lea.hbm %s6042_s8, 16 }
  0x5b   :  { %p5373_p12 = scmp.ne.s32.totalorder %s6042_s8, %s5372_s19  ;;  %p5376_p13 = scmp.lt.u32.totalorder %s5372_s19, %s6042_s8 }
  0x5d   :  { %p5378_p0 = pnand %p5376_p13, %p5373_p12 }
  0x5f   :  { %5381 = shalt.err (!%p5378_p0)
}
  0x60   :  { %s5382_s0 = scalar_lea.vmem %s93_s28, 16  ;;  %s5386_s21 = scalar_lea.vmem %s93_s28, 32 }
  0x61   :  { %p5383_p1 = scmp.ne.s32.totalorder %s93_s28, %s5382_s0  ;;  %p5387_p2 = scmp.lt.s32.totalorder %s93_s28, %s93_s28 }
  0x62   :  { %p5388_p3 = scmp.lt.s32.totalorder %s5386_s21, %s5382_s0 }
  0x64   :  { %p5389_p4 = por %p5388_p3, %p5387_p2 }
  0x66   :  { %p5390_p5 = pnand %p5389_p4, %p5383_p1 }
  0x68   :  { %5393 = shalt.err (!%p5390_p5)
}
  0x69   :  { %95 = dma.hbm_to_vmem [thread:$0]  %s6042_s8, 16, %s93_s28, [#allocation13]  }
  0x6a   :  { %5416 = dma.done.wait [#allocation4], 256  }
  0x6b   :  { %5417 = vsyncadd [#allocation4], 4294967040 }
  0x6c   :  { %5418 = dma.done.wait [#allocation7], 272  }
  0x6d   :  { %5419 = vsyncadd [#allocation7], 4294967024 }
  0x6e   :  { %5420 = dma.done.wait [#allocation10], 37120  }
  0x6f   :  { %5421 = vsyncadd [#allocation10], 4294930176 }
  0x70   :  { %5422 = dma.done.wait [#allocation13], 16  }
  0x71   :  { %5423 = vsyncadd [#allocation13], 4294967280  ;;  %v5434_v1 = vmov 0   ;;  %v5435_v2 = vmov 0.0|0.0   ;;  %v123_v3 = vld [vmem:[%s6036_s2 + $0x8] sm:$0xff]  ;;  %v122_v4 = vld [vmem:[%s6036_s2] sm:$0xff]  ;;  %v120_v16 = vlaneseq }
  0x72   :  { %5049 = vset.pattern.permute.xlu1 %v5434_v1  ;;  %5048 = vset.pattern.permute.xlu0 %v5434_v1  ;;  %v141_v5 = vld [vmem:[%s6037_s3 + $0x8] sm:$0xff]  ;;  %v140_v6 = vld [vmem:[%s6037_s3] sm:$0xff]  ;;  %vm5436_vm0 = vmmov 0   ;;  %v5437_v7 = vmov 0.0   ;;  %v142_v11 = vld [vmem:[%s6037_s3 + $0x10] sm:$0xff]  ;;  %vm170_vm1 = vcmask 130048  }
  0x73   :  { %4420 = vmatprep.subr.bf16.mxu1 %v5435_v2  ;;  %4417 = vmatprep.subr.bf16.mxu0 %v5435_v2  ;;  %v116_v8 = vld [vmem:[#allocation3] sm:$0xff]  ;;  %v117_v9 = vld [vmem:[#allocation3 + $0x8] sm:$0xff]  ;;  %v121_v17 = vand.u32 127, %v120_v16  ;;  %v3184_v31 = vld [vmem:[#allocation12] ss:$0 sm:$0xff]  ;;  %vm812_vm10 = vcmask 64512  }
  0x74   :  { %129 = vperm.xlu1 %5049, %v123_v3   ;;  %126 = vperm.xlu0 %5048, %v122_v4   ;;  %v4418_v10 = vpack.c.bf16 %v117_v9, %v116_v8  ;;  %v124_v12 = vld [vmem:[%s6036_s2 + $0x10] sm:$0xff]  ;;  %v785_v13 = vld [vmem:[%s6039_s5 + $0x8] sm:$0xff]  ;;  %v784_v14 = vld [vmem:[%s6039_s5] sm:$0xff]  ;;  %vm583_vm13 = vcmask 195584  }
  0x75   :  { %3619 = vmatprep.mubr.msk.f32.mxu1 %vm5436_vm0, %v5437_v7  ;;  %3606 = vmatprep.mubr.msk.f32.mxu0 %vm5436_vm0, %v5437_v7  ;;  %v786_v15 = vld [vmem:[%s6039_s5 + $0x10] sm:$0xff]  ;;  %v366_v43 = vld [vmem:[#allocation9 + $0x80] sm:$0xff]  ;;  %v369_v47 = vld [vmem:[#allocation9 + $0x98] sm:$0xff]  ;;  %s5438_s5 = smov [#allocation14]  }
  0x76   :  { %4422 = vmatpush3.bf16.msra.mxu1 %v4418_v10  ;;  %4419 = vmatpush3.bf16.msra.mxu0 %v4418_v10  ;;  %v367_v44 = vld [vmem:[#allocation9 + $0x88] sm:$0xff]  ;;  %v368_v45 = vld [vmem:[#allocation9 + $0x90] sm:$0xff]  ;;  %v349_v48 = vld [vmem:[#allocation9] sm:$0xff]  ;;  %s3158_s19 = sshll.u32 %s5438_s5, 4  ;;  %s3159_s19 = int_to_ptr.vmem [resolvable:$true] %s3158_s19 }
  0x77   :  { %4423 = vmatprep.subr.bf16.mxu0 %v5435_v2  ;;  %4447 = vmatprep.subr.bf16.mxu1 %v5435_v2  ;;  %v4424_v46 = vpack.c.bf16 %v367_v44, %v366_v43  ;;  %v350_v49 = vld [vmem:[#allocation9 + $0x8] sm:$0xff]  ;;  %v351_v51 = vld [vmem:[#allocation9 + $0x10] sm:$0xff]  ;;  %v4427_v52 = vpack.c.bf16 %v369_v47, %v368_v45  ;;  %v352_v53 = vld [vmem:[#allocation9 + $0x18] sm:$0xff]  ;;  %s5394_s1 = scalar_lea.vmem %s3159_s19, 256  ;;  %p5399_p7 = scmp.lt.s32.totalorder %s3159_s19, %s3159_s19 }
  0x78   :  { %147 = vperm.xlu1 %5049, %v141_v5   ;;  %144 = vperm.xlu0 %5048, %v140_v6   ;;  %v4448_v50 = vpack.c.bf16 %v350_v49, %v349_v48  ;;  %v370_v54 = vld [vmem:[#allocation9 + $0xa0] sm:$0xff]  ;;  %v371_v55 = vld [vmem:[#allocation9 + $0xa8] sm:$0xff]  ;;  %v4451_v56 = vpack.c.bf16 %v352_v53, %v351_v51  ;;  %v372_v60 = vld [vmem:[#allocation9 + $0xb0] sm:$0xff]  ;;  %p5395_p6 = scmp.ne.s32.totalorder %s3159_s19, %s5394_s1  ;;  %p5400_p8 = scmp.lt.s32.totalorder %s5394_s1, %s5394_s1 }
  0x79   :  { %v353_v57 = vld [vmem:[#allocation9 + $0x20] sm:$0xff]  ;;  %v354_v58 = vld [vmem:[#allocation9 + $0x28] sm:$0xff]  ;;  %v4430_v59 = vpack.c.bf16 %v371_v55, %v370_v54  ;;  %v373_v61 = vld [vmem:[#allocation9 + $0xb8] sm:$0xff] }
  0x7a   :  { %v4454_v62 = vpack.c.bf16 %v354_v58, %v353_v57  ;;  %v355_v63 = vld [vmem:[#allocation9 + $0x30] sm:$0xff]  ;;  %v356_v0 = vld [vmem:[#allocation9 + $0x38] sm:$0xff]  ;;  %v4433_v1 = vpack.c.bf16 %v373_v61, %v372_v60  ;;  %v374_v3 = vld [vmem:[#allocation9 + $0xc0] sm:$0xff]  ;;  %v5716_v57 = vshrl.u32 %v120_v16, 7  ;;  %p5401_p9 = por %p5400_p8, %p5399_p7 }
  0x7b   :  { %v375_v4 = vld [vmem:[#allocation9 + $0xc8] sm:$0xff]  ;;  %v4457_v5 = vpack.c.bf16 %v356_v0, %v355_v63  ;;  %v357_v6 = vld [vmem:[#allocation9 + $0x40] sm:$0xff]  ;;  %v376_v10 = vld [vmem:[#allocation9 + $0xd0] sm:$0xff] }
  0x7c   :  { %150 = vperm.xlu1 %5049, %v142_v11   ;;  %132 = vperm.xlu0 %5048, %v124_v12   ;;  %v358_v8 = vld [vmem:[#allocation9 + $0x48] sm:$0xff]  ;;  %v4436_v9 = vpack.c.bf16 %v375_v4, %v374_v3  ;;  %v377_v11 = vld [vmem:[#allocation9 + $0xd8] sm:$0xff]  ;;  %v666_v60 = vld [vmem:[#allocation9 + $0x100] sm:$0xff]  ;;  %p5402_p10 = pnand %p5401_p9, %p5395_p6 }
  0x7d   :  { %v4460_v12 = vpack.c.bf16 %v358_v8, %v357_v6  ;;  %v5718_v58 = vld [vmem:[#allocation8] ss:$0 sm:$0xff]  ;;  %v667_v61 = vld [vmem:[#allocation9 + $0x108] sm:$0xff]  ;;  %v670_v16 = vld [vmem:[#allocation9 + $0x120] sm:$0xff] }
  0x7e   :  { %vm166_vm12 = vcmp.eq.s32.totalorder %v5718_v58, %v5716_v57  ;;  %v4475_v63 = vpack.c.bf16 %v667_v61, %v666_v60  ;;  %v669_v0 = vld [vmem:[#allocation9 + $0x118] sm:$0xff]  ;;  %v671_v3 = vld [vmem:[#allocation9 + $0x128] sm:$0xff] }
  0x7f   :  { %v4483_v4 = vpack.c.bf16 %v671_v3, %v670_v16  ;;  %v673_v6 = vld [vmem:[#allocation9 + $0x138] sm:$0xff] }
  0x80   :  { %791 = vperm.xlu1 %5049, %v785_v13   ;;  %788 = vperm.xlu0 %5048, %v784_v14   ;;  %v359_v13 = vld [vmem:[#allocation9 + $0x50] sm:$0xff]  ;;  %v360_v14 = vld [vmem:[#allocation9 + $0x58] sm:$0xff] }
  0x84   :  { %794 = vperm.xlu0 %5048, %v786_v15   ;;  %v4439_v15 = vpack.c.bf16 %v377_v11, %v376_v10  ;;  %v675_v10 = vld [vmem:[#allocation9 + $0x148] sm:$0xff] }
  0xf3   :  { %v130_v18 = vpop.permute.xlu1 %129  ;;  %v127_v19 = vpop.permute.xlu0 %126 }
  0xf4   :  { %vm135_vm2 = vcmp.eq.s32.totalorder %v130_v18, %v121_v17  ;;  %vm134_vm3 = vcmp.eq.s32.totalorder %v127_v19, %v121_v17  ;;  %v379_v18 = vld [vmem:[#allocation9 + $0xe8] sm:$0xff]  ;;  %v4463_v19 = vpack.c.bf16 %v360_v14, %v359_v13  ;;  %v677_v13 = vld [vmem:[#allocation9 + $0x158] sm:$0xff] }
  0xf5   :  { %v5625_v20 = vsel %vm134_vm3, 1.0, %v5437_v7  ;;  %v5630_v21 = vsel %vm135_vm2, 1.0, %v5437_v7 }
  0xf6   :  { %3620 = vmatmul.mubr.msk.f32.vlgmr.msra.gmra.mrb[0].mxu1 %vm170_vm1, %v5625_v20 }
  0xf7   :  { %v148_v22 = vpop.permute.xlu1 %147  ;;  %v145_v23 = vpop.permute.xlu0 %144  ;;  %3622 = vmatprep.mubr.msk.f32.mxu1 %vm5436_vm0, %v5437_v7  ;;  %4449 = vmatpush3.bf16.msra.mxu1 %v4448_v50 }
  0xf8   :  { %vm152_vm4 = vcmp.eq.s32.totalorder %v145_v23, %v121_v17  ;;  %vm153_vm5 = vcmp.eq.s32.totalorder %v148_v22, %v121_v17  ;;  %4450 = vmatprep.subr.bf16.mxu1 %v5435_v2  ;;  %v361_v22 = vld [vmem:[#allocation9 + $0x60] sm:$0xff]  ;;  %v362_v23 = vld [vmem:[#allocation9 + $0x68] sm:$0xff] }
  0xf9   :  { %v5635_v24 = vsel %vm152_vm4, 1.0, %v5437_v7  ;;  %v5646_v27 = vsel %vm153_vm5, 1.0, %v5437_v7 }
  0xfa   :  { %3607 = vmatmul.mubr.msk.f32.vlgmr.msra.gmra.mrb[0].mxu0 %vm170_vm1, %v5635_v24  ;;  %3623 = vmatmul.mubr.msk.f32.gmra.mrb[2].mxu1 %vm170_vm1, %v5630_v21 }
  0xfb   :  { %v151_v25 = vpop.permute.xlu1 %150  ;;  %v133_v26 = vpop.permute.xlu0 %132  ;;  %3609 = vmatprep.mubr.msk.f32.mxu0 %vm5436_vm0, %v5437_v7  ;;  %3625 = vmatprep.mubr.msk.f32.mxu1 %vm5436_vm0, %v5437_v7 }
  0xfc   :  { %vm136_vm6 = vcmp.eq.s32.totalorder %v133_v26, %v121_v17  ;;  %vm154_vm7 = vcmp.eq.s32.totalorder %v151_v25, %v121_v17  ;;  %4425 = vmatpush3.bf16.msra.mxu0 %v4424_v46  ;;  %4452 = vmatpush3.bf16.msra.mxu1 %v4451_v56  ;;  %v380_v26 = vld [vmem:[#allocation9 + $0xf0] sm:$0xff] }
  0xfd   :  { %v5649_v28 = vsel %vm136_vm6, 1.0, %v5437_v7  ;;  %v5660_v32 = vsel %vm154_vm7, 1.0, %v5437_v7  ;;  %4426 = vmatprep.subr.bf16.mxu0 %v5435_v2  ;;  %4453 = vmatprep.subr.bf16.mxu1 %v5435_v2 }
  0xfe   :  { %3610 = vmatmul.mubr.msk.f32.gmra.mrb[2].mxu0 %vm170_vm1, %v5646_v27  ;;  %3626 = vmatmul.mubr.msk.f32.gmra.mrb[4].mxu1 %vm170_vm1, %v5649_v28 }
  0xff   :  { %v792_v29 = vpop.permute.xlu1 %791  ;;  %v789_v30 = vpop.permute.xlu0 %788  ;;  %3612 = vmatprep.mubr.msk.f32.mxu0 %vm5436_vm0, %v5437_v7  ;;  %3701 = vmatprep.mubr.msk.f32.mxu1 %vm5436_vm0, %v5437_v7 }
 0x100   :  { %vm797_vm8 = vcmp.eq.s32.totalorder %v792_v29, %v121_v17  ;;  %vm796_vm9 = vcmp.eq.s32.totalorder %v789_v30, %v121_v17  ;;  %4428 = vmatpush3.bf16.msra.mxu0 %v4427_v52  ;;  %4455 = vmatpush3.bf16.msra.mxu1 %v4454_v62  ;;  %v381_v29 = vld [vmem:[#allocation9 + $0xf8] sm:$0xff]  ;;  %v4466_v30 = vpack.c.bf16 %v362_v23, %v361_v22  ;;  %v668_v62 = vld [vmem:[#allocation9 + $0x110] sm:$0xff] }
 0x101   :  { %v800_v33 = vsel %vm797_vm8, 1.0, %v5437_v7  ;;  %v799_v34 = vsel %vm796_vm9, 1.0, %v5437_v7  ;;  %4429 = vmatprep.subr.bf16.mxu0 %v5435_v2  ;;  %4456 = vmatprep.subr.bf16.mxu1 %v5435_v2  ;;  %v680_v23 = vld [vmem:[#allocation9 + $0x170] sm:$0xff] }
 0x102   :  { %3613 = vmatmul.mubr.msk.f32.gmra.mrb[4].mxu0 %vm170_vm1, %v5660_v32  ;;  %v810_v35 = vmul.f32 %v3184_v31, %v800_v33  ;;  %v809_v36 = vmul.f32 %v3184_v31, %v799_v34  ;;  %v363_v33 = vld [vmem:[#allocation9 + $0x70] sm:$0xff]  ;;  %v364_v34 = vld [vmem:[#allocation9 + $0x78] sm:$0xff] }
 0x103   :  { %v795_v37 = vpop.permute.xlu0 %794  ;;  %3660 = vmatprep.mubr.msk.f32.mxu0 %vm5436_vm0, %v5437_v7 }
 0x104   :  { %vm798_vm11 = vcmp.eq.s32.totalorder %v795_v37, %v121_v17  ;;  %v816_v38 = vsel %vm812_vm10, %v810_v35, 0.0  ;;  %v813_v39 = vsel %vm812_vm10, %v809_v36, 0.0  ;;  %4431 = vmatpush3.bf16.msra.mxu0 %v4430_v59  ;;  %4458 = vmatpush3.bf16.msra.mxu1 %v4457_v5  ;;  %v378_v17 = vld [vmem:[#allocation9 + $0xe0] sm:$0xff]  ;;  %v4469_v35 = vpack.c.bf16 %v364_v34, %v363_v33  ;;  %v3185_v36 = vld [vmem:[#allocation2] ss:$0 sm:$0xff]  ;;  %v672_v5 = vld [vmem:[#allocation9 + $0x130] sm:$0xff] }
 0x105   :  { %v801_v40 = vsel %vm798_vm11, 1.0, %v5437_v7  ;;  %817 = vadd.xlane.f32.xlu0 %v816_v38  ;;  %814 = vadd.xlane.f32.xlu1 %v813_v39  ;;  %v4442_v25 = vpack.c.bf16 %v379_v18, %v378_v17  ;;  %v5723_v59 = vsel %vm166_vm12, 1.0, %v5437_v7  ;;  %v4487_v8 = vpack.c.bf16 %v673_v6, %v672_v5  ;;  %v679_v17 = vld [vmem:[#allocation9 + $0x168] sm:$0xff] }
 0x106   :  { %v811_v41 = vmul.f32 %v3184_v31, %v801_v40  ;;  %4432 = vmatprep.subr.bf16.mxu0 %v5435_v2  ;;  %4459 = vmatprep.subr.bf16.mxu1 %v5435_v2  ;;  %v4445_v31 = vpack.c.bf16 %v381_v29, %v380_v26 }
 0x108   :  { %v819_v42 = vsel %vm812_vm10, %v811_v41, 0.0  ;;  %4434 = vmatpush3.bf16.msra.mxu0 %v4433_v1  ;;  %4461 = vmatpush3.bf16.msra.mxu1 %v4460_v12  ;;  %v4479_v1 = vpack.c.bf16 %v669_v0, %v668_v62  ;;  %v676_v12 = vld [vmem:[#allocation9 + $0x150] sm:$0xff] }
 0x109   :  { %820 = vadd.xlane.f32.xlu0 %v819_v42  ;;  %4435 = vmatprep.subr.bf16.mxu0 %v5435_v2  ;;  %v4495_v14 = vpack.c.bf16 %v677_v13, %v676_v12 }
 0x10a   :  { %4462 = vmatprep.subr.bf16.mxu1 %v5435_v2 }
 0x10c   :  { %4437 = vmatpush3.bf16.msra.mxu0 %v4436_v9  ;;  %4464 = vmatpush3.bf16.msra.mxu1 %v4463_v19  ;;  %v674_v9 = vld [vmem:[#allocation9 + $0x140] sm:$0xff] }
 0x10d   :  { %4438 = vmatprep.subr.bf16.mxu0 %v5435_v2  ;;  %4465 = vmatprep.subr.bf16.mxu1 %v5435_v2  ;;  %v4491_v11 = vpack.c.bf16 %v675_v10, %v674_v9 }
 0x110   :  { %4440 = vmatpush3.bf16.msra.mxu0 %v4439_v15  ;;  %4467 = vmatpush3.bf16.msra.mxu1 %v4466_v30  ;;  %v678_v15 = vld [vmem:[#allocation9 + $0x160] sm:$0xff] }
 0x111   :  { %4441 = vmatprep.subr.bf16.mxu0 %v5435_v2  ;;  %4468 = vmatprep.subr.bf16.mxu1 %v5435_v2  ;;  %v4499_v22 = vpack.c.bf16 %v679_v17, %v678_v15  ;;  %v3180_v30 = vld [vmem:[#allocation11] ss:$0 sm:$0xff] }
 0x114   :  { %4443 = vmatpush3.bf16.msra.mxu0 %v4442_v25  ;;  %4470 = vmatpush3.bf16.msra.mxu1 %v4469_v35  ;;  %v681_v25 = vld [vmem:[#allocation9 + $0x178] sm:$0xff] }
 0x115   :  { %4444 = vmatprep.subr.bf16.mxu0 %v5435_v2  ;;  %4476 = vmatprep.subr.bf16.mxu1 %v4475_v63  ;;  %v4503_v35 = vpack.c.bf16 %v681_v25, %v680_v23 }
 0x118   :  { %4446 = vmatpush3.bf16.msra.mxu0 %v4445_v31 }
 0x192   :  { %v815_v37 = vpop.xlane.xlu1 %814  ;;  %v818_v38 = vpop.xlane.xlu0 %817 }
 0x193   :  { %v829_v39 = vadd.f32 %v3185_v36, %v815_v37  ;;  %v830_v40 = vadd.f32 %v3185_v36, %v818_v38 }
 0x195   :  { %834 = vperm.xlu1 %5049, %v829_v39   ;;  %839 = vperm.xlu0 %5048, %v830_v40  }
 0x196   :  { %v821_v41 = vpop.xlane.xlu0 %820 }
 0x197   :  { %v831_v42 = vadd.f32 %v3185_v36, %v821_v41 }
 0x199   :  { %844 = vperm.xlu1 %5049, %v831_v42  }
 0x1c9   :  { %v5683_v43 = vpop.f32.mrb[0].mxu1 }
 0x1ca   :  { %v3621_v44 = vpop.f32.mrb[1].mxu1  ;;  %3661 = vmatmul.mubr.f32.vlgmr.msra.gmra.mrb[6].mxu0 %v5683_v43 }
 0x1cb   :  { %3663 = vmatprep.mubr.msk.f32.mxu0 %vm5436_vm0, %v5437_v7 }
 0x1cd   :  { %v5688_v45 = vpop.f32.mrb[0].mxu0  ;;  %v5690_v46 = vpop.f32.mrb[2].mxu1 }
 0x1ce   :  { %v3608_v47 = vpop.f32.mrb[1].mxu0  ;;  %v3624_v48 = vpop.f32.mrb[3].mxu1  ;;  %3664 = vmatmul.mubr.f32.gmra.mrb[8].mxu0 %v5690_v46  ;;  %3702 = vmatmul.mubr.f32.vlgmr.msra.gmra.mrb[6].mxu1 %v5688_v45 }
 0x1cf   :  { %3666 = vmatprep.mubr.msk.f32.mxu0 %vm5436_vm0, %v5437_v7  ;;  %3704 = vmatprep.mubr.msk.f32.mxu1 %vm5436_vm0, %v5437_v7 }
 0x1d0   :  { %4478 = vmatpush3.bf16.msra.mxu1 %v4475_v63 }
 0x1d1   :  { %v5698_v49 = vpop.f32.mrb[2].mxu0  ;;  %v5700_v50 = vpop.f32.mrb[4].mxu1  ;;  %4480 = vmatprep.subr.bf16.mxu1 %v4479_v1 }
 0x1d2   :  { %v3611_v51 = vpop.f32.mrb[3].mxu0  ;;  %v3627_v52 = vpop.f32.mrb[5].mxu1  ;;  %3667 = vmatmul.mubr.f32.gmra.mrb[10].mxu0 %v5700_v50  ;;  %3705 = vmatmul.mubr.f32.gmra.mrb[8].mxu1 %v5698_v49 }
 0x1d3   :  { %3707 = vmatprep.mubr.msk.f32.mxu1 %vm5436_vm0, %v5437_v7  ;;  %3716 = vmatprep.mubr.msk.f32.mxu0 %vm583_vm13, %v5723_v59 }
 0x1d4   :  { %4482 = vmatpush3.bf16.msra.mxu1 %v4479_v1 }
 0x1d5   :  { %v5706_v53 = vpop.f32.mrb[4].mxu0  ;;  %4484 = vmatprep.subr.bf16.mxu1 %v4483_v4 }
 0x1d6   :  { %v3614_v54 = vpop.f32.mrb[5].mxu0  ;;  %3708 = vmatmul.mubr.f32.gmra.mrb[10].mxu1 %v5706_v53 }
 0x1d8   :  { %4486 = vmatpush3.bf16.msra.mxu1 %v4483_v4 }
 0x1d9   :  { %4488 = vmatprep.subr.bf16.mxu1 %v4487_v8 }
 0x1dc   :  { %4490 = vmatpush3.bf16.msra.mxu1 %v4487_v8 }
 0x1dd   :  { %4492 = vmatprep.subr.bf16.mxu1 %v4491_v11 }
 0x1e0   :  { %4494 = vmatpush3.bf16.msra.mxu1 %v4491_v11 }
 0x1e1   :  { %4496 = vmatprep.subr.bf16.mxu1 %v4495_v14 }
 0x1e4   :  { %4498 = vmatpush3.bf16.msra.mxu1 %v4495_v14 }
 0x1e5   :  { %4500 = vmatprep.subr.bf16.mxu1 %v4499_v22 }
 0x1e8   :  { %4502 = vmatpush3.bf16.msra.mxu1 %v4499_v22 }
 0x1e9   :  { %4504 = vmatprep.subr.bf16.mxu1 %v4503_v35 }
 0x1ec   :  { %4506 = vmatpush3.bf16.msra.mxu1 %v4503_v35 }
 0x1ed   :  { %4531 = vmatprep.subr.bf16.mxu1 %v5435_v2 }
 0x214   :  { %v5709_v55 = vpop.permute.xlu1 %834 }
 0x215   :  { %v5713_v56 = vmul.f32 %v5709_v55, %v5688_v45 }
 0x29d   :  { %v448_v18 = vpop.f32.mrb[6].mxu0 }
 0x29e   :  { %v3662_v19 = vpop.f32.mrb[7].mxu0 }
 0x2a1   :  { %v453_v26 = vpop.f32.mrb[8].mxu0  ;;  %v528_v29 = vpop.f32.mrb[6].mxu1 }
 0x2a2   :  { %v529_v31 = vadd.f32 %v528_v29, %v448_v18  ;;  %v3665_v33 = vpop.f32.mrb[9].mxu0  ;;  %v3703_v34 = vpop.f32.mrb[7].mxu1 }
 0x2a3   :  { %v5729_v33 = vadd.s32 8, %v5716_v57 }
 0x2a4   :  { %v547_v36 = vadd.f32 %v3180_v30, %v529_v31 }
 0x2a5   :  { %v458_v37 = vpop.f32.mrb[10].mxu0  ;;  %v533_v38 = vpop.f32.mrb[8].mxu1  ;;  %vm167_vm14 = vcmp.eq.s32.totalorder %v5718_v58, %v5729_v33  ;;  %v875_v58 = vld [vmem:[#allocation9 + $0x220] sm:$0xff]  ;;  %vm3086_vm15 = vcmp.lt.s32.totalorder %v5729_v33, 12 }
 0x2a6   :  { %v553_v39 = vand.u32 2147483647, %v547_v36  ;;  %v534_v40 = vadd.f32 %v533_v38, %v453_v26  ;;  %v3668_v41 = vpop.f32.mrb[11].mxu0  ;;  %v3706_v42 = vpop.f32.mrb[9].mxu1  ;;  %v550_v11 = vmax.f32 %v547_v36, 0.0  ;;  %v871_v38 = vld [vmem:[#allocation9 + $0x200] sm:$0xff] }
 0x2a7   :  { %v874_v42 = vld [vmem:[#allocation9 + $0x218] sm:$0xff] }
 0x2a8   :  { %v556_v44 = vsub.f32 0.0, %v553_v39  ;;  %v548_v47 = vadd.f32 %v3180_v30, %v534_v40  ;;  %v872_v39 = vld [vmem:[#allocation9 + $0x208] sm:$0xff]  ;;  %v5734_v40 = vsel %vm167_vm14, 1.0, %v5437_v7 }
 0x2a9   :  { %v538_v48 = vpop.f32.mrb[10].mxu1  ;;  %v4508_v41 = vpack.c.bf16 %v872_v39, %v871_v38  ;;  %v861_v39 = vld [vmem:[#allocation9 + $0x1d0] sm:$0xff] }
 0x2aa   :  { %v559_v51 = vmul.f32 1.442695, %v556_v44  ;;  %v554_v52 = vand.u32 2147483647, %v548_v47  ;;  %v539_v54 = vadd.f32 %v538_v48, %v458_v37  ;;  %v3709_v60 = vpop.f32.mrb[11].mxu1  ;;  %v551_v15 = vmax.f32 %v548_v47, 0.0 }
 0x2ab   :  { %v879_v60 = vld [vmem:[#allocation9 + $0x240] sm:$0xff] }
 0x2ac   :  { %5050 = vpow2.f32 %v559_v51  ;;  %v557_v61 = vsub.f32 0.0, %v554_v52  ;;  %v549_v62 = vadd.f32 %v3180_v30, %v539_v54  ;;  %v877_v51 = vld [vmem:[#allocation9 + $0x230] sm:$0xff]  ;;  %v878_v52 = vld [vmem:[#allocation9 + $0x238] sm:$0xff] }
 0x2ad   :  { %v4517_v54 = vpack.c.bf16 %v878_v52, %v877_v51 }
 0x2ae   :  { %v561_v63 = vmul.f32 1.442695, %v557_v61  ;;  %v555_v0 = vand.u32 2147483647, %v549_v62  ;;  %v552_v22 = vmax.f32 %v549_v62, 0.0  ;;  %v880_v61 = vld [vmem:[#allocation9 + $0x248] sm:$0xff] }
 0x2b0   :  { %5052 = vpow2.f32 %v561_v63  ;;  %v558_v1 = vsub.f32 0.0, %v555_v0  ;;  %v881_v63 = vld [vmem:[#allocation9 + $0x250] sm:$0xff]  ;;  %v882_v0 = vld [vmem:[#allocation9 + $0x258] sm:$0xff] }
 0x2b2   :  { %v563_v16 = vmul.f32 1.442695, %v558_v1  ;;  %v4523_v1 = vpack.c.bf16 %v882_v0, %v881_v63 }
 0x2b4   :  { %5054 = vpow2.f32 %v563_v16  ;;  %v883_v16 = vld [vmem:[#allocation9 + $0x260] sm:$0xff] }
 0x2b6   :  { %v5051_v3 = vpop.eup %5050 }
 0x2b7   :  { %v565_v4 = vadd.f32 1.0, %v5051_v3  ;;  %v884_v3 = vld [vmem:[#allocation9 + $0x268] sm:$0xff] }
 0x2b9   :  { %5056 = vlog2.f32 %v565_v4  ;;  %v4526_v4 = vpack.c.bf16 %v884_v3, %v883_v16  ;;  %v1165_v16 = vld [vmem:[#allocation9 + $0x288] sm:$0xff]  ;;  %v1166_v3 = vld [vmem:[#allocation9 + $0x290] sm:$0xff] }
 0x2ba   :  { %v5053_v5 = vpop.eup %5052 }
 0x2bb   :  { %v566_v6 = vadd.f32 1.0, %v5053_v5  ;;  %v885_v5 = vld [vmem:[#allocation9 + $0x270] sm:$0xff] }
 0x2bd   :  { %5058 = vlog2.f32 %v566_v6  ;;  %v886_v6 = vld [vmem:[#allocation9 + $0x278] sm:$0xff] }
 0x2be   :  { %v5055_v8 = vpop.eup %5054 }
 0x2bf   :  { %v567_v9 = vadd.f32 1.0, %v5055_v8  ;;  %v4529_v8 = vpack.c.bf16 %v886_v6, %v885_v5  ;;  %v1167_v5 = vld [vmem:[#allocation9 + $0x298] sm:$0xff] }
 0x2c0   :  { %v4563_v6 = vpack.c.bf16 %v1167_v5, %v1166_v3 }
 0x2c1   :  { %5060 = vlog2.f32 %v567_v9  ;;  %v867_v9 = vmul.f32 %v5709_v55, %v5683_v43 }
 0x2c3   :  { %v5057_v10 = vpop.eup %5056 }
 0x2c4   :  { %v569_v12 = vmul.f32 0.6931472, %v5057_v10  ;;  %v840_v10 = vpop.permute.xlu0 %839 }
 0x2c6   :  { %v574_v13 = vadd.f32 %v569_v12, %v550_v11  ;;  %v868_v11 = vmul.f32 %v840_v10, %v5690_v46  ;;  %v845_v12 = vpop.permute.xlu1 %844 }
 0x2c7   :  { %v5059_v14 = vpop.eup %5058  ;;  %v849_v0 = vmul.f32 %v845_v12, %v5706_v53 }
 0x2c8   :  { %v571_v17 = vmul.f32 0.6931472, %v5059_v14  ;;  %5062 = vtanh.f32 %v574_v13  ;;  %v869_v13 = vmul.f32 %v845_v12, %v5700_v50  ;;  %v851_v14 = vld [vmem:[#allocation9 + $0x180] sm:$0xff] }
 0x2ca   :  { %v575_v18 = vadd.f32 %v571_v17, %v551_v15  ;;  %v852_v15 = vld [vmem:[#allocation9 + $0x188] sm:$0xff] }
 0x2cb   :  { %v5061_v19 = vpop.eup %5060 }
 0x2cc   :  { %5064 = vtanh.f32 %v575_v18  ;;  %v573_v23 = vmul.f32 0.6931472, %v5061_v19  ;;  %v4532_v18 = vpack.c.bf16 %v852_v15, %v851_v14  ;;  %v853_v19 = vld [vmem:[#allocation9 + $0x190] sm:$0xff] }
 0x2ce   :  { %v576_v25 = vadd.f32 %v573_v23, %v552_v22  ;;  %v854_v22 = vld [vmem:[#allocation9 + $0x198] sm:$0xff] }
 0x2cf   :  { %v4535_v23 = vpack.c.bf16 %v854_v22, %v853_v19  ;;  %v1174_v19 = vld [vmem:[#allocation9 + $0x2d0] sm:$0xff]  ;;  %v1175_v22 = vld [vmem:[#allocation9 + $0x2d8] sm:$0xff] }
 0x2d0   :  { %5066 = vtanh.f32 %v576_v25  ;;  %v855_v25 = vld [vmem:[#allocation9 + $0x1a0] sm:$0xff] }
 0x2d2   :  { %v5063_v26 = vpop.eup %5062 }
 0x2d3   :  { %v580_v30 = vmul.f32 %v5063_v26, %v547_v36  ;;  %v873_v36 = vld [vmem:[#allocation9 + $0x210] sm:$0xff]  ;;  %v856_v26 = vld [vmem:[#allocation9 + $0x1a8] sm:$0xff] }
 0x2d4   :  { %v4511_v44 = vpack.c.bf16 %v874_v42, %v873_v36  ;;  %v863_v42 = vld [vmem:[#allocation9 + $0x1e0] sm:$0xff] }
 0x2d6   :  { %v5065_v29 = vpop.eup %5064 }
 0x2d7   :  { %v581_v31 = vmul.f32 %v5065_v29, %v548_v47  ;;  %v876_v47 = vld [vmem:[#allocation9 + $0x228] sm:$0xff]  ;;  %v4538_v29 = vpack.c.bf16 %v856_v26, %v855_v25  ;;  %v1176_v25 = vld [vmem:[#allocation9 + $0x2e0] sm:$0xff] }
 0x2d8   :  { %v4514_v48 = vpack.c.bf16 %v876_v47, %v875_v58  ;;  %v865_v47 = vld [vmem:[#allocation9 + $0x1f0] sm:$0xff]  ;;  %v1177_v26 = vld [vmem:[#allocation9 + $0x2e8] sm:$0xff] }
 0x2d9   :  { %v4471_v34 = vpack.c.bf16 %v581_v31, %v580_v30  ;;  %v857_v30 = vld [vmem:[#allocation9 + $0x1b0] sm:$0xff]  ;;  %v858_v31 = vld [vmem:[#allocation9 + $0x1b8] sm:$0xff] }
 0x2da   :  { %v5067_v35 = vpop.eup %5066 }
 0x2db   :  { %4472 = vmatprep.subr.bf16.mxu0 %v4471_v34  ;;  %v582_v37 = vmul.f32 %v5067_v35, %v549_v62  ;;  %v4520_v62 = vpack.c.bf16 %v880_v61, %v879_v60  ;;  %v859_v35 = vld [vmem:[#allocation9 + $0x1c0] sm:$0xff]  ;;  %v848_v61 = vmul.f32 %v840_v10, %v5698_v49 }
 0x2dc   :  { %4474 = vmatpush3.bf16.msra.mxu0 %v4471_v34  ;;  %v4541_v34 = vpack.c.bf16 %v858_v31, %v857_v30  ;;  %v1178_v30 = vld [vmem:[#allocation9 + $0x2f0] sm:$0xff]  ;;  %v1179_v31 = vld [vmem:[#allocation9 + $0x2f8] sm:$0xff] }
 0x2dd   :  { %3714 = vmatprep.subr.mxu0 %v582_v37 }
 0x2e0   :  { %3715 = vmatpush3.msra.mxu0 %v582_v37  ;;  %v860_v37 = vld [vmem:[#allocation9 + $0x1c8] sm:$0xff] }
 0x2e1   :  { %3717 = vmatmul.mubr.msk.f32.vlgmr.msra.gmra.mrb[12].mxu0 %vm583_vm13, %v5734_v40  ;;  %4507 = vmatprep.subr.bf16.mxu0 %v5435_v2  ;;  %v4544_v38 = vpack.c.bf16 %v860_v37, %v859_v35  ;;  %v3186_v37 = vld [vmem:[#allocation11 + $0x2] ss:$0 sm:$0xff] }
 0x2e2   :  { %4509 = vmatpush3.bf16.msra.mxu0 %v4508_v41  ;;  %3786 = vmatprep.mubr.msk.f32.mxu0 %vm5436_vm0, %v5437_v7  ;;  %v862_v41 = vld [vmem:[#allocation9 + $0x1d8] sm:$0xff] }
 0x2e3   :  { %4510 = vmatprep.subr.bf16.mxu0 %v5435_v2  ;;  %v4547_v36 = vpack.c.bf16 %v862_v41, %v861_v39 }
 0x2e6   :  { %4512 = vmatpush3.bf16.msra.mxu0 %v4511_v44  ;;  %v864_v44 = vld [vmem:[#allocation9 + $0x1e8] sm:$0xff] }
 0x2e7   :  { %4513 = vmatprep.subr.bf16.mxu0 %v5435_v2  ;;  %v4550_v58 = vpack.c.bf16 %v864_v44, %v863_v42 }
 0x2ea   :  { %4515 = vmatpush3.bf16.msra.mxu0 %v4514_v48  ;;  %v866_v48 = vld [vmem:[#allocation9 + $0x1f8] sm:$0xff] }
 0x2eb   :  { %4516 = vmatprep.subr.bf16.mxu0 %v5435_v2  ;;  %v4553_v51 = vpack.c.bf16 %v866_v48, %v865_v47 }
 0x2ee   :  { %4518 = vmatpush3.bf16.msra.mxu0 %v4517_v54 }
 0x2ef   :  { %4519 = vmatprep.subr.bf16.mxu0 %v5435_v2 }
 0x2f2   :  { %4521 = vmatpush3.bf16.msra.mxu0 %v4520_v62 }
 0x2f3   :  { %4522 = vmatprep.subr.bf16.mxu0 %v5435_v2 }
 0x2f6   :  { %4524 = vmatpush3.bf16.msra.mxu0 %v4523_v1 }
 0x2f7   :  { %4525 = vmatprep.subr.bf16.mxu0 %v5435_v2 }
 0x2fa   :  { %4527 = vmatpush3.bf16.msra.mxu0 %v4526_v4 }
 0x2fb   :  { %4528 = vmatprep.subr.bf16.mxu0 %v5435_v2 }
 0x2fe   :  { %4530 = vmatpush3.bf16.msra.mxu0 %v4529_v8  ;;  %v1168_v8 = vld [vmem:[#allocation9 + $0x2a0] sm:$0xff] }
 0x301   :  { %3787 = vmatmul.mubr.f32.vlgmr.msra.gmra.mrb[14].mxu0 %v867_v9  ;;  %v1169_v9 = vld [vmem:[#allocation9 + $0x2a8] sm:$0xff] }
 0x302   :  { %3789 = vmatprep.mubr.msk.f32.mxu0 %vm5436_vm0, %v5437_v7  ;;  %v4567_v10 = vpack.c.bf16 %v1169_v9, %v1168_v8 }
 0x305   :  { %3790 = vmatmul.mubr.f32.gmra.mrb[16].mxu0 %v868_v11  ;;  %v1170_v11 = vld [vmem:[#allocation9 + $0x2b0] sm:$0xff] }
 0x306   :  { %3792 = vmatprep.mubr.msk.f32.mxu0 %vm5436_vm0, %v5437_v7 }
 0x309   :  { %3793 = vmatmul.mubr.f32.gmra.mrb[18].mxu0 %v869_v13  ;;  %v1171_v13 = vld [vmem:[#allocation9 + $0x2b8] sm:$0xff] }
 0x30a   :  { %v4571_v15 = vpack.c.bf16 %v1171_v13, %v1170_v11 }
 0x3b4   :  { %v3718_v17 = vpop.f32.mrb[12].mxu0 }
 0x3b5   :  { %v656_v55 = vpop.f32.mrb[13].mxu0 }
 0x3b6   :  { %3751 = vmatprep.mubr.f32.mxu1 %v656_v55 }
 0x3b7   :  { %3752 = vmatmul.mubr.f32.vlgmr.msra.gmra.mrb[12].mxu1 %v3718_v17  ;;  %v1172_v17 = vld [vmem:[#allocation9 + $0x2c0] sm:$0xff] }
 0x3b8   :  { %4533 = vmatpush3.bf16.msra.mxu1 %v4532_v18  ;;  %3827 = vmatprep.mubr.msk.f32.mxu1 %vm5436_vm0, %v5437_v7  ;;  %v1173_v18 = vld [vmem:[#allocation9 + $0x2c8] sm:$0xff] }
 0x3b9   :  { %4534 = vmatprep.subr.bf16.mxu1 %v5435_v2  ;;  %v4575_v55 = vpack.c.bf16 %v1173_v18, %v1172_v17 }
 0x3bc   :  { %4536 = vmatpush3.bf16.msra.mxu1 %v4535_v23  ;;  %v4579_v23 = vpack.c.bf16 %v1175_v22, %v1174_v19 }
 0x3bd   :  { %4537 = vmatprep.subr.bf16.mxu1 %v5435_v2 }
 0x3c0   :  { %4539 = vmatpush3.bf16.msra.mxu1 %v4538_v29  ;;  %v4583_v29 = vpack.c.bf16 %v1177_v26, %v1176_v25 }
 0x3c1   :  { %4540 = vmatprep.subr.bf16.mxu1 %v5435_v2 }
 0x3c4   :  { %4542 = vmatpush3.bf16.msra.mxu1 %v4541_v34  ;;  %v4587_v34 = vpack.c.bf16 %v1179_v31, %v1178_v30 }
 0x3c5   :  { %4543 = vmatprep.subr.bf16.mxu1 %v5435_v2 }
 0x3c8   :  { %4545 = vmatpush3.bf16.msra.mxu1 %v4544_v38 }
 0x3c9   :  { %4546 = vmatprep.subr.bf16.mxu1 %v5435_v2 }
 0x3cc   :  { %4548 = vmatpush3.bf16.msra.mxu1 %v4547_v36 }
 0x3cd   :  { %4549 = vmatprep.subr.bf16.mxu1 %v5435_v2 }
 0x3d0   :  { %4551 = vmatpush3.bf16.msra.mxu1 %v4550_v58 }
 0x3d1   :  { %4552 = vmatprep.subr.bf16.mxu1 %v5435_v2 }
 0x3d4   :  { %4554 = vmatpush3.bf16.msra.mxu1 %v4553_v51  ;;  %v953_v52 = vpop.f32.mrb[14].mxu0 }
 0x3d5   :  { %v3788_v54 = vpop.f32.mrb[15].mxu0 }
 0x3d7   :  { %3828 = vmatmul.mubr.f32.vlgmr.msra.gmra.mrb[14].mxu1 %v5713_v56  ;;  %v1164_v56 = vld [vmem:[#allocation9 + $0x280] sm:$0xff] }
 0x3d8   :  { %v958_v60 = vpop.f32.mrb[16].mxu0  ;;  %3830 = vmatprep.mubr.msk.f32.mxu1 %vm5436_vm0, %v5437_v7  ;;  %v4559_v4 = vpack.c.bf16 %v1165_v16, %v1164_v56 }
 0x3d9   :  { %v3791_v62 = vpop.f32.mrb[17].mxu0 }
 0x3da   :  { %4560 = vmatprep.subr.bf16.mxu0 %v4559_v4 }
 0x3db   :  { %3831 = vmatmul.mubr.f32.gmra.mrb[16].mxu1 %v848_v61  ;;  %4562 = vmatpush3.bf16.msra.mxu0 %v4559_v4 }
 0x3dc   :  { %v5769_v63 = vpop.f32.mrb[18].mxu0  ;;  %3833 = vmatprep.mubr.msk.f32.mxu1 %vm5436_vm0, %v5437_v7  ;;  %4564 = vmatprep.subr.bf16.mxu0 %v4563_v6 }
 0x3dd   :  { %v3794_v1 = vpop.f32.mrb[19].mxu0 }
 0x3df   :  { %3834 = vmatmul.mubr.f32.gmra.mrb[18].mxu1 %v849_v0  ;;  %4566 = vmatpush3.bf16.msra.mxu0 %v4563_v6 }
 0x3e0   :  { %3842 = vmatprep.mubr.msk.f32.mxu1 %vm583_vm13, %v5723_v59  ;;  %4568 = vmatprep.subr.bf16.mxu0 %v4567_v10 }
 0x3e3   :  { %4570 = vmatpush3.bf16.msra.mxu0 %v4567_v10 }
 0x3e4   :  { %4572 = vmatprep.subr.bf16.mxu0 %v4571_v15 }
 0x3e7   :  { %4574 = vmatpush3.bf16.msra.mxu0 %v4571_v15 }
 0x3e8   :  { %4576 = vmatprep.subr.bf16.mxu0 %v4575_v55 }
 0x3eb   :  { %4578 = vmatpush3.bf16.msra.mxu0 %v4575_v55 }
 0x3ec   :  { %4580 = vmatprep.subr.bf16.mxu0 %v4579_v23 }
 0x3ef   :  { %4582 = vmatpush3.bf16.msra.mxu0 %v4579_v23 }
 0x3f0   :  { %4584 = vmatprep.subr.bf16.mxu0 %v4583_v29 }
 0x3f3   :  { %4586 = vmatpush3.bf16.msra.mxu0 %v4583_v29 }
 0x3f4   :  { %4588 = vmatprep.subr.bf16.mxu0 %v4587_v34 }
 0x3f7   :  { %4590 = vmatpush3.bf16.msra.mxu0 %v4587_v34 }
 0x3f8   :  { %4597 = vmatprep.subr.bf16.mxu0 %v5435_v2 }
 0x48a   :  { %v5776_v12 = vpop.f32.mrb[12].mxu1 }
 0x48b   :  { %v5778_v14 = vpop.f32.mrb[13].mxu1 }
 0x4aa   :  { %v1033_v35 = vpop.f32.mrb[14].mxu1 }
 0x4ab   :  { %v1034_v38 = vadd.f32 %v1033_v35, %v953_v52  ;;  %v3829_v39 = vpop.f32.mrb[15].mxu1 }
 0x4ac   :  { %v118_v39 = vld [vmem:[#allocation6] sm:$0xff] }
 0x4ad   :  { %v1052_v41 = vadd.f32 %v3186_v37, %v1034_v38 }
 0x4ae   :  { %v1038_v36 = vpop.f32.mrb[16].mxu1 }
 0x4af   :  { %v1058_v42 = vand.u32 2147483647, %v1052_v41  ;;  %v1039_v44 = vadd.f32 %v1038_v36, %v958_v60  ;;  %v3832_v58 = vpop.f32.mrb[17].mxu1  ;;  %v1055_v11 = vmax.f32 %v1052_v41, 0.0  ;;  %v119_v36 = vld [vmem:[#allocation6 + $0x8] sm:$0xff] }
 0x4b0   :  { %v1462_v58 = vld [vmem:[#allocation9 + $0x320] sm:$0xff] }
 0x4b1   :  { %v1061_v47 = vsub.f32 0.0, %v1058_v42  ;;  %v1053_v48 = vadd.f32 %v3186_v37, %v1039_v44  ;;  %v4592_v42 = vpack.c.bf16 %v119_v36, %v118_v39 }
 0x4b2   :  { %v1043_v51 = vpop.f32.mrb[18].mxu1 }
 0x4b3   :  { %v1064_v54 = vmul.f32 1.442695, %v1061_v47  ;;  %v1059_v61 = vand.u32 2147483647, %v1053_v48  ;;  %v1044_v62 = vadd.f32 %v1043_v51, %v5769_v63  ;;  %v3835_v0 = vpop.f32.mrb[19].mxu1  ;;  %v1056_v18 = vmax.f32 %v1053_v48, 0.0 }
 0x4b4   :  { %v1468_v0 = vld [vmem:[#allocation9 + $0x350] sm:$0xff] }
 0x4b5   :  { %5068 = vpow2.f32 %v1064_v54  ;;  %v1062_v1 = vsub.f32 0.0, %v1059_v61  ;;  %v1054_v56 = vadd.f32 %v3186_v37, %v1044_v62  ;;  %v1466_v54 = vld [vmem:[#allocation9 + $0x340] sm:$0xff]  ;;  %v1467_v61 = vld [vmem:[#allocation9 + $0x348] sm:$0xff] }
 0x4b6   :  { %v4634_v62 = vpack.c.bf16 %v1467_v61, %v1466_v54 }
 0x4b7   :  { %v1066_v16 = vmul.f32 1.442695, %v1062_v1  ;;  %v1060_v3 = vand.u32 2147483647, %v1054_v56  ;;  %v1057_v23 = vmax.f32 %v1054_v56, 0.0  ;;  %v1469_v1 = vld [vmem:[#allocation9 + $0x358] sm:$0xff] }
 0x4b9   :  { %5070 = vpow2.f32 %v1066_v16  ;;  %v1063_v52 = vsub.f32 0.0, %v1060_v3  ;;  %v1470_v16 = vld [vmem:[#allocation9 + $0x360] sm:$0xff]  ;;  %v1471_v3 = vld [vmem:[#allocation9 + $0x368] sm:$0xff] }
 0x4bb   :  { %v1068_v4 = vmul.f32 1.442695, %v1063_v52  ;;  %v4640_v52 = vpack.c.bf16 %v1471_v3, %v1470_v16 }
 0x4bd   :  { %5072 = vpow2.f32 %v1068_v4  ;;  %v1472_v4 = vld [vmem:[#allocation9 + $0x370] sm:$0xff] }
 0x4bf   :  { %v5069_v5 = vpop.eup %5068 }
 0x4c0   :  { %v1070_v60 = vadd.f32 1.0, %v5069_v5  ;;  %v1473_v5 = vld [vmem:[#allocation9 + $0x378] sm:$0xff] }
 0x4c2   :  { %5074 = vlog2.f32 %v1070_v60  ;;  %v4643_v60 = vpack.c.bf16 %v1473_v5, %v1472_v4 }
 0x4c3   :  { %v5071_v6 = vpop.eup %5070 }
 0x4c4   :  { %v1071_v8 = vadd.f32 1.0, %v5071_v6  ;;  %v1478_v6 = vld [vmem:[#allocation9 + $0x380] sm:$0xff] }
 0x4c6   :  { %5076 = vlog2.f32 %v1071_v8  ;;  %v1479_v8 = vld [vmem:[#allocation9 + $0x388] sm:$0xff] }
 0x4c7   :  { %v5073_v9 = vpop.eup %5072 }
 0x4c8   :  { %v1072_v10 = vadd.f32 1.0, %v5073_v9 }
 0x4ca   :  { %5078 = vlog2.f32 %v1072_v10  ;;  %v4598_v10 = vpack.c.bf16 %v1479_v8, %v1478_v6  ;;  %v1738_v6 = vld [vmem:[#allocation9 + $0x400] sm:$0xff]  ;;  %v1739_v8 = vld [vmem:[#allocation9 + $0x408] sm:$0xff] }
 0x4cc   :  { %v5075_v63 = vpop.eup %5074 }
 0x4cd   :  { %v1074_v13 = vmul.f32 0.6931472, %v5075_v63 }
 0x4cf   :  { %v1079_v15 = vadd.f32 %v1074_v13, %v1055_v11  ;;  %v1480_v11 = vld [vmem:[#allocation9 + $0x390] sm:$0xff]  ;;  %v1481_v13 = vld [vmem:[#allocation9 + $0x398] sm:$0xff] }
 0x4d0   :  { %v5077_v17 = vpop.eup %5076 }
 0x4d1   :  { %v1076_v55 = vmul.f32 0.6931472, %v5077_v17  ;;  %5080 = vtanh.f32 %v1079_v15  ;;  %v4601_v17 = vpack.c.bf16 %v1481_v13, %v1480_v11  ;;  %v1743_v13 = vld [vmem:[#allocation9 + $0x428] sm:$0xff] }
 0x4d3   :  { %v1080_v19 = vadd.f32 %v1076_v55, %v1056_v18  ;;  %v1482_v55 = vld [vmem:[#allocation9 + $0x3a0] sm:$0xff] }
 0x4d4   :  { %v5079_v22 = vpop.eup %5078 }
 0x4d5   :  { %5082 = vtanh.f32 %v1080_v19  ;;  %v1078_v25 = vmul.f32 0.6931472, %v5079_v22  ;;  %v1483_v19 = vld [vmem:[#allocation9 + $0x3a8] sm:$0xff] }
 0x4d7   :  { %v1081_v26 = vadd.f32 %v1078_v25, %v1057_v23  ;;  %v4604_v23 = vpack.c.bf16 %v1483_v19, %v1482_v55  ;;  %v1748_v19 = vld [vmem:[#allocation9 + $0x450] sm:$0xff] }
 0x4d9   :  { %5084 = vtanh.f32 %v1081_v26  ;;  %v1484_v26 = vld [vmem:[#allocation9 + $0x3b0] sm:$0xff] }
 0x4db   :  { %v5081_v29 = vpop.eup %5080 }
 0x4dc   :  { %v1085_v31 = vmul.f32 %v5081_v29, %v1052_v41  ;;  %v1460_v41 = vld [vmem:[#allocation9 + $0x310] sm:$0xff]  ;;  %v1485_v29 = vld [vmem:[#allocation9 + $0x3b8] sm:$0xff] }
 0x4df   :  { %v5083_v30 = vpop.eup %5082 }
 0x4e0   :  { %v1086_v34 = vmul.f32 %v5083_v30, %v1053_v48  ;;  %v1464_v48 = vld [vmem:[#allocation9 + $0x330] sm:$0xff] }
 0x4e2   :  { %v4555_v35 = vpack.c.bf16 %v1086_v34, %v1085_v31  ;;  %v4607_v31 = vpack.c.bf16 %v1485_v29, %v1484_v26  ;;  %v1751_v26 = vld [vmem:[#allocation9 + $0x468] sm:$0xff] }
 0x4e3   :  { %v5085_v37 = vpop.eup %5084 }
 0x4e4   :  { %4556 = vmatprep.subr.bf16.mxu1 %v4555_v35  ;;  %v1087_v38 = vmul.f32 %v5085_v37, %v1054_v56  ;;  %v4637_v56 = vpack.c.bf16 %v1469_v1, %v1468_v0  ;;  %v1487_v37 = vld [vmem:[#allocation9 + $0x3c8] sm:$0xff]  ;;  %v1492_v0 = vld [vmem:[#allocation9 + $0x3f0] sm:$0xff]  ;;  %v1493_v1 = vld [vmem:[#allocation9 + $0x3f8] sm:$0xff] }
 0x4e5   :  { %4558 = vmatpush3.bf16.msra.mxu1 %v4555_v35  ;;  %v1486_v35 = vld [vmem:[#allocation9 + $0x3c0] sm:$0xff] }
 0x4e6   :  { %3840 = vmatprep.subr.mxu1 %v1087_v38  ;;  %v4610_v39 = vpack.c.bf16 %v1487_v37, %v1486_v35 }
 0x4e9   :  { %3841 = vmatpush3.msra.mxu1 %v1087_v38 }
 0x4ea   :  { %3843 = vmatmul.mubr.msk.f32.vlgmr.msra.gmra.mrb[20].mxu1 %vm583_vm13, %v5734_v40  ;;  %4591 = vmatprep.subr.bf16.mxu1 %v5435_v2 }
 0x4eb   :  { %4593 = vmatpush3.bf16.msra.mxu1 %v4592_v42  ;;  %3884 = vmatprep.mubr.msk.f32.mxu1 %vm5436_vm0, %v5437_v7 }
 0x4ec   :  { %4594 = vmatprep.subr.bf16.mxu1 %v5435_v2 }
 0x4ee   :  { %3885 = vmatmul.mubr.msk.f32.vlgmr.msra.gmra.mrb[22].mxu1 %vm170_vm1, %v5625_v20  ;;  %v1458_v20 = vld [vmem:[#allocation9 + $0x300] sm:$0xff] }
 0x4ef   :  { %3887 = vmatprep.mubr.msk.f32.mxu1 %vm5436_vm0, %v5437_v7  ;;  %4596 = vmatpush3.bf16.msra.mxu1 %v4592_v42 }
 0x4f0   :  { %4621 = vmatprep.subr.bf16.mxu1 %v5435_v2 }
 0x4f2   :  { %3888 = vmatmul.mubr.msk.f32.gmra.mrb[24].mxu1 %vm170_vm1, %v5630_v21  ;;  %v1459_v21 = vld [vmem:[#allocation9 + $0x308] sm:$0xff] }
 0x4f3   :  { %3890 = vmatprep.mubr.msk.f32.mxu1 %vm5436_vm0, %v5437_v7 }
 0x4f6   :  { %3891 = vmatmul.mubr.msk.f32.gmra.mrb[26].mxu1 %vm170_vm1, %v5649_v28  ;;  %v4622_v28 = vpack.c.bf16 %v1459_v21, %v1458_v20  ;;  %v1488_v20 = vld [vmem:[#allocation9 + $0x3d0] sm:$0xff]  ;;  %v1489_v21 = vld [vmem:[#allocation9 + $0x3d8] sm:$0xff] }
 0x4f7   :  { %3897 = vmatprep.mubr.msk.f32.mxu1 %vm5436_vm0, %v5437_v7 }
 0x4fa   :  { %3898 = vmatmul.mubr.msk.f32.vlgmr.msra.gmra.mrb[28].mxu1 %vm170_vm1, %v5635_v24  ;;  %v1461_v24 = vld [vmem:[#allocation9 + $0x318] sm:$0xff] }
 0x4fb   :  { %3900 = vmatprep.mubr.msk.f32.mxu1 %vm5436_vm0, %v5437_v7  ;;  %4623 = vmatpush3.bf16.msra.mxu1 %v4622_v28  ;;  %v4625_v44 = vpack.c.bf16 %v1461_v24, %v1460_v41  ;;  %v4613_v24 = vpack.c.bf16 %v1489_v21, %v1488_v20 }
 0x4fc   :  { %4624 = vmatprep.subr.bf16.mxu1 %v5435_v2 }
 0x4fe   :  { %3901 = vmatmul.mubr.msk.f32.gmra.mrb[30].mxu1 %vm170_vm1, %v5646_v27  ;;  %v1463_v27 = vld [vmem:[#allocation9 + $0x328] sm:$0xff] }
 0x4ff   :  { %3903 = vmatprep.mubr.msk.f32.mxu1 %vm5436_vm0, %v5437_v7  ;;  %4626 = vmatpush3.bf16.msra.mxu1 %v4625_v44  ;;  %v4628_v47 = vpack.c.bf16 %v1463_v27, %v1462_v58  ;;  %v1490_v27 = vld [vmem:[#allocation9 + $0x3e0] sm:$0xff] }
 0x500   :  { %4627 = vmatprep.subr.bf16.mxu1 %v5435_v2 }
 0x502   :  { %3904 = vmatmul.mubr.msk.f32.gmra.mrb[32].mxu1 %vm170_vm1, %v5660_v32  ;;  %v1465_v32 = vld [vmem:[#allocation9 + $0x338] sm:$0xff] }
 0x503   :  { %3979 = vmatprep.mubr.msk.f32.mxu1 %vm5436_vm0, %v5437_v7  ;;  %4629 = vmatpush3.bf16.msra.mxu1 %v4628_v47  ;;  %v4631_v51 = vpack.c.bf16 %v1465_v32, %v1464_v48  ;;  %v1491_v47 = vld [vmem:[#allocation9 + $0x3e8] sm:$0xff] }
 0x504   :  { %4630 = vmatprep.subr.bf16.mxu1 %v5435_v2 }
 0x507   :  { %4632 = vmatpush3.bf16.msra.mxu1 %v4631_v51  ;;  %v4616_v51 = vpack.c.bf16 %v1491_v47, %v1490_v27 }
 0x508   :  { %4633 = vmatprep.subr.bf16.mxu1 %v5435_v2 }
 0x50b   :  { %4635 = vmatpush3.bf16.msra.mxu1 %v4634_v62 }
 0x50c   :  { %4636 = vmatprep.subr.bf16.mxu1 %v5435_v2 }
 0x50f   :  { %4638 = vmatpush3.bf16.msra.mxu1 %v4637_v56  ;;  %v4619_v56 = vpack.c.bf16 %v1493_v1, %v1492_v0  ;;  %v5851_v1 = vld [vmem:[#allocation3] sm:$0xff] }
 0x510   :  { %4639 = vmatprep.subr.bf16.mxu1 %v5435_v2 }
 0x513   :  { %4641 = vmatpush3.bf16.msra.mxu1 %v4640_v52 }
 0x514   :  { %4642 = vmatprep.subr.bf16.mxu1 %v5435_v2 }
 0x517   :  { %4644 = vmatpush3.bf16.msra.mxu1 %v4643_v60 }
 0x5bd   :  { %v3844_v9 = vpop.f32.mrb[20].mxu1 }
 0x5be   :  { %v1154_v63 = vpop.f32.mrb[21].mxu1 }
 0x5bf   :  { %3877 = vmatprep.mubr.f32.mxu0 %v1154_v63  ;;  %v1741_v63 = vld [vmem:[#allocation9 + $0x418] sm:$0xff] }
 0x5c0   :  { %3878 = vmatmul.mubr.f32.vlgmr.msra.gmra.mrb[20].mxu0 %v3844_v9  ;;  %v1740_v9 = vld [vmem:[#allocation9 + $0x410] sm:$0xff] }
 0x5c1   :  { %v1348_v15 = vpop.f32.mrb[22].mxu1  ;;  %4599 = vmatpush3.bf16.msra.mxu0 %v4598_v10  ;;  %3938 = vmatprep.mubr.msk.f32.mxu0 %vm5436_vm0, %v5437_v7  ;;  %v4649_v10 = vpack.c.bf16 %v1739_v8, %v1738_v6  ;;  %v4653_v11 = vpack.c.bf16 %v1741_v63, %v1740_v9  ;;  %v1882_v8 = vld [vmem:[#allocation9 + $0x540] sm:$0xff]  ;;  %v1883_v9 = vld [vmem:[#allocation9 + $0x548] sm:$0xff]  ;;  %v1884_v63 = vld [vmem:[#allocation9 + $0x550] sm:$0xff] }
 0x5c2   :  { %v3886_v18 = vpop.f32.mrb[23].mxu1  ;;  %4600 = vmatprep.subr.bf16.mxu0 %v5435_v2 }
 0x5c3   :  { %4650 = vmatprep.subr.bf16.mxu1 %v4649_v10  ;;  %v1747_v18 = vld [vmem:[#allocation9 + $0x448] sm:$0xff] }
 0x5c5   :  { %v1353_v22 = vpop.f32.mrb[24].mxu1  ;;  %4602 = vmatpush3.bf16.msra.mxu0 %v4601_v17  ;;  %v1746_v17 = vld [vmem:[#allocation9 + $0x440] sm:$0xff] }
 0x5c6   :  { %v3889_v25 = vpop.f32.mrb[25].mxu1  ;;  %4603 = vmatprep.subr.bf16.mxu0 %v5435_v2  ;;  %v4665_v55 = vpack.c.bf16 %v1747_v18, %v1746_v17  ;;  %v1857_v18 = vld [vmem:[#allocation9 + $0x480] sm:$0xff] }
 0x5c7   :  { %v1750_v25 = vld [vmem:[#allocation9 + $0x460] sm:$0xff] }
 0x5c8   :  { %v4673_v29 = vpack.c.bf16 %v1751_v26, %v1750_v25  ;;  %v2072_v26 = vld [vmem:[#allocation9 + $0x590] sm:$0xff] }
 0x5c9   :  { %v1358_v30 = vpop.f32.mrb[26].mxu1  ;;  %4605 = vmatpush3.bf16.msra.mxu0 %v4604_v23 }
 0x5ca   :  { %v3892_v34 = vpop.f32.mrb[27].mxu1  ;;  %4606 = vmatprep.subr.bf16.mxu0 %v5435_v2 }
 0x5cd   :  { %v1428_v38 = vpop.f32.mrb[28].mxu1  ;;  %4608 = vmatpush3.bf16.msra.mxu0 %v4607_v31  ;;  %v1753_v31 = vld [vmem:[#allocation9 + $0x478] sm:$0xff] }
 0x5ce   :  { %v1442_v36 = vsub.f32 %v1348_v15, %v1428_v38  ;;  %v3899_v42 = vpop.f32.mrb[29].mxu1  ;;  %4609 = vmatprep.subr.bf16.mxu0 %v5435_v2  ;;  %v1745_v15 = vld [vmem:[#allocation9 + $0x438] sm:$0xff] }
 0x5cf   :  { %v3196_v42 = vld [vmem:[#allocation11 + $0x4] ss:$0 sm:$0xff] }
 0x5d0   :  { %v1445_v28 = vmul.f32 %v1442_v36, %v1442_v36 }
 0x5d1   :  { %v1433_v41 = vpop.f32.mrb[30].mxu1  ;;  %4611 = vmatpush3.bf16.msra.mxu0 %v4610_v39 }
 0x5d2   :  { %v1443_v44 = vsub.f32 %v1353_v22, %v1433_v41  ;;  %1448 = vadd.xlane.f32.xlu1 %v1445_v28  ;;  %v3902_v58 = vpop.f32.mrb[31].mxu1  ;;  %4612 = vmatprep.subr.bf16.mxu0 %v5435_v2  ;;  %v1749_v22 = vld [vmem:[#allocation9 + $0x458] sm:$0xff] }
 0x5d3   :  { %v4669_v23 = vpack.c.bf16 %v1749_v22, %v1748_v19  ;;  %v2070_v22 = vld [vmem:[#allocation9 + $0x580] sm:$0xff] }
 0x5d4   :  { %v1446_v48 = vmul.f32 %v1443_v44, %v1443_v44 }
 0x5d5   :  { %v1438_v32 = vpop.f32.mrb[32].mxu1  ;;  %4614 = vmatpush3.bf16.msra.mxu0 %v4613_v24 }
 0x5d6   :  { %v1444_v54 = vsub.f32 %v1358_v30, %v1438_v32  ;;  %1450 = vadd.xlane.f32.xlu0 %v1446_v48  ;;  %v3905_v61 = vpop.f32.mrb[33].mxu1  ;;  %4615 = vmatprep.subr.bf16.mxu0 %v5435_v2  ;;  %v1752_v30 = vld [vmem:[#allocation9 + $0x470] sm:$0xff] }
 0x5d7   :  { %v4677_v34 = vpack.c.bf16 %v1753_v31, %v1752_v30  ;;  %v2074_v31 = vld [vmem:[#allocation9 + $0x5a0] sm:$0xff] }
 0x5d8   :  { %v1447_v62 = vmul.f32 %v1444_v54, %v1444_v54 }
 0x5d9   :  { %4617 = vmatpush3.bf16.msra.mxu0 %v4616_v51 }
 0x5da   :  { %1452 = vadd.xlane.f32.xlu0 %v1447_v62  ;;  %4618 = vmatprep.subr.bf16.mxu0 %v5435_v2 }
 0x5dd   :  { %4620 = vmatpush3.bf16.msra.mxu0 %v4619_v56  ;;  %v1874_v56 = vld [vmem:[#allocation9 + $0x500] sm:$0xff] }
 0x65f   :  { %v1449_v16 = vpop.xlane.xlu1 %1448 }
 0x660   :  { %v1454_v3 = vmul.f32 %v1449_v16, %v5688_v45  ;;  %v1474_v52 = vmul.f32 %v1449_v16, %v5683_v43  ;;  %v1875_v16 = vld [vmem:[#allocation9 + $0x508] sm:$0xff] }
 0x662   :  { %3939 = vmatmul.mubr.f32.vlgmr.msra.gmra.mrb[22].mxu0 %v1474_v52  ;;  %3980 = vmatmul.mubr.f32.vlgmr.msra.gmra.mrb[34].mxu1 %v1454_v3  ;;  %v4681_v3 = vpack.c.bf16 %v1875_v16, %v1874_v56  ;;  %v1876_v52 = vld [vmem:[#allocation9 + $0x510] sm:$0xff] }
 0x663   :  { %v1451_v4 = vpop.xlane.xlu0 %1450  ;;  %3941 = vmatprep.mubr.msk.f32.mxu0 %vm5436_vm0, %v5437_v7  ;;  %3982 = vmatprep.mubr.msk.f32.mxu1 %vm5436_vm0, %v5437_v7 }
 0x664   :  { %v1455_v2 = vmul.f32 %v1451_v4, %v5698_v49  ;;  %v1475_v5 = vmul.f32 %v1451_v4, %v5690_v46  ;;  %4652 = vmatpush3.bf16.msra.mxu1 %v4649_v10  ;;  %v1877_v4 = vld [vmem:[#allocation9 + $0x518] sm:$0xff]  ;;  %v4697_v10 = vpack.c.bf16 %v1883_v9, %v1882_v8 }
 0x665   :  { %4654 = vmatprep.subr.bf16.mxu1 %v4653_v11 }
 0x666   :  { %3942 = vmatmul.mubr.f32.gmra.mrb[24].mxu0 %v1475_v5  ;;  %3983 = vmatmul.mubr.f32.gmra.mrb[36].mxu1 %v1455_v2  ;;  %v4685_v2 = vpack.c.bf16 %v1877_v4, %v1876_v52  ;;  %v1878_v5 = vld [vmem:[#allocation9 + $0x520] sm:$0xff] }
 0x667   :  { %v1453_v60 = vpop.xlane.xlu0 %1452  ;;  %3944 = vmatprep.mubr.msk.f32.mxu0 %vm5436_vm0, %v5437_v7  ;;  %3985 = vmatprep.mubr.msk.f32.mxu1 %vm5436_vm0, %v5437_v7  ;;  %v1742_v7 = vld [vmem:[#allocation9 + $0x420] sm:$0xff] }
 0x668   :  { %v1456_v43 = vmul.f32 %v1453_v60, %v5706_v53  ;;  %v1476_v45 = vmul.f32 %v1453_v60, %v5700_v50  ;;  %v4657_v50 = vpack.c.bf16 %v1743_v13, %v1742_v7  ;;  %v1744_v53 = vld [vmem:[#allocation9 + $0x430] sm:$0xff]  ;;  %4656 = vmatpush3.bf16.msra.mxu1 %v4653_v11  ;;  %v1885_v11 = vld [vmem:[#allocation9 + $0x558] sm:$0xff]  ;;  %v1886_v13 = vld [vmem:[#allocation9 + $0x560] sm:$0xff] }
 0x669   :  { %v4701_v7 = vpack.c.bf16 %v1885_v11, %v1884_v63 }
 0x66a   :  { %3945 = vmatmul.mubr.f32.gmra.mrb[26].mxu0 %v1476_v45  ;;  %3986 = vmatmul.mubr.f32.gmra.mrb[38].mxu1 %v1456_v43  ;;  %v1880_v43 = vld [vmem:[#allocation9 + $0x530] sm:$0xff]  ;;  %v1881_v45 = vld [vmem:[#allocation9 + $0x538] sm:$0xff] }
 0x66b   :  { %3994 = vmatprep.mubr.msk.f32.mxu0 %vm583_vm13, %v5723_v59  ;;  %4658 = vmatprep.subr.bf16.mxu1 %v4657_v50  ;;  %v4661_v59 = vpack.c.bf16 %v1745_v15, %v1744_v53  ;;  %v4693_v6 = vpack.c.bf16 %v1881_v45, %v1880_v43  ;;  %v1888_v15 = vld [vmem:[#allocation9 + $0x570] sm:$0xff] }
 0x66c   :  { %4660 = vmatpush3.bf16.msra.mxu1 %v4657_v50  ;;  %v1887_v50 = vld [vmem:[#allocation9 + $0x568] sm:$0xff] }
 0x66d   :  { %4662 = vmatprep.subr.bf16.mxu1 %v4661_v59  ;;  %v4705_v53 = vpack.c.bf16 %v1887_v50, %v1886_v13 }
 0x670   :  { %4664 = vmatpush3.bf16.msra.mxu1 %v4661_v59  ;;  %v1889_v59 = vld [vmem:[#allocation9 + $0x578] sm:$0xff] }
 0x671   :  { %4666 = vmatprep.subr.bf16.mxu1 %v4665_v55  ;;  %v4709_v17 = vpack.c.bf16 %v1889_v59, %v1888_v15 }
 0x674   :  { %4668 = vmatpush3.bf16.msra.mxu1 %v4665_v55  ;;  %v1858_v55 = vld [vmem:[#allocation9 + $0x488] sm:$0xff] }
 0x675   :  { %4670 = vmatprep.subr.bf16.mxu1 %v4669_v23  ;;  %v5854_v19 = vpack.c.bf16 %v1858_v55, %v1857_v18  ;;  %v5864_v18 = vld [vmem:[#allocation11 + $0x3] ss:$0 sm:$0xff] }
 0x678   :  { %4672 = vmatpush3.bf16.msra.mxu1 %v4669_v23  ;;  %v2071_v23 = vld [vmem:[#allocation9 + $0x588] sm:$0xff] }
 0x679   :  { %4674 = vmatprep.subr.bf16.mxu1 %v4673_v29  ;;  %v4745_v25 = vpack.c.bf16 %v2071_v23, %v2070_v22  ;;  %v1859_v23 = vld [vmem:[#allocation9 + $0x490] sm:$0xff] }
 0x67c   :  { %4676 = vmatpush3.bf16.msra.mxu1 %v4673_v29  ;;  %v2073_v29 = vld [vmem:[#allocation9 + $0x598] sm:$0xff] }
 0x67d   :  { %4678 = vmatprep.subr.bf16.mxu1 %v4677_v34  ;;  %v4749_v30 = vpack.c.bf16 %v2073_v29, %v2072_v26 }
 0x680   :  { %4680 = vmatpush3.bf16.msra.mxu1 %v4677_v34  ;;  %v2075_v34 = vld [vmem:[#allocation9 + $0x5a8] sm:$0xff] }
 0x681   :  { %4746 = vmatprep.subr.bf16.mxu1 %v4745_v25 }
 0x693   :  { %v5845_v49 = vpop.f32.mrb[20].mxu0 }
 0x694   :  { %v5847_v46 = vpop.f32.mrb[21].mxu0 }
 0x695   :  { %v5871_v29 = vadd.f32 %v5864_v18, %v5847_v46 }
 0x735   :  { %v1560_v35 = vpop.f32.mrb[22].mxu0  ;;  %v1640_v37 = vpop.f32.mrb[34].mxu1 }
 0x736   :  { %v1641_v38 = vadd.f32 %v1640_v37, %v1560_v35  ;;  %v3940_v39 = vpop.f32.mrb[23].mxu0  ;;  %v3981_v36 = vpop.f32.mrb[35].mxu1  ;;  %v4753_v35 = vpack.c.bf16 %v2075_v34, %v2074_v31  ;;  %v2076_v37 = vld [vmem:[#allocation9 + $0x5b0] sm:$0xff] }
 0x737   :  { %v2078_v36 = vld [vmem:[#allocation9 + $0x5c0] sm:$0xff] }
 0x738   :  { %v1659_v44 = vadd.f32 %v3196_v42, %v1641_v38  ;;  %v2077_v38 = vld [vmem:[#allocation9 + $0x5b8] sm:$0xff] }
 0x739   :  { %v1565_v20 = vpop.f32.mrb[24].mxu0  ;;  %v1645_v21 = vpop.f32.mrb[36].mxu1  ;;  %v4757_v39 = vpack.c.bf16 %v2077_v38, %v2076_v37  ;;  %v1861_v37 = vld [vmem:[#allocation9 + $0x4a0] sm:$0xff]  ;;  %v1862_v38 = vld [vmem:[#allocation9 + $0x4a8] sm:$0xff] }
 0x73a   :  { %v1646_v28 = vadd.f32 %v1645_v21, %v1565_v20  ;;  %v3943_v41 = vpop.f32.mrb[25].mxu0  ;;  %v3984_v24 = vpop.f32.mrb[37].mxu1  ;;  %v2080_v21 = vld [vmem:[#allocation9 + $0x5d0] sm:$0xff] }
 0x73b   :  { %v2082_v24 = vld [vmem:[#allocation9 + $0x5e0] sm:$0xff] }
 0x73c   :  { %v1660_v58 = vadd.f32 %v3196_v42, %v1646_v28  ;;  %v2081_v28 = vld [vmem:[#allocation9 + $0x5d8] sm:$0xff] }
 0x73d   :  { %v1570_v27 = vpop.f32.mrb[26].mxu0  ;;  %v1650_v47 = vpop.f32.mrb[38].mxu1  ;;  %v4765_v41 = vpack.c.bf16 %v2081_v28, %v2080_v21 }
 0x73e   :  { %v1651_v48 = vadd.f32 %v1650_v47, %v1570_v27  ;;  %v3946_v32 = vpop.f32.mrb[27].mxu0  ;;  %v3987_v51 = vpop.f32.mrb[39].mxu1  ;;  %v4645_v54 = vpack.c.bf16 %v1660_v58, %v1659_v44  ;;  %v2083_v44 = vld [vmem:[#allocation9 + $0x5e8] sm:$0xff]  ;;  %v2084_v27 = vld [vmem:[#allocation9 + $0x5f0] sm:$0xff]  ;;  %v2085_v47 = vld [vmem:[#allocation9 + $0x5f8] sm:$0xff] }
 0x73f   :  { %v4769_v58 = vpack.c.bf16 %v2083_v44, %v2082_v24  ;;  %v5857_v32 = vld [vmem:[#allocation3 + $0x8] sm:$0xff]  ;;  %v3199_v51 = vld [vmem:[#allocation11 + $0x5] ss:$0 sm:$0xff] }
 0x740   :  { %v1661_v61 = vadd.f32 %v3196_v42, %v1651_v48  ;;  %4646 = vmatprep.subr.bf16.mxu0 %v4645_v54  ;;  %v2079_v42 = vld [vmem:[#allocation9 + $0x5c8] sm:$0xff]  ;;  %v4773_v48 = vpack.c.bf16 %v2085_v47, %v2084_v27  ;;  %v1865_v24 = vld [vmem:[#allocation9 + $0x4c0] sm:$0xff]  ;;  %v1868_v47 = vld [vmem:[#allocation9 + $0x4d8] sm:$0xff] }
 0x741   :  { %4648 = vmatpush3.bf16.msra.mxu0 %v4645_v54  ;;  %v4761_v20 = vpack.c.bf16 %v2079_v42, %v2078_v36  ;;  %v1863_v36 = vld [vmem:[#allocation9 + $0x4b0] sm:$0xff]  ;;  %v1864_v42 = vld [vmem:[#allocation9 + $0x4b8] sm:$0xff]  ;;  %v1866_v44 = vld [vmem:[#allocation9 + $0x4c8] sm:$0xff] }
 0x742   :  { %3992 = vmatprep.subr.mxu0 %v1661_v61  ;;  %v4725_v21 = vpack.c.bf16 %v1864_v42, %v1863_v36  ;;  %v2312_v42 = vld [vmem:[#allocation9 + $0x670] sm:$0xff] }
 0x745   :  { %3993 = vmatpush3.msra.mxu0 %v1661_v61 }
 0x746   :  { %3995 = vmatmul.mubr.msk.f32.vlgmr.msra.gmra.mrb[28].mxu0 %vm583_vm13, %v5734_v40  ;;  %4682 = vmatprep.subr.bf16.mxu0 %v4681_v3  ;;  %v1879_v40 = vld [vmem:[#allocation9 + $0x528] sm:$0xff] }
 0x747   :  { %4684 = vmatpush3.bf16.msra.mxu0 %v4681_v3  ;;  %v4689_v60 = vpack.c.bf16 %v1879_v40, %v1878_v5  ;;  %v3183_v5 = vld [vmem:[#allocation11 + $0x1] ss:$0 sm:$0xff] }
 0x748   :  { %4686 = vmatprep.subr.bf16.mxu0 %v4685_v2  ;;  %v5861_v40 = vadd.f32 %v3183_v5, %v5778_v14  ;;  %v5867_v22 = vadd.f32 %v5776_v12, %v3183_v5  ;;  %v4721_v12 = vpack.c.bf16 %v1862_v38, %v1861_v37  ;;  %v2299_v5 = vld [vmem:[#allocation9 + $0x608] sm:$0xff] }
 0x74a   :  { %v764_v45 = vand.u32 2147483647, %v5861_v40 }
 0x74b   :  { %4688 = vmatpush3.bf16.msra.mxu0 %v4685_v2 }
 0x74c   :  { %4690 = vmatprep.subr.bf16.mxu0 %v4689_v60  ;;  %v766_v9 = vsub.f32 0.0, %v764_v45 }
 0x74f   :  { %4692 = vmatpush3.bf16.msra.mxu0 %v4689_v60 }
 0x750   :  { %4694 = vmatprep.subr.bf16.mxu0 %v4693_v6 }
 0x753   :  { %4696 = vmatpush3.bf16.msra.mxu0 %v4693_v6 }
 0x754   :  { %4698 = vmatprep.subr.bf16.mxu0 %v4697_v10 }
 0x757   :  { %4700 = vmatpush3.bf16.msra.mxu0 %v4697_v10  ;;  %v768_v10 = vmul.f32 1.442695, %v766_v9  ;;  %v2301_v9 = vld [vmem:[#allocation9 + $0x618] sm:$0xff] }
 0x758   :  { %4702 = vmatprep.subr.bf16.mxu0 %v4701_v7 }
 0x75b   :  { %4704 = vmatpush3.bf16.msra.mxu0 %v4701_v7 }
 0x75c   :  { %4706 = vmatprep.subr.bf16.mxu0 %v4705_v53 }
 0x75f   :  { %4708 = vmatpush3.bf16.msra.mxu0 %v4705_v53 }
 0x760   :  { %4710 = vmatprep.subr.bf16.mxu0 %v4709_v17 }
 0x763   :  { %4712 = vmatpush3.bf16.msra.mxu0 %v4709_v17 }
 0x764   :  { %4714 = vmatprep.subr.bf16.mxu0 %v5854_v19 }
 0x819   :  { %v3996_v62 = vpop.f32.mrb[28].mxu0 }
 0x81a   :  { %v1728_v0 = vpop.f32.mrb[29].mxu0 }
 0x81b   :  { %4029 = vmatprep.mubr.f32.mxu1 %v1728_v0 }
 0x81c   :  { %4030 = vmatmul.mubr.f32.vlgmr.msra.gmra.mrb[40].mxu1 %v3996_v62 }
 0x81d   :  { %4134 = vmatprep.mubr.f32.mxu1 %v5851_v1  ;;  %4748 = vmatpush3.bf16.msra.mxu1 %v4745_v25  ;;  %v1860_v25 = vld [vmem:[#allocation9 + $0x498] sm:$0xff] }
 0x81e   :  { %4750 = vmatprep.subr.bf16.mxu1 %v4749_v30  ;;  %v4717_v34 = vpack.c.bf16 %v1860_v25, %v1859_v23  ;;  %v2307_v23 = vld [vmem:[#allocation9 + $0x648] sm:$0xff] }
 0x821   :  { %4752 = vmatpush3.bf16.msra.mxu1 %v4749_v30 }
 0x822   :  { %4754 = vmatprep.subr.bf16.mxu1 %v4753_v35 }
 0x825   :  { %4756 = vmatpush3.bf16.msra.mxu1 %v4753_v35  ;;  %v765_v35 = vand.u32 2147483647, %v5867_v22 }
 0x826   :  { %4758 = vmatprep.subr.bf16.mxu1 %v4757_v39 }
 0x827   :  { %v767_v46 = vsub.f32 0.0, %v765_v35  ;;  %v1260_v35 = vmax.f32 %v5871_v29, 0.0 }
 0x829   :  { %4760 = vmatpush3.bf16.msra.mxu1 %v4757_v39  ;;  %v1262_v39 = vand.u32 2147483647, %v5871_v29 }
 0x82a   :  { %4762 = vmatprep.subr.bf16.mxu1 %v4761_v20 }
 0x82d   :  { %4764 = vmatpush3.bf16.msra.mxu1 %v4761_v20  ;;  %v1264_v20 = vsub.f32 0.0, %v1262_v39 }
 0x82e   :  { %4766 = vmatprep.subr.bf16.mxu1 %v4765_v41 }
 0x831   :  { %4768 = vmatpush3.bf16.msra.mxu1 %v4765_v41  ;;  %v770_v41 = vmul.f32 1.442695, %v767_v46  ;;  %v2311_v46 = vld [vmem:[#allocation9 + $0x668] sm:$0xff] }
 0x832   :  { %4770 = vmatprep.subr.bf16.mxu1 %v4769_v58 }
 0x835   :  { %4772 = vmatpush3.bf16.msra.mxu1 %v4769_v58  ;;  %v1266_v58 = vmul.f32 1.442695, %v1264_v20  ;;  %v2313_v20 = vld [vmem:[#allocation9 + $0x678] sm:$0xff] }
 0x836   :  { %4774 = vmatprep.subr.bf16.mxu1 %v4773_v48 }
 0x839   :  { %4776 = vmatpush3.bf16.msra.mxu1 %v4773_v48  ;;  %v762_v48 = vmax.f32 %v5861_v40, 0.0 }
 0x83c   :  { %4135 = vmatmul.mubr.f32.vlgmr.msra.gmra.mrb[42].mxu1 %v5857_v32 }
 0x8ef   :  { %v4031_v54 = vpop.f32.mrb[40].mxu1 }
 0x8f0   :  { %v1831_v61 = vadd.f32 %v4031_v54, %v3199_v51  ;;  %v1825_v62 = vpop.f32.mrb[41].mxu1 }
 0x8f1   :  { %v1826_v0 = vadd.f32 %v3199_v51, %v1825_v62  ;;  %v1870_v62 = vld [vmem:[#allocation9 + $0x4e8] sm:$0xff] }
 0x8f2   :  { %v1837_v56 = vand.u32 2147483647, %v1831_v61  ;;  %v1835_v7 = vmax.f32 %v1831_v61, 0.0 }
 0x8f3   :  { %v1836_v16 = vand.u32 2147483647, %v1826_v0  ;;  %v1834_v50 = vmax.f32 %v1826_v0, 0.0 }
 0x8f4   :  { %v1839_v3 = vsub.f32 0.0, %v1837_v56  ;;  %v1871_v56 = vld [vmem:[#allocation9 + $0x4f0] sm:$0xff] }
 0x8f5   :  { %v1838_v52 = vsub.f32 0.0, %v1836_v16  ;;  %v1872_v16 = vld [vmem:[#allocation9 + $0x4f8] sm:$0xff] }
 0x8f6   :  { %v1842_v4 = vmul.f32 1.442695, %v1839_v3 }
 0x8f7   :  { %v1840_v2 = vmul.f32 1.442695, %v1838_v52 }
 0x8f8   :  { %5086 = vpow2.f32 %v1842_v4  ;;  %v4741_v4 = vpack.c.bf16 %v1872_v16, %v1871_v56  ;;  %v2534_v56 = vld [vmem:[#allocation9 + $0x6b0] sm:$0xff]  ;;  %v2535_v16 = vld [vmem:[#allocation9 + $0x6b8] sm:$0xff] }
 0x8f9   :  { %5088 = vpow2.f32 %v1840_v2  ;;  %v2298_v2 = vld [vmem:[#allocation9 + $0x600] sm:$0xff] }
 0x8fa   :  { %v4809_v45 = vpack.c.bf16 %v2299_v5, %v2298_v2 }
 0x902   :  { %v5087_v60 = vpop.eup %5086 }
 0x903   :  { %v5089_v43 = vpop.eup %5088  ;;  %v1845_v6 = vadd.f32 1.0, %v5087_v60 }
 0x904   :  { %v1844_v8 = vadd.f32 1.0, %v5089_v43 }
 0x905   :  { %5090 = vlog2.f32 %v1845_v6  ;;  %v5880_v6 = vadd.f32 %v5845_v49, %v5864_v18 }
 0x906   :  { %5092 = vlog2.f32 %v1844_v8  ;;  %v2300_v8 = vld [vmem:[#allocation9 + $0x610] sm:$0xff] }
 0x907   :  { %5094 = vpow2.f32 %v768_v10  ;;  %v1261_v5 = vmax.f32 %v5880_v6, 0.0 }
 0x90f   :  { %v5091_v63 = vpop.eup %5090 }
 0x910   :  { %v5093_v11 = vpop.eup %5092  ;;  %v1849_v13 = vmul.f32 0.6931472, %v5091_v63  ;;  %v4813_v63 = vpack.c.bf16 %v2301_v9, %v2300_v8  ;;  %v2540_v9 = vld [vmem:[#allocation9 + $0x6e0] sm:$0xff] }
 0x911   :  { %v1847_v53 = vmul.f32 0.6931472, %v5093_v11  ;;  %v5095_v59 = vpop.eup %5094  ;;  %v1263_v11 = vand.u32 2147483647, %v5880_v6 }
 0x912   :  { %v1851_v15 = vadd.f32 %v1849_v13, %v1835_v7  ;;  %v772_v17 = vadd.f32 1.0, %v5095_v59  ;;  %v2302_v13 = vld [vmem:[#allocation9 + $0x620] sm:$0xff] }
 0x913   :  { %v1850_v14 = vadd.f32 %v1847_v53, %v1834_v50  ;;  %v2303_v50 = vld [vmem:[#allocation9 + $0x628] sm:$0xff]  ;;  %v1265_v53 = vsub.f32 0.0, %v1263_v11  ;;  %v2542_v11 = vld [vmem:[#allocation9 + $0x6f0] sm:$0xff] }
 0x914   :  { %5096 = vtanh.f32 %v1851_v15  ;;  %v4817_v49 = vpack.c.bf16 %v2303_v50, %v2302_v13  ;;  %v2304_v15 = vld [vmem:[#allocation9 + $0x630] sm:$0xff]  ;;  %v2543_v13 = vld [vmem:[#allocation9 + $0x6f8] sm:$0xff] }
 0x915   :  { %5098 = vtanh.f32 %v1850_v14  ;;  %v2305_v14 = vld [vmem:[#allocation9 + $0x638] sm:$0xff]  ;;  %v4901_v50 = vpack.c.bf16 %v2543_v13, %v2542_v11  ;;  %v2206_v11 = vld [vmem:[#allocation9 + $0x780] sm:$0xff]  ;;  %v2207_v13 = vld [vmem:[#allocation9 + $0x788] sm:$0xff] }
 0x916   :  { %5100 = vlog2.f32 %v772_v17  ;;  %v4821_v17 = vpack.c.bf16 %v2305_v14, %v2304_v15  ;;  %v5903_v15 = vpop.f32.mrb[42].mxu1 }
 0x917   :  { %5102 = vpow2.f32 %v770_v41  ;;  %v2528_v41 = vld [vmem:[#allocation9 + $0x680] sm:$0xff]  ;;  %v5905_v14 = vpop.f32.mrb[43].mxu1 }
 0x918   :  { %5104 = vpow2.f32 %v1266_v58 }
 0x91e   :  { %v5097_v55 = vpop.eup %5096 }
 0x91f   :  { %v5099_v26 = vpop.eup %5098  ;;  %v1855_v31 = vmul.f32 %v5097_v55, %v1831_v61  ;;  %v1869_v61 = vld [vmem:[#allocation9 + $0x4e0] sm:$0xff]  ;;  %v1268_v55 = vmul.f32 1.442695, %v1265_v53 }
 0x920   :  { %v1854_v30 = vmul.f32 %v5099_v26, %v1826_v0  ;;  %v5101_v28 = vpop.eup %5100  ;;  %v4737_v0 = vpack.c.bf16 %v1870_v62, %v1869_v61  ;;  %v2532_v61 = vld [vmem:[#allocation9 + $0x6a0] sm:$0xff]  ;;  %v2533_v62 = vld [vmem:[#allocation9 + $0x6a8] sm:$0xff] }
 0x921   :  { %v775_v27 = vmul.f32 0.6931472, %v5101_v28  ;;  %v5103_v3 = vpop.eup %5102  ;;  %v4837_v28 = vpack.c.bf16 %v2313_v20, %v2312_v42  ;;  %v2748_v42 = vld [vmem:[#allocation9 + $0x738] sm:$0xff] }
 0x922   :  { %4064 = vmatprep.mubr.f32.mxu0 %v1854_v30  ;;  %v5105_v52 = vpop.eup %5104  ;;  %v773_v60 = vadd.f32 1.0, %v5103_v3  ;;  %v763_v30 = vmax.f32 %v5867_v22, 0.0 }
 0x923   :  { %4065 = vmatmul.mubr.f32.vlgmr.msra.gmra.mrb[30].mxu0 %v1855_v31  ;;  %v778_v51 = vadd.f32 %v775_v27, %v762_v48  ;;  %v1270_v43 = vadd.f32 1.0, %v5105_v52  ;;  %v2308_v31 = vld [vmem:[#allocation9 + $0x650] sm:$0xff]  ;;  %v2536_v52 = vld [vmem:[#allocation9 + $0x6c0] sm:$0xff] }
 0x924   :  { %4716 = vmatpush3.bf16.msra.mxu0 %v5854_v19  ;;  %4099 = vmatprep.mubr.f32.mxu0 %v5851_v1  ;;  %v4729_v19 = vpack.c.bf16 %v1866_v44, %v1865_v24  ;;  %v1867_v1 = vld [vmem:[#allocation9 + $0x4d0] sm:$0xff]  ;;  %v2529_v24 = vld [vmem:[#allocation9 + $0x688] sm:$0xff] }
 0x925   :  { %4718 = vmatprep.subr.bf16.mxu0 %v4717_v34  ;;  %v4733_v54 = vpack.c.bf16 %v1868_v47, %v1867_v1  ;;  %5106 = vtanh.f32 %v778_v51  ;;  %v4873_v58 = vpack.c.bf16 %v2529_v24, %v2528_v41  ;;  %v2531_v1 = vld [vmem:[#allocation9 + $0x698] sm:$0xff]  ;;  %v2161_v41 = vmax.f32 %v5905_v14, 0.0 }
 0x926   :  { %5108 = vlog2.f32 %v773_v60  ;;  %v2538_v60 = vld [vmem:[#allocation9 + $0x6d0] sm:$0xff] }
 0x927   :  { %5110 = vlog2.f32 %v1270_v43  ;;  %v2539_v43 = vld [vmem:[#allocation9 + $0x6d8] sm:$0xff] }
 0x928   :  { %4720 = vmatpush3.bf16.msra.mxu0 %v4717_v34  ;;  %5112 = vpow2.f32 %v1268_v55  ;;  %v2309_v34 = vld [vmem:[#allocation9 + $0x658] sm:$0xff]  ;;  %v4893_v8 = vpack.c.bf16 %v2539_v43, %v2538_v60 }
 0x929   :  { %4722 = vmatprep.subr.bf16.mxu0 %v4721_v12  ;;  %v4829_v39 = vpack.c.bf16 %v2309_v34, %v2308_v31 }
 0x92c   :  { %4724 = vmatpush3.bf16.msra.mxu0 %v4721_v12  ;;  %v2310_v12 = vld [vmem:[#allocation9 + $0x660] sm:$0xff] }
 0x92d   :  { %4726 = vmatprep.subr.bf16.mxu0 %v4725_v21  ;;  %v4833_v36 = vpack.c.bf16 %v2311_v46, %v2310_v12  ;;  %v2746_v12 = vld [vmem:[#allocation9 + $0x728] sm:$0xff] }
 0x92f   :  { %v5107_v10 = vpop.eup %5106 }
 0x930   :  { %4728 = vmatpush3.bf16.msra.mxu0 %v4725_v21  ;;  %v5884_v7 = vmul.f32 %v5107_v10, %v5861_v40  ;;  %v5109_v59 = vpop.eup %5108  ;;  %v2306_v40 = vld [vmem:[#allocation9 + $0x640] sm:$0xff]  ;;  %v2541_v10 = vld [vmem:[#allocation9 + $0x6e8] sm:$0xff] }
 0x931   :  { %4730 = vmatprep.subr.bf16.mxu0 %v4729_v19  ;;  %v5111_v18 = vpop.eup %5110  ;;  %v777_v25 = vmul.f32 0.6931472, %v5109_v59  ;;  %v2163_v59 = vand.u32 2147483647, %v5905_v14 }
 0x932   :  { %v1273_v26 = vmul.f32 0.6931472, %v5111_v18  ;;  %v5113_v21 = vpop.eup %5112 }
 0x933   :  { %v779_v37 = vadd.f32 %v777_v25, %v763_v30  ;;  %v1271_v44 = vadd.f32 1.0, %v5113_v21  ;;  %v2165_v18 = vsub.f32 0.0, %v2163_v59  ;;  %v2741_v25 = vld [vmem:[#allocation9 + $0x700] sm:$0xff] }
 0x934   :  { %4732 = vmatpush3.bf16.msra.mxu0 %v4729_v19  ;;  %v1276_v38 = vadd.f32 %v1273_v26, %v1260_v35  ;;  %v2530_v19 = vld [vmem:[#allocation9 + $0x690] sm:$0xff]  ;;  %v2742_v26 = vld [vmem:[#allocation9 + $0x708] sm:$0xff] }
 0x935   :  { %4734 = vmatprep.subr.bf16.mxu0 %v4733_v54  ;;  %5114 = vtanh.f32 %v779_v37  ;;  %v4877_v51 = vpack.c.bf16 %v2531_v1, %v2530_v19  ;;  %v2743_v35 = vld [vmem:[#allocation9 + $0x710] sm:$0xff]  ;;  %v2744_v37 = vld [vmem:[#allocation9 + $0x718] sm:$0xff] }
 0x936   :  { %5116 = vtanh.f32 %v1276_v38  ;;  %v4941_v38 = vpack.c.bf16 %v2744_v37, %v2743_v35 }
 0x937   :  { %5118 = vlog2.f32 %v1271_v44  ;;  %v2749_v44 = vld [vmem:[#allocation9 + $0x740] sm:$0xff] }
 0x938   :  { %4736 = vmatpush3.bf16.msra.mxu0 %v4733_v54 }
 0x939   :  { %4738 = vmatprep.subr.bf16.mxu0 %v4737_v0 }
 0x93c   :  { %4740 = vmatpush3.bf16.msra.mxu0 %v4737_v0  ;;  %v4881_v0 = vpack.c.bf16 %v2533_v62, %v2532_v61  ;;  %v2751_v61 = vld [vmem:[#allocation9 + $0x750] sm:$0xff]  ;;  %v2752_v62 = vld [vmem:[#allocation9 + $0x758] sm:$0xff] }
 0x93d   :  { %4742 = vmatprep.subr.bf16.mxu0 %v4741_v4 }
 0x93f   :  { %v5115_v27 = vpop.eup %5114 }
 0x940   :  { %4744 = vmatpush3.bf16.msra.mxu0 %v4741_v4  ;;  %v5117_v47 = vpop.eup %5116  ;;  %v5891_v48 = vmul.f32 %v5115_v27, %v5867_v22  ;;  %v4885_v22 = vpack.c.bf16 %v2535_v16, %v2534_v56  ;;  %v2537_v4 = vld [vmem:[#allocation9 + $0x6c8] sm:$0xff]  ;;  %v2162_v27 = vmax.f32 %v5903_v15, 0.0  ;;  %v2753_v56 = vld [vmem:[#allocation9 + $0x760] sm:$0xff] }
 0x941   :  { %4810 = vmatprep.subr.bf16.mxu0 %v4809_v45  ;;  %v5894_v54 = vmul.f32 %v5117_v47, %v5871_v29  ;;  %v5119_v3 = vpop.eup %5118  ;;  %v4889_v29 = vpack.c.bf16 %v2537_v4, %v2536_v52  ;;  %v2754_v16 = vld [vmem:[#allocation9 + $0x768] sm:$0xff]  ;;  %v2756_v52 = vld [vmem:[#allocation9 + $0x778] sm:$0xff] }
 0x942   :  { %v1275_v2 = vmul.f32 0.6931472, %v5119_v3  ;;  %v4961_v3 = vpack.c.bf16 %v2754_v16, %v2753_v56  ;;  %v2436_v16 = vld [vmem:[#allocation9 + $0x810] sm:$0xff] }
 0x943   :  { %4100 = vmatmul.mubr.f32.vlgmr.msra.gmra.mrb[30].mxu0 %v5857_v32  ;;  %v4825_v32 = vpack.c.bf16 %v2307_v23, %v2306_v40  ;;  %v2167_v40 = vmul.f32 1.442695, %v2165_v18  ;;  %v2209_v18 = vld [vmem:[#allocation9 + $0x798] sm:$0xff] }
 0x944   :  { %4812 = vmatpush3.bf16.msra.mxu0 %v4809_v45  ;;  %4204 = vmatprep.mubr.f32.mxu0 %v5884_v7  ;;  %v1277_v45 = vadd.f32 %v1275_v2, %v1261_v5 }
 0x945   :  { %4814 = vmatprep.subr.bf16.mxu0 %v4813_v63 }
 0x946   :  { %5120 = vtanh.f32 %v1277_v45 }
 0x947   :  { %5122 = vpow2.f32 %v2167_v40  ;;  %v2210_v40 = vld [vmem:[#allocation9 + $0x7a0] sm:$0xff] }
 0x948   :  { %4816 = vmatpush3.bf16.msra.mxu0 %v4813_v63  ;;  %v4897_v63 = vpack.c.bf16 %v2541_v10, %v2540_v9 }
 0x949   :  { %4818 = vmatprep.subr.bf16.mxu0 %v4817_v49 }
 0x94c   :  { %4820 = vmatpush3.bf16.msra.mxu0 %v4817_v49 }
 0x94d   :  { %4822 = vmatprep.subr.bf16.mxu0 %v4821_v17 }
 0x950   :  { %4824 = vmatpush3.bf16.msra.mxu0 %v4821_v17  ;;  %v5121_v49 = vpop.eup %5120  ;;  %v2164_v17 = vand.u32 2147483647, %v5903_v15 }
 0x951   :  { %4826 = vmatprep.subr.bf16.mxu0 %v4825_v32  ;;  %v5900_v53 = vmul.f32 %v5121_v49, %v5880_v6  ;;  %v4937_v6 = vpack.c.bf16 %v2742_v26, %v2741_v25  ;;  %v2212_v26 = vld [vmem:[#allocation9 + $0x7b0] sm:$0xff] }
 0x952   :  { %v2166_v55 = vsub.f32 0.0, %v2164_v17  ;;  %v2208_v17 = vld [vmem:[#allocation9 + $0x790] sm:$0xff] }
 0x954   :  { %4828 = vmatpush3.bf16.msra.mxu0 %v4825_v32  ;;  %v2169_v23 = vmul.f32 1.442695, %v2166_v55  ;;  %v5123_v32 = vpop.eup %5122  ;;  %v4781_v55 = vpack.c.bf16 %v2209_v18, %v2208_v17 }
 0x955   :  { %4830 = vmatprep.subr.bf16.mxu0 %v4829_v39  ;;  %v2171_v31 = vadd.f32 1.0, %v5123_v32 }
 0x956   :  { %5124 = vpow2.f32 %v2169_v23  ;;  %v2211_v23 = vld [vmem:[#allocation9 + $0x7a8] sm:$0xff] }
 0x957   :  { %5126 = vlog2.f32 %v2171_v31  ;;  %v4785_v25 = vpack.c.bf16 %v2211_v23, %v2210_v40 }
 0x958   :  { %4832 = vmatpush3.bf16.msra.mxu0 %v4829_v39  ;;  %v2745_v39 = vld [vmem:[#allocation9 + $0x720] sm:$0xff] }
 0x959   :  { %4834 = vmatprep.subr.bf16.mxu0 %v4833_v36  ;;  %v4945_v46 = vpack.c.bf16 %v2746_v12, %v2745_v39  ;;  %v2215_v39 = vld [vmem:[#allocation9 + $0x7c8] sm:$0xff] }
 0x95c   :  { %4836 = vmatpush3.bf16.msra.mxu0 %v4833_v36  ;;  %v2747_v36 = vld [vmem:[#allocation9 + $0x730] sm:$0xff] }
 0x95d   :  { %4838 = vmatprep.subr.bf16.mxu0 %v4837_v28  ;;  %v4949_v20 = vpack.c.bf16 %v2748_v42, %v2747_v36 }
 0x960   :  { %4840 = vmatpush3.bf16.msra.mxu0 %v4837_v28  ;;  %v5125_v30 = vpop.eup %5124 }
 0x961   :  { %4874 = vmatprep.subr.bf16.mxu0 %v4873_v58  ;;  %v2172_v34 = vadd.f32 1.0, %v5125_v30  ;;  %v5127_v21 = vpop.eup %5126 }
 0x962   :  { %v2174_v24 = vmul.f32 0.6931472, %v5127_v21  ;;  %v2217_v21 = vld [vmem:[#allocation9 + $0x7d8] sm:$0xff] }
 0x963   :  { %4205 = vmatmul.mubr.f32.vlgmr.msra.gmra.mrb[32].mxu0 %v5891_v48  ;;  %5128 = vlog2.f32 %v2172_v34 }
 0x964   :  { %4876 = vmatpush3.bf16.msra.mxu0 %v4873_v58  ;;  %4274 = vmatprep.mubr.f32.mxu0 %v5894_v54  ;;  %v2750_v58 = vld [vmem:[#allocation9 + $0x748] sm:$0xff]  ;;  %v2177_v47 = vadd.f32 %v2174_v24, %v2161_v41  ;;  %v2218_v41 = vld [vmem:[#allocation9 + $0x7e0] sm:$0xff] }
 0x965   :  { %4878 = vmatprep.subr.bf16.mxu0 %v4877_v51  ;;  %v4953_v1 = vpack.c.bf16 %v2750_v58, %v2749_v44  ;;  %v2219_v24 = vld [vmem:[#allocation9 + $0x7e8] sm:$0xff]  ;;  %v2220_v58 = vld [vmem:[#allocation9 + $0x7f0] sm:$0xff] }
 0x966   :  { %5130 = vtanh.f32 %v2177_v47  ;;  %v4801_v44 = vpack.c.bf16 %v2219_v24, %v2218_v41 }
 0x968   :  { %4880 = vmatpush3.bf16.msra.mxu0 %v4877_v51 }
 0x969   :  { %4882 = vmatprep.subr.bf16.mxu0 %v4881_v0 }
 0x96c   :  { %4884 = vmatpush3.bf16.msra.mxu0 %v4881_v0  ;;  %v4957_v0 = vpack.c.bf16 %v2752_v62, %v2751_v61  ;;  %v2435_v61 = vld [vmem:[#allocation9 + $0x808] sm:$0xff] }
 0x96d   :  { %4886 = vmatprep.subr.bf16.mxu0 %v4885_v22  ;;  %v5129_v28 = vpop.eup %5128 }
 0x96e   :  { %v2176_v19 = vmul.f32 0.6931472, %v5129_v28 }
 0x970   :  { %4888 = vmatpush3.bf16.msra.mxu0 %v4885_v22  ;;  %v2178_v51 = vadd.f32 %v2176_v19, %v2162_v27  ;;  %v2755_v22 = vld [vmem:[#allocation9 + $0x770] sm:$0xff]  ;;  %v5131_v2 = vpop.eup %5130  ;;  %v2221_v27 = vld [vmem:[#allocation9 + $0x7f8] sm:$0xff] }
 0x971   :  { %4890 = vmatprep.subr.bf16.mxu0 %v4889_v29  ;;  %v4965_v4 = vpack.c.bf16 %v2756_v52, %v2755_v22  ;;  %v5912_v5 = vmul.f32 %v5131_v2, %v5905_v14  ;;  %v4805_v19 = vpack.c.bf16 %v2221_v27, %v2220_v58  ;;  %v2438_v52 = vld [vmem:[#allocation9 + $0x820] sm:$0xff] }
 0x972   :  { %5132 = vtanh.f32 %v2178_v51  ;;  %v2434_v51 = vld [vmem:[#allocation9 + $0x800] sm:$0xff] }
 0x973   :  { %v2185_v43 = vand.u32 2147483647, %v5912_v5  ;;  %v2183_v30 = vmax.f32 %v5912_v5, 0.0 }
 0x974   :  { %4892 = vmatpush3.bf16.msra.mxu0 %v4889_v29 }
 0x975   :  { %4894 = vmatprep.subr.bf16.mxu0 %v4893_v8 }
 0x978   :  { %4896 = vmatpush3.bf16.msra.mxu0 %v4893_v8  ;;  %v2187_v8 = vsub.f32 0.0, %v2185_v43  ;;  %v2442_v43 = vld [vmem:[#allocation9 + $0x840] sm:$0xff] }
 0x979   :  { %4898 = vmatprep.subr.bf16.mxu0 %v4897_v63 }
 0x97a   :  { %v2189_v10 = vmul.f32 1.442695, %v2187_v8 }
 0x97c   :  { %4900 = vmatpush3.bf16.msra.mxu0 %v4897_v63  ;;  %v5133_v29 = vpop.eup %5132  ;;  %5134 = vpow2.f32 %v2189_v10  ;;  %v2445_v10 = vld [vmem:[#allocation9 + $0x858] sm:$0xff] }
 0x97d   :  { %4902 = vmatprep.subr.bf16.mxu0 %v4901_v50  ;;  %v5915_v60 = vmul.f32 %v5133_v29, %v5903_v15  ;;  %v2440_v29 = vld [vmem:[#allocation9 + $0x830] sm:$0xff] }
 0x97f   :  { %v2186_v45 = vand.u32 2147483647, %v5915_v60  ;;  %v2184_v34 = vmax.f32 %v5915_v60, 0.0 }
 0x980   :  { %4904 = vmatpush3.bf16.msra.mxu0 %v4901_v50  ;;  %v4777_v50 = vpack.c.bf16 %v2207_v13, %v2206_v11  ;;  %v2446_v11 = vld [vmem:[#allocation9 + $0x860] sm:$0xff]  ;;  %v2447_v13 = vld [vmem:[#allocation9 + $0x868] sm:$0xff] }
 0x981   :  { %4938 = vmatprep.subr.bf16.mxu0 %v4937_v6  ;;  %v2188_v9 = vsub.f32 0.0, %v2186_v45  ;;  %v2443_v45 = vld [vmem:[#allocation9 + $0x848] sm:$0xff] }
 0x982   :  { %4778 = vmatprep.subr.bf16.mxu1 %v4777_v50  ;;  %v5939_v8 = vpack.c.bf16 %v2443_v45, %v2442_v43 }
 0x983   :  { %4275 = vmatmul.mubr.f32.vlgmr.msra.gmra.mrb[34].mxu0 %v5900_v53  ;;  %v2191_v63 = vmul.f32 1.442695, %v2188_v9  ;;  %4780 = vmatpush3.bf16.msra.mxu1 %v4777_v50  ;;  %v2444_v9 = vld [vmem:[#allocation9 + $0x850] sm:$0xff]  ;;  %v5947_v50 = vpack.c.bf16 %v2447_v13, %v2446_v11 }
 0x984   :  { %4940 = vmatpush3.bf16.msra.mxu0 %v4937_v6  ;;  %4782 = vmatprep.subr.bf16.mxu1 %v4781_v55  ;;  %v2213_v6 = vld [vmem:[#allocation9 + $0x7b8] sm:$0xff] }
 0x985   :  { %4942 = vmatprep.subr.bf16.mxu0 %v4941_v38  ;;  %5136 = vpow2.f32 %v2191_v63  ;;  %v4789_v32 = vpack.c.bf16 %v2213_v6, %v2212_v26  ;;  %v5943_v63 = vpack.c.bf16 %v2445_v10, %v2444_v9 }
 0x986   :  { %v5135_v49 = vpop.eup %5134 }
 0x987   :  { %v2193_v59 = vadd.f32 1.0, %v5135_v49  ;;  %4784 = vmatpush3.bf16.msra.mxu1 %v4781_v55  ;;  %v2448_v49 = vld [vmem:[#allocation9 + $0x870] sm:$0xff] }
 0x988   :  { %4944 = vmatpush3.bf16.msra.mxu0 %v4941_v38  ;;  %4786 = vmatprep.subr.bf16.mxu1 %v4785_v25  ;;  %v2214_v38 = vld [vmem:[#allocation9 + $0x7c0] sm:$0xff] }
 0x989   :  { %4946 = vmatprep.subr.bf16.mxu0 %v4945_v46  ;;  %5138 = vlog2.f32 %v2193_v59 }
 0x98b   :  { %4788 = vmatpush3.bf16.msra.mxu1 %v4785_v25 }
 0x98c   :  { %4948 = vmatpush3.bf16.msra.mxu0 %v4945_v46  ;;  %4790 = vmatprep.subr.bf16.mxu1 %v4789_v32  ;;  %v4793_v46 = vpack.c.bf16 %v2215_v39, %v2214_v38 }
 0x98d   :  { %4950 = vmatprep.subr.bf16.mxu0 %v4949_v20 }
 0x98f   :  { %v5137_v14 = vpop.eup %5136  ;;  %4792 = vmatpush3.bf16.msra.mxu1 %v4789_v32 }
 0x990   :  { %4952 = vmatpush3.bf16.msra.mxu0 %v4949_v20  ;;  %v2194_v15 = vadd.f32 1.0, %v5137_v14  ;;  %4794 = vmatprep.subr.bf16.mxu1 %v4793_v46  ;;  %v2216_v20 = vld [vmem:[#allocation9 + $0x7d0] sm:$0xff]  ;;  %v2449_v14 = vld [vmem:[#allocation9 + $0x878] sm:$0xff] }
 0x991   :  { %4954 = vmatprep.subr.bf16.mxu0 %v4953_v1  ;;  %v4797_v28 = vpack.c.bf16 %v2217_v21, %v2216_v20  ;;  %v5951_v59 = vpack.c.bf16 %v2449_v14, %v2448_v49 }
 0x992   :  { %5140 = vlog2.f32 %v2194_v15  ;;  %v3200_v15 = vld [vmem:[#allocation11 + $0x6] ss:$0 sm:$0xff] }
 0x993   :  { %v5139_v31 = vpop.eup %5138  ;;  %4796 = vmatpush3.bf16.msra.mxu1 %v4793_v46 }
 0x994   :  { %4956 = vmatpush3.bf16.msra.mxu0 %v4953_v1  ;;  %v2196_v37 = vmul.f32 0.6931472, %v5139_v31  ;;  %4798 = vmatprep.subr.bf16.mxu1 %v4797_v28 }
 0x995   :  { %4958 = vmatprep.subr.bf16.mxu0 %v4957_v0 }
 0x996   :  { %v2199_v36 = vadd.f32 %v2196_v37, %v2183_v30 }
 0x997   :  { %4800 = vmatpush3.bf16.msra.mxu1 %v4797_v28 }
 0x998   :  { %4960 = vmatpush3.bf16.msra.mxu0 %v4957_v0  ;;  %5142 = vtanh.f32 %v2199_v36  ;;  %4802 = vmatprep.subr.bf16.mxu1 %v4801_v44  ;;  %v5922_v0 = vpack.c.bf16 %v2435_v61, %v2434_v51 }
 0x999   :  { %4962 = vmatprep.subr.bf16.mxu0 %v4961_v3 }
 0x99b   :  { %4804 = vmatpush3.bf16.msra.mxu1 %v4801_v44 }
 0x99c   :  { %4964 = vmatpush3.bf16.msra.mxu0 %v4961_v3  ;;  %v5141_v35 = vpop.eup %5140  ;;  %4806 = vmatprep.subr.bf16.mxu1 %v4805_v19  ;;  %v2437_v3 = vld [vmem:[#allocation9 + $0x818] sm:$0xff] }
 0x99d   :  { %4966 = vmatprep.subr.bf16.mxu0 %v4965_v4  ;;  %v2198_v12 = vmul.f32 0.6931472, %v5141_v35  ;;  %v5927_v22 = vpack.c.bf16 %v2437_v3, %v2436_v16 }
 0x99f   :  { %v2200_v42 = vadd.f32 %v2198_v12, %v2184_v34  ;;  %4808 = vmatpush3.bf16.msra.mxu1 %v4805_v19 }
 0x9a0   :  { %4968 = vmatpush3.bf16.msra.mxu0 %v4965_v4  ;;  %4842 = vmatprep.subr.bf16.mxu1 %v5922_v0  ;;  %v2439_v4 = vld [vmem:[#allocation9 + $0x828] sm:$0xff] }
 0x9a1   :  { %5144 = vtanh.f32 %v2200_v42  ;;  %v5931_v2 = vpack.c.bf16 %v2439_v4, %v2438_v52 }
 0x9a2   :  { %v5143_v1 = vpop.eup %5142 }
 0x9a3   :  { %v2203_v62 = vmul.f32 %v5143_v1, %v5912_v5  ;;  %v2441_v5 = vld [vmem:[#allocation9 + $0x838] sm:$0xff] }
 0x9a5   :  { %4169 = vmatprep.mubr.f32.mxu1 %v2203_v62 }
 0x9ab   :  { %v5145_v47 = vpop.eup %5144 }
 0x9ac   :  { %v2204_v56 = vmul.f32 %v5145_v47, %v5915_v60  ;;  %v5935_v60 = vpack.c.bf16 %v2441_v5, %v2440_v29 }
 0x9ae   :  { %4170 = vmatmul.mubr.f32.vlgmr.msra.gmra.mrb[44].mxu1 %v2204_v56 }
 0x9af   :  { %4844 = vmatpush3.bf16.msra.mxu1 %v5922_v0 }
 0x9b0   :  { %4846 = vmatprep.subr.bf16.mxu1 %v5927_v22 }
 0x9b3   :  { %4848 = vmatpush3.bf16.msra.mxu1 %v5927_v22 }
 0x9b4   :  { %4850 = vmatprep.subr.bf16.mxu1 %v5931_v2 }
 0x9b7   :  { %4852 = vmatpush3.bf16.msra.mxu1 %v5931_v2 }
 0x9b8   :  { %4854 = vmatprep.subr.bf16.mxu1 %v5935_v60 }
 0x9bb   :  { %4856 = vmatpush3.bf16.msra.mxu1 %v5935_v60 }
 0x9bc   :  { %4858 = vmatprep.subr.bf16.mxu1 %v5939_v8 }
 0x9bf   :  { %4860 = vmatpush3.bf16.msra.mxu1 %v5939_v8 }
 0x9c0   :  { %4862 = vmatprep.subr.bf16.mxu1 %v5943_v63 }
 0x9c3   :  { %4864 = vmatpush3.bf16.msra.mxu1 %v5943_v63 }
 0x9c4   :  { %4866 = vmatprep.subr.bf16.mxu1 %v5947_v50 }
 0x9c7   :  { %4868 = vmatpush3.bf16.msra.mxu1 %v5947_v50 }
 0x9c8   :  { %4870 = vmatprep.subr.bf16.mxu1 %v5951_v59 }
 0x9cb   :  { %4872 = vmatpush3.bf16.msra.mxu1 %v5951_v59 }
 0x9cc   :  { %4906 = vmatprep.subr.bf16.mxu1 %v5922_v0 }
 0xa16   :  { %v4101_v17 = vpop.f32.mrb[30].mxu0 }
 0xa17   :  { %v2046_v18 = vadd.f32 %v4101_v17, %v3200_v15  ;;  %v2031_v55 = vpop.f32.mrb[31].mxu0 }
 0xa18   :  { %v2045_v40 = vadd.f32 %v3200_v15, %v2031_v55 }
 0xa19   :  { %v2050_v23 = vand.u32 2147483647, %v2046_v18  ;;  %v2048_v46 = vmax.f32 %v2046_v18, 0.0 }
 0xa1a   :  { %v2049_v25 = vand.u32 2147483647, %v2045_v40  ;;  %v2047_v21 = vmax.f32 %v2045_v40, 0.0 }
 0xa1b   :  { %v2052_v26 = vsub.f32 0.0, %v2050_v23 }
 0xa1c   :  { %v2051_v6 = vsub.f32 0.0, %v2049_v25 }
 0xa1d   :  { %v2055_v32 = vmul.f32 1.442695, %v2052_v26 }
 0xa1e   :  { %v2053_v30 = vmul.f32 1.442695, %v2051_v6 }
 0xa1f   :  { %5146 = vpow2.f32 %v2055_v32 }
 0xa20   :  { %5148 = vpow2.f32 %v2053_v30 }
 0xa29   :  { %v5147_v31 = vpop.eup %5146 }
 0xa2a   :  { %v5149_v34 = vpop.eup %5148  ;;  %v2058_v35 = vadd.f32 1.0, %v5147_v31 }
 0xa2b   :  { %v2057_v37 = vadd.f32 1.0, %v5149_v34 }
 0xa2c   :  { %5150 = vlog2.f32 %v2058_v35 }
 0xa2d   :  { %5152 = vlog2.f32 %v2057_v37 }
 0xa36   :  { %v5151_v38 = vpop.eup %5150  ;;  %v4206_v39 = vpop.f32.mrb[32].mxu0 }
 0xa37   :  { %v5153_v12 = vpop.eup %5152  ;;  %v2062_v36 = vmul.f32 0.6931472, %v5151_v38  ;;  %v2392_v42 = vand.u32 2147483647, %v4206_v39  ;;  %v2380_v20 = vpop.f32.mrb[33].mxu0  ;;  %v2390_v5 = vmax.f32 %v4206_v39, 0.0 }
 0xa38   :  { %v2060_v28 = vmul.f32 0.6931472, %v5153_v12  ;;  %v2391_v41 = vand.u32 2147483647, %v2380_v20  ;;  %v2389_v45 = vmax.f32 %v2380_v20, 0.0 }
 0xa39   :  { %v2064_v24 = vadd.f32 %v2062_v36, %v2048_v46  ;;  %v2394_v44 = vsub.f32 0.0, %v2392_v42 }
 0xa3a   :  { %v2063_v58 = vadd.f32 %v2060_v28, %v2047_v21  ;;  %v2393_v27 = vsub.f32 0.0, %v2391_v41 }
 0xa3b   :  { %5154 = vtanh.f32 %v2064_v24  ;;  %v2397_v19 = vmul.f32 1.442695, %v2394_v44 }
 0xa3c   :  { %5156 = vtanh.f32 %v2063_v58  ;;  %v2395_v1 = vmul.f32 1.442695, %v2393_v27 }
 0xa3d   :  { %5158 = vpow2.f32 %v2397_v19 }
 0xa3e   :  { %5160 = vpow2.f32 %v2395_v1 }
 0xa45   :  { %v5155_v47 = vpop.eup %5154 }
 0xa46   :  { %v5157_v51 = vpop.eup %5156  ;;  %v5958_v16 = vmul.f32 %v5155_v47, %v2046_v18 }
 0xa47   :  { %v5159_v61 = vpop.eup %5158  ;;  %v5956_v62 = vmul.f32 %v5157_v51, %v2045_v40 }
 0xa48   :  { %v5161_v56 = vpop.eup %5160  ;;  %v2400_v3 = vadd.f32 1.0, %v5159_v61 }
 0xa49   :  { %v2399_v52 = vadd.f32 1.0, %v5161_v56  ;;  %4344 = vmatprep.mubr.f32.mxu0 %v5956_v62 }
 0xa4a   :  { %5162 = vlog2.f32 %v2400_v3  ;;  %4345 = vmatmul.mubr.f32.vlgmr.msra.gmra.mrb[36].mxu0 %v5958_v16 }
 0xa4b   :  { %5164 = vlog2.f32 %v2399_v52 }
 0xa54   :  { %v5163_v4 = vpop.eup %5162 }
 0xa55   :  { %v5165_v29 = vpop.eup %5164  ;;  %v2404_v43 = vmul.f32 0.6931472, %v5163_v4 }
 0xa56   :  { %v2402_v9 = vmul.f32 0.6931472, %v5165_v29  ;;  %v4276_v10 = vpop.f32.mrb[34].mxu0 }
 0xa57   :  { %v2406_v11 = vadd.f32 %v2404_v43, %v2390_v5  ;;  %v2622_v13 = vand.u32 2147483647, %v4276_v10  ;;  %v2610_v49 = vpop.f32.mrb[35].mxu0  ;;  %v2620_v28 = vmax.f32 %v4276_v10, 0.0 }
 0xa58   :  { %v2405_v14 = vadd.f32 %v2402_v9, %v2389_v45  ;;  %v2621_v15 = vand.u32 2147483647, %v2610_v49 }
 0xa59   :  { %5166 = vtanh.f32 %v2406_v11  ;;  %v2624_v17 = vsub.f32 0.0, %v2622_v13 }
 0xa5a   :  { %5168 = vtanh.f32 %v2405_v14  ;;  %v2623_v18 = vsub.f32 0.0, %v2621_v15 }
 0xa5b   :  { %v2627_v55 = vmul.f32 1.442695, %v2624_v17 }
 0xa5c   :  { %v2625_v40 = vmul.f32 1.442695, %v2623_v18 }
 0xa5d   :  { %5170 = vpow2.f32 %v2627_v55 }
 0xa5e   :  { %5172 = vpow2.f32 %v2625_v40 }
 0xa63   :  { %v5167_v23 = vpop.eup %5166 }
 0xa64   :  { %v5169_v25 = vpop.eup %5168  ;;  %v2410_v26 = vmul.f32 %v5167_v23, %v4206_v39 }
 0xa65   :  { %v2409_v6 = vmul.f32 %v5169_v25, %v2380_v20  ;;  %v2619_v20 = vmax.f32 %v2610_v49, 0.0 }
 0xa66   :  { %v2414_v32 = vand.u32 2147483647, %v2410_v26  ;;  %v2412_v61 = vmax.f32 %v2410_v26, 0.0 }
 0xa67   :  { %v5171_v30 = vpop.eup %5170  ;;  %v2413_v31 = vand.u32 2147483647, %v2409_v6  ;;  %v2411_v52 = vmax.f32 %v2409_v6, 0.0 }
 0xa68   :  { %v5173_v34 = vpop.eup %5172  ;;  %v2416_v35 = vsub.f32 0.0, %v2414_v32  ;;  %v2630_v37 = vadd.f32 1.0, %v5171_v30 }
 0xa69   :  { %v2415_v38 = vsub.f32 0.0, %v2413_v31  ;;  %v2629_v12 = vadd.f32 1.0, %v5173_v34 }
 0xa6a   :  { %v2419_v46 = vmul.f32 1.442695, %v2416_v35  ;;  %5174 = vlog2.f32 %v2630_v37 }
 0xa6b   :  { %v2417_v36 = vmul.f32 1.442695, %v2415_v38  ;;  %5176 = vlog2.f32 %v2629_v12 }
 0xa6c   :  { %5178 = vpow2.f32 %v2419_v46 }
 0xa6d   :  { %5180 = vpow2.f32 %v2417_v36 }
 0xa74   :  { %v5175_v42 = vpop.eup %5174 }
 0xa75   :  { %v5177_v21 = vpop.eup %5176  ;;  %v2634_v41 = vmul.f32 0.6931472, %v5175_v42 }
 0xa76   :  { %v5179_v39 = vpop.eup %5178  ;;  %v2632_v24 = vmul.f32 0.6931472, %v5177_v21 }
 0xa77   :  { %v5181_v44 = vpop.eup %5180  ;;  %v2422_v58 = vadd.f32 1.0, %v5179_v39  ;;  %v2636_v27 = vadd.f32 %v2634_v41, %v2620_v28 }
 0xa78   :  { %v2421_v19 = vadd.f32 1.0, %v5181_v44  ;;  %v2635_v1 = vadd.f32 %v2632_v24, %v2619_v20 }
 0xa79   :  { %5182 = vlog2.f32 %v2422_v58 }
 0xa7a   :  { %5184 = vlog2.f32 %v2421_v19 }
 0xa7b   :  { %5186 = vtanh.f32 %v2636_v27 }
 0xa7c   :  { %5188 = vtanh.f32 %v2635_v1 }
 0xa83   :  { %v5183_v47 = vpop.eup %5182 }
 0xa84   :  { %v5185_v51 = vpop.eup %5184  ;;  %v2426_v56 = vmul.f32 0.6931472, %v5183_v47 }
 0xa85   :  { %v5187_v3 = vpop.eup %5186  ;;  %v2424_v4 = vmul.f32 0.6931472, %v5185_v51 }
 0xa86   :  { %v5189_v29 = vpop.eup %5188  ;;  %v2428_v5 = vadd.f32 %v2426_v56, %v2412_v61  ;;  %v2640_v43 = vmul.f32 %v5187_v3, %v4276_v10 }
 0xa87   :  { %v2427_v45 = vadd.f32 %v2424_v4, %v2411_v52  ;;  %v2639_v9 = vmul.f32 %v5189_v29, %v2610_v49 }
 0xa88   :  { %5190 = vtanh.f32 %v2428_v5  ;;  %v2644_v11 = vand.u32 2147483647, %v2640_v43  ;;  %v2642_v31 = vmax.f32 %v2640_v43, 0.0 }
 0xa89   :  { %5192 = vtanh.f32 %v2427_v45  ;;  %v2643_v13 = vand.u32 2147483647, %v2639_v9  ;;  %v2641_v35 = vmax.f32 %v2639_v9, 0.0 }
 0xa8a   :  { %v2646_v14 = vsub.f32 0.0, %v2644_v11 }
 0xa8b   :  { %v2645_v15 = vsub.f32 0.0, %v2643_v13 }
 0xa8c   :  { %v2649_v17 = vmul.f32 1.442695, %v2646_v14 }
 0xa8d   :  { %v2647_v18 = vmul.f32 1.442695, %v2645_v15 }
 0xa8e   :  { %5194 = vpow2.f32 %v2649_v17 }
 0xa8f   :  { %5196 = vpow2.f32 %v2647_v18 }
 0xa92   :  { %v5191_v55 = vpop.eup %5190 }
 0xa93   :  { %v5193_v40 = vpop.eup %5192  ;;  %v2432_v25 = vmul.f32 %v5191_v55, %v2410_v26 }
 0xa94   :  { %v2431_v23 = vmul.f32 %v5193_v40, %v2409_v6 }
 0xa96   :  { %4239 = vmatprep.mubr.f32.mxu1 %v2431_v23 }
 0xa97   :  { %4240 = vmatmul.mubr.f32.vlgmr.msra.gmra.mrb[46].mxu1 %v2432_v25 }
 0xa98   :  { %v5195_v32 = vpop.eup %5194  ;;  %4908 = vmatpush3.bf16.msra.mxu1 %v5922_v0 }
 0xa99   :  { %v5197_v10 = vpop.eup %5196  ;;  %v2652_v49 = vadd.f32 1.0, %v5195_v32  ;;  %4910 = vmatprep.subr.bf16.mxu1 %v5927_v22 }
 0xa9a   :  { %v2651_v30 = vadd.f32 1.0, %v5197_v10 }
 0xa9b   :  { %5198 = vlog2.f32 %v2652_v49 }
 0xa9c   :  { %5200 = vlog2.f32 %v2651_v30  ;;  %4912 = vmatpush3.bf16.msra.mxu1 %v5927_v22 }
 0xa9d   :  { %4914 = vmatprep.subr.bf16.mxu1 %v5931_v2 }
 0xaa0   :  { %4916 = vmatpush3.bf16.msra.mxu1 %v5931_v2 }
 0xaa1   :  { %4918 = vmatprep.subr.bf16.mxu1 %v5935_v60 }
 0xaa4   :  { %4920 = vmatpush3.bf16.msra.mxu1 %v5935_v60 }
 0xaa5   :  { %v5199_v26 = vpop.eup %5198  ;;  %4922 = vmatprep.subr.bf16.mxu1 %v5939_v8 }
 0xaa6   :  { %v5201_v6 = vpop.eup %5200  ;;  %v2656_v34 = vmul.f32 0.6931472, %v5199_v26 }
 0xaa7   :  { %v2654_v37 = vmul.f32 0.6931472, %v5201_v6 }
 0xaa8   :  { %v2658_v38 = vadd.f32 %v2656_v34, %v2642_v31  ;;  %4924 = vmatpush3.bf16.msra.mxu1 %v5939_v8 }
 0xaa9   :  { %v2657_v12 = vadd.f32 %v2654_v37, %v2641_v35  ;;  %4926 = vmatprep.subr.bf16.mxu1 %v5943_v63 }
 0xaaa   :  { %5202 = vtanh.f32 %v2658_v38 }
 0xaab   :  { %5204 = vtanh.f32 %v2657_v12 }
 0xaac   :  { %4928 = vmatpush3.bf16.msra.mxu1 %v5943_v63 }
 0xaad   :  { %4930 = vmatprep.subr.bf16.mxu1 %v5947_v50 }
 0xab0   :  { %4932 = vmatpush3.bf16.msra.mxu1 %v5947_v50 }
 0xab1   :  { %4934 = vmatprep.subr.bf16.mxu1 %v5951_v59 }
 0xab4   :  { %v5203_v46 = vpop.eup %5202  ;;  %4936 = vmatpush3.bf16.msra.mxu1 %v5951_v59 }
 0xab5   :  { %v5205_v36 = vpop.eup %5204  ;;  %4970 = vmatprep.subr.bf16.mxu1 %v5922_v0  ;;  %v2662_v21 = vmul.f32 %v5203_v46, %v2640_v43 }
 0xab6   :  { %v2661_v42 = vmul.f32 %v5205_v36, %v2639_v9 }
 0xab8   :  { %4309 = vmatprep.mubr.f32.mxu1 %v2661_v42 }
 0xab9   :  { %4310 = vmatmul.mubr.f32.vlgmr.msra.gmra.mrb[48].mxu1 %v2662_v21 }
 0xaba   :  { %4972 = vmatpush3.bf16.msra.mxu1 %v5922_v0  ;;  %v5993_v0 = vpop.f32.mrb[44].mxu1 }
 0xabb   :  { %4974 = vmatprep.subr.bf16.mxu1 %v5927_v22 }
 0xabe   :  { %4976 = vmatpush3.bf16.msra.mxu1 %v5927_v22  ;;  %v5995_v22 = vpop.f32.mrb[45].mxu1 }
 0xabf   :  { %4978 = vmatprep.subr.bf16.mxu1 %v5931_v2 }
 0xac2   :  { %4980 = vmatpush3.bf16.msra.mxu1 %v5931_v2 }
 0xac3   :  { %4982 = vmatprep.subr.bf16.mxu1 %v5935_v60 }
 0xac6   :  { %4984 = vmatpush3.bf16.msra.mxu1 %v5935_v60 }
 0xac7   :  { %4986 = vmatprep.subr.bf16.mxu1 %v5939_v8 }
 0xaca   :  { %4988 = vmatpush3.bf16.msra.mxu1 %v5939_v8 }
 0xacb   :  { %4990 = vmatprep.subr.bf16.mxu1 %v5943_v63 }
 0xace   :  { %4992 = vmatpush3.bf16.msra.mxu1 %v5943_v63 }
 0xacf   :  { %4994 = vmatprep.subr.bf16.mxu1 %v5947_v50 }
 0xad2   :  { %4996 = vmatpush3.bf16.msra.mxu1 %v5947_v50 }
 0xad3   :  { %4998 = vmatprep.subr.bf16.mxu1 %v5951_v59 }
 0xad6   :  { %5000 = vmatpush3.bf16.msra.mxu1 %v5951_v59 }
 0xb1d   :  { %v4346_v2 = vpop.f32.mrb[36].mxu0 }
 0xb1e   :  { %v2835_v60 = vand.u32 2147483647, %v4346_v2  ;;  %v2823_v28 = vpop.f32.mrb[37].mxu0  ;;  %v2833_v19 = vmax.f32 %v4346_v2, 0.0 }
 0xb1f   :  { %v2834_v8 = vand.u32 2147483647, %v2823_v28  ;;  %v2832_v47 = vmax.f32 %v2823_v28, 0.0 }
 0xb20   :  { %v2837_v41 = vsub.f32 0.0, %v2835_v60 }
 0xb21   :  { %v2836_v39 = vsub.f32 0.0, %v2834_v8  ;;  %v2995_v8 = vld [vmem:[#allocation9 + $0x888] sm:$0xff] }
 0xb22   :  { %v2840_v20 = vmul.f32 1.442695, %v2837_v41 }
 0xb23   :  { %v2838_v63 = vmul.f32 1.442695, %v2836_v39  ;;  %v2996_v39 = vld [vmem:[#allocation9 + $0x890] sm:$0xff] }
 0xb24   :  { %5206 = vpow2.f32 %v2840_v20  ;;  %v2997_v20 = vld [vmem:[#allocation9 + $0x898] sm:$0xff] }
 0xb25   :  { %5208 = vpow2.f32 %v2838_v63  ;;  %v5005_v63 = vpack.c.bf16 %v2997_v20, %v2996_v39 }
 0xb2e   :  { %v5207_v24 = vpop.eup %5206 }
 0xb2f   :  { %v5209_v50 = vpop.eup %5208  ;;  %v2843_v44 = vadd.f32 1.0, %v5207_v24  ;;  %v2998_v24 = vld [vmem:[#allocation9 + $0x8a0] sm:$0xff] }
 0xb30   :  { %v2842_v58 = vadd.f32 1.0, %v5209_v50  ;;  %v2999_v50 = vld [vmem:[#allocation9 + $0x8a8] sm:$0xff] }
 0xb31   :  { %5210 = vlog2.f32 %v2843_v44  ;;  %v5009_v44 = vpack.c.bf16 %v2999_v50, %v2998_v24 }
 0xb32   :  { %5212 = vlog2.f32 %v2842_v58  ;;  %v3000_v58 = vld [vmem:[#allocation9 + $0x8b0] sm:$0xff] }
 0xb3b   :  { %v5211_v59 = vpop.eup %5210 }
 0xb3c   :  { %v5213_v27 = vpop.eup %5212  ;;  %v2847_v1 = vmul.f32 0.6931472, %v5211_v59  ;;  %v3001_v59 = vld [vmem:[#allocation9 + $0x8b8] sm:$0xff] }
 0xb3d   :  { %v2845_v51 = vmul.f32 0.6931472, %v5213_v27  ;;  %v5013_v27 = vpack.c.bf16 %v3001_v59, %v3000_v58 }
 0xb3e   :  { %v2849_v61 = vadd.f32 %v2847_v1, %v2833_v19  ;;  %v3002_v19 = vld [vmem:[#allocation9 + $0x8c0] sm:$0xff]  ;;  %v3003_v1 = vld [vmem:[#allocation9 + $0x8c8] sm:$0xff] }
 0xb3f   :  { %v2848_v56 = vadd.f32 %v2845_v51, %v2832_v47  ;;  %v5017_v47 = vpack.c.bf16 %v3003_v1, %v3002_v19  ;;  %v3004_v51 = vld [vmem:[#allocation9 + $0x8d0] sm:$0xff] }
 0xb40   :  { %5214 = vtanh.f32 %v2849_v61  ;;  %v3005_v61 = vld [vmem:[#allocation9 + $0x8d8] sm:$0xff] }
 0xb41   :  { %5216 = vtanh.f32 %v2848_v56  ;;  %v3006_v56 = vld [vmem:[#allocation9 + $0x8e0] sm:$0xff] }
 0xb4a   :  { %v5215_v3 = vpop.eup %5214 }
 0xb4b   :  { %v5217_v52 = vpop.eup %5216  ;;  %v2853_v4 = vmul.f32 %v5215_v3, %v4346_v2  ;;  %v5021_v3 = vpack.c.bf16 %v3005_v61, %v3004_v51 }
 0xb4c   :  { %v2852_v29 = vmul.f32 %v5217_v52, %v2823_v28  ;;  %v2994_v28 = vld [vmem:[#allocation9 + $0x880] sm:$0xff]  ;;  %v3007_v52 = vld [vmem:[#allocation9 + $0x8e8] sm:$0xff] }
 0xb4d   :  { %v2857_v5 = vand.u32 2147483647, %v2853_v4  ;;  %v2855_v25 = vmax.f32 %v2853_v4, 0.0  ;;  %v5001_v41 = vpack.c.bf16 %v2995_v8, %v2994_v28 }
 0xb4e   :  { %v2856_v43 = vand.u32 2147483647, %v2852_v29  ;;  %v2854_v30 = vmax.f32 %v2852_v29, 0.0 }
 0xb4f   :  { %v2859_v45 = vsub.f32 0.0, %v2857_v5  ;;  %5002 = vmatprep.subr.bf16.mxu0 %v5001_v41  ;;  %v3009_v5 = vld [vmem:[#allocation9 + $0x8f8] sm:$0xff] }
 0xb50   :  { %v2858_v9 = vsub.f32 0.0, %v2856_v43  ;;  %5004 = vmatpush3.bf16.msra.mxu0 %v5001_v41 }
 0xb51   :  { %v2862_v11 = vmul.f32 1.442695, %v2859_v45  ;;  %5006 = vmatprep.subr.bf16.mxu0 %v5005_v63 }
 0xb52   :  { %v2860_v13 = vmul.f32 1.442695, %v2858_v9 }
 0xb53   :  { %5218 = vpow2.f32 %v2862_v11 }
 0xb54   :  { %5220 = vpow2.f32 %v2860_v13  ;;  %5008 = vmatpush3.bf16.msra.mxu0 %v5005_v63 }
 0xb55   :  { %5010 = vmatprep.subr.bf16.mxu0 %v5009_v44 }
 0xb58   :  { %5012 = vmatpush3.bf16.msra.mxu0 %v5009_v44 }
 0xb59   :  { %5014 = vmatprep.subr.bf16.mxu0 %v5013_v27 }
 0xb5c   :  { %5016 = vmatpush3.bf16.msra.mxu0 %v5013_v27 }
 0xb5d   :  { %v5219_v14 = vpop.eup %5218  ;;  %5018 = vmatprep.subr.bf16.mxu0 %v5017_v47 }
 0xb5e   :  { %v5221_v15 = vpop.eup %5220  ;;  %v2865_v17 = vadd.f32 1.0, %v5219_v14 }
 0xb5f   :  { %v2864_v18 = vadd.f32 1.0, %v5221_v15 }
 0xb60   :  { %5222 = vlog2.f32 %v2865_v17  ;;  %5020 = vmatpush3.bf16.msra.mxu0 %v5017_v47 }
 0xb61   :  { %5224 = vlog2.f32 %v2864_v18  ;;  %5022 = vmatprep.subr.bf16.mxu0 %v5021_v3 }
 0xb64   :  { %5024 = vmatpush3.bf16.msra.mxu0 %v5021_v3 }
 0xb6a   :  { %v5223_v55 = vpop.eup %5222  ;;  %v4241_v40 = vpop.f32.mrb[46].mxu1 }
 0xb6b   :  { %v5225_v23 = vpop.eup %5224  ;;  %v2869_v32 = vmul.f32 0.6931472, %v5223_v55  ;;  %v5998_v10 = vadd.f32 %v4241_v40, %v5993_v0  ;;  %v2516_v49 = vpop.f32.mrb[47].mxu1 }
 0xb6c   :  { %v2867_v26 = vmul.f32 0.6931472, %v5225_v23  ;;  %v6001_v6 = vadd.f32 %v2516_v49, %v5995_v22 }
 0xb6d   :  { %v2871_v31 = vadd.f32 %v2869_v32, %v2855_v25 }
 0xb6e   :  { %v2870_v34 = vadd.f32 %v2867_v26, %v2854_v30 }
 0xb6f   :  { %5226 = vtanh.f32 %v2871_v31 }
 0xb70   :  { %5228 = vtanh.f32 %v2870_v34 }
 0xb79   :  { %v5227_v35 = vpop.eup %5226 }
 0xb7a   :  { %v5229_v37 = vpop.eup %5228  ;;  %v2875_v12 = vmul.f32 %v5227_v35, %v2853_v4  ;;  %v5025_v4 = vpack.c.bf16 %v3007_v52, %v3006_v56 }
 0xb7b   :  { %v2874_v38 = vmul.f32 %v5229_v37, %v2852_v29  ;;  %v3008_v29 = vld [vmem:[#allocation9 + $0x8f0] sm:$0xff] }
 0xb7c   :  { %5026 = vmatprep.subr.bf16.mxu0 %v5025_v4  ;;  %v5029_v43 = vpack.c.bf16 %v3009_v5, %v3008_v29 }
 0xb7d   :  { %4379 = vmatprep.mubr.f32.mxu1 %v2874_v38  ;;  %5028 = vmatpush3.bf16.msra.mxu0 %v5025_v4 }
 0xb7e   :  { %4380 = vmatmul.mubr.f32.vlgmr.msra.gmra.mrb[50].mxu1 %v2875_v12  ;;  %5030 = vmatprep.subr.bf16.mxu0 %v5029_v43 }
 0xb81   :  { %5032 = vmatpush3.bf16.msra.mxu0 %v5029_v43 }
 0xb8c   :  { %v4311_v46 = vpop.f32.mrb[48].mxu1 }
 0xb8d   :  { %v2739_v36 = vadd.f32 %v4311_v46, %v5993_v0  ;;  %v2729_v42 = vpop.f32.mrb[49].mxu1 }
 0xb8e   :  { %v2738_v21 = vadd.f32 %v2729_v42, %v5995_v22 }
 0xb8f   :  { %v2954_v2 = vmax.f32 %v5998_v10, %v2739_v36 }
 0xb90   :  { %v2953_v60 = vmax.f32 %v6001_v6, %v2738_v21 }
 0xc51   :  { %v4381_v45 = vpop.f32.mrb[50].mxu1 }
 0xc52   :  { %v2952_v9 = vadd.f32 %v4381_v45, %v5993_v0  ;;  %v2942_v11 = vpop.f32.mrb[51].mxu1 }
 0xc53   :  { %v2951_v13 = vadd.f32 %v2942_v11, %v5995_v22 }
 0xc54   :  { %v2956_v14 = vmax.f32 %v2954_v2, %v2952_v9 }
 0xc55   :  { %v2955_v15 = vmax.f32 %v2953_v60, %v2951_v13 }
 0xc56   :  { %v2958_v17 = vsub.f32 %v5998_v10, %v2956_v14  ;;  %v2964_v18 = vsub.f32 %v2739_v36, %v2956_v14  ;;  %v2970_v55 = vsub.f32 %v2952_v9, %v2956_v14  ;;  %v3110_v14 = vld [vmem:[#allocation11 + $0x7] sm:$0x1] }
 0xc57   :  { %v2957_v40 = vsub.f32 %v6001_v6, %v2955_v15  ;;  %v2963_v23 = vsub.f32 %v2738_v21, %v2955_v15  ;;  %v2969_v25 = vsub.f32 %v2951_v13, %v2955_v15  ;;  %v3119_v15 = vsub.s32 0, %v5716_v57 }
 0xc58   :  { %v2961_v32 = vmul.f32 1.442695, %v2958_v17  ;;  %v2967_v49 = vmul.f32 1.442695, %v2964_v18  ;;  %v2973_v30 = vmul.f32 1.442695, %v2970_v55 }
 0xc59   :  { %v2959_v26 = vmul.f32 1.442695, %v2957_v40  ;;  %v2965_v31 = vmul.f32 1.442695, %v2963_v23  ;;  %v2971_v0 = vmul.f32 1.442695, %v2969_v25 }
 0xc5a   :  { %5230 = vpow2.f32 %v2961_v32  ;;  %v3114_v55 = vld [vmem:[#allocation11 + $0x8] sm:$0x1] }
 0xc5b   :  { %5232 = vpow2.f32 %v2967_v49 }
 0xc5c   :  { %5234 = vpow2.f32 %v2973_v30 }
 0xc5d   :  { %5236 = vpow2.f32 %v2959_v26 }
 0xc5e   :  { %5238 = vpow2.f32 %v2965_v31 }
 0xc5f   :  { %5240 = vpow2.f32 %v2971_v0 }
 0xc64   :  { %v5231_v22 = vpop.eup %5230 }
 0xc65   :  { %v5233_v10 = vpop.eup %5232  ;;  %v2976_v34 = vmul.f32 %v5231_v22, %v5891_v48 }
 0xc66   :  { %v5235_v35 = vpop.eup %5234  ;;  %v2986_v6 = vadd.f32 %v5233_v10, %v5231_v22  ;;  %v2978_v37 = vmul.f32 %v5233_v10, %v5900_v53 }
 0xc67   :  { %v5237_v38 = vpop.eup %5236  ;;  %v2982_v21 = vmul.f32 %v5235_v35, %v5958_v16 }
 0xc68   :  { %v5239_v12 = vpop.eup %5238  ;;  %v2988_v46 = vadd.f32 %v5235_v35, %v2986_v6  ;;  %v2975_v36 = vmul.f32 %v5237_v38, %v5884_v7  ;;  %v2980_v42 = vadd.f32 %v2978_v37, %v2976_v34 }
 0xc69   :  { %v5241_v2 = vpop.eup %5240  ;;  %v2985_v60 = vadd.f32 %v5239_v12, %v5237_v38  ;;  %v2977_v28 = vmul.f32 %v5239_v12, %v5894_v54 }
 0xc6a   :  { %5242 = vrcp.f32 %v2988_v46  ;;  %v2984_v8 = vadd.f32 %v2982_v21, %v2980_v42  ;;  %v2981_v39 = vmul.f32 %v5241_v2, %v5956_v62 }
 0xc6b   :  { %v2987_v41 = vadd.f32 %v5241_v2, %v2985_v60  ;;  %v2979_v48 = vadd.f32 %v2977_v28, %v2975_v36 }
 0xc6d   :  { %v2983_v20 = vadd.f32 %v2981_v39, %v2979_v48  ;;  %5244 = vrcp.f32 %v2987_v41 }
 0xc74   :  { %v5243_v53 = vpop.eup %5242 }
 0xc75   :  { %v2992_v63 = vmul.f32 %v5243_v53, %v2984_v8 }
 0xc77   :  { %v5245_v24 = vpop.eup %5244 }
 0xc78   :  { %v2990_v50 = vmul.f32 %v5245_v24, %v2983_v20 }
 0xc7a   :  { %4414 = vmatprep.mubr.f32.mxu0 %v2990_v50 }
 0xc7b   :  { %4415 = vmatmul.mubr.f32.vlgmr.msra.gmra.mrb[38].mxu0 %v2992_v63 }
 0xd4e   :  { %v4416_v7 = vpop.f32.mrb[38].mxu0 }
 0xd4f   :  { %v3088_v16 = vsel %vm3086_vm15, %v4416_v7, 0.0  ;;  %v3076_v44 = vpop.f32.mrb[39].mxu0 }
 0xd50   :  { %v3098_v54 = vmul.f32 %v3088_v16, %v3088_v16  ;;  %v3089_v58 = vadd.f32 %v3088_v16, %v3076_v44  ;;  %v3097_v59 = vmul.f32 %v3076_v44, %v3076_v44 }
 0xd52   :  { %v3090_v27 = vrot.slane %v3089_v58, 4  ;;  %v3099_v19 = vadd.f32 %v3098_v54, %v3097_v59 }
 0xd54   :  { %v3091_v1 = vadd.f32 %v3090_v27, %v3089_v58  ;;  %v3100_v62 = vrot.slane %v3099_v19, 4 }
 0xd56   :  { %v3092_v47 = vrot.slane %v3091_v1, 2  ;;  %v3101_v51 = vadd.f32 %v3100_v62, %v3099_v19 }
 0xd58   :  { %v3093_v61 = vadd.f32 %v3092_v47, %v3091_v1  ;;  %v3102_v56 = vrot.slane %v3101_v51, 2 }
 0xd5a   :  { %v3094_v3 = vrot.slane %v3093_v61, 1  ;;  %v3103_v52 = vadd.f32 %v3102_v56, %v3101_v51 }
 0xd5c   :  { %v3095_v4 = vadd.f32 %v3094_v3, %v3093_v61  ;;  %v3104_v29 = vrot.slane %v3103_v52, 1 }
 0xd5e   :  { %v3096_v5 = vmul.f32 0.083333336, %v3095_v4  ;;  %v3105_v33 = vadd.f32 %v3104_v29, %v3103_v52 }
 0xd60   :  { %v3106_v43 = vmul.f32 0.083333336, %v3105_v33  ;;  %v3107_v45 = vmul.f32 %v3096_v5, %v3096_v5 }
 0xd62   :  { %v3108_v9 = vsub.f32 %v3106_v43, %v3107_v45 }
 0xd64   :  { %v3109_v11 = vmax.f32 %v3108_v9, 0.0 }
 0xd66   :  { %v3111_v13 = vadd.f32 1e-05, %v3109_v11 }
 0xd68   :  { %5246 = vrsqrt.f32 %v3111_v13 }
 0xd72   :  { %v5247_v17 = vpop.eup %5246 }
 0xd73   :  { %v3113_v18 = vmul.f32 %v5247_v17, %v3110_v14 }
 0xd75   :  { %v3115_v40 = vmul.f32 %v3113_v18, %v3096_v5  ;;  %v3120_v23 = vrot.slane %v3113_v18, %v3119_v15 }
 0xd77   :  { %v3116_v25 = vsub.f32 %v3114_v55, %v3115_v40  ;;  %v3121_v32 = vmul.f32 %v3120_v23, %v3076_v44  ;;  %v3122_v49 = vmul.f32 %v4416_v7, %v3120_v23 }
 0xd79   :  { %v3126_v30 = vrot.slane %v3116_v25, %v3119_v15 }
 0xd7b   :  { %v3127_v26 = vadd.f32 %v3126_v30, %v3121_v32  ;;  %v3128_v31 = vadd.f32 %v3126_v30, %v3122_v49 }
 0xd7d   :  { %v3131_v0 = vand.u32 2147483647, %v3127_v26  ;;  %v3132_v22 = vand.u32 2147483647, %v3128_v31  ;;  %v3129_v42 = vmax.f32 %v3127_v26, 0.0  ;;  %v3130_v2 = vmax.f32 %v3128_v31, 0.0 }
 0xd7f   :  { %v3133_v10 = vsub.f32 0.0, %v3131_v0  ;;  %v3134_v34 = vsub.f32 0.0, %v3132_v22 }
 0xd81   :  { %v3135_v35 = vmul.f32 1.442695, %v3133_v10  ;;  %v3137_v6 = vmul.f32 1.442695, %v3134_v34 }
 0xd83   :  { %5248 = vpow2.f32 %v3135_v35 }
 0xd84   :  { %5250 = vpow2.f32 %v3137_v6 }
 0xd8d   :  { %v5249_v57 = vpop.eup %5248 }
 0xd8e   :  { %v5251_v37 = vpop.eup %5250  ;;  %v3139_v38 = vadd.f32 1.0, %v5249_v57 }
 0xd8f   :  { %v3140_v12 = vadd.f32 1.0, %v5251_v37 }
 0xd90   :  { %5252 = vlog2.f32 %v3139_v38 }
 0xd91   :  { %5254 = vlog2.f32 %v3140_v12 }
 0xd9a   :  { %v5253_v46 = vpop.eup %5252 }
 0xd9b   :  { %v5255_v36 = vpop.eup %5254  ;;  %v3142_v21 = vmul.f32 0.6931472, %v5253_v46 }
 0xd9c   :  { %v3144_v60 = vmul.f32 0.6931472, %v5255_v36 }
 0xd9d   :  { %v3145_v28 = vadd.f32 %v3142_v21, %v3129_v42 }
 0xd9e   :  { %v3146_v8 = vadd.f32 %v3144_v60, %v3130_v2 }
 0xd9f   :  { %5256 = vtanh.f32 %v3145_v28 }
 0xda0   :  { %5258 = vtanh.f32 %v3146_v8 }
 0xda9   :  { %v5257_v41 = vpop.eup %5256 }
 0xdaa   :  { %v5259_v48 = vpop.eup %5258  ;;  %v3149_v39 = vmul.f32 %v5257_v41, %v3127_v26 }
 0xdab   :  { %v3150_v20 = vmul.f32 %v5259_v48, %v3128_v31 }
 0xdac   :  { %3151 = vst [vmem:[#allocation14] sm:$0xff] %v3149_v39 }
 0xdad   :  { %3152 = vst [vmem:[#allocation14 + $0x8] sm:$0xff] %v3150_v20 }
 0xdae   :  { %5405 = shalt.err (!%p5402_p10)
}
 0xdaf   :  { %s5406_s22 = scalar_lea.hbm %s6044_s10, 256 }
 0xdb0   :  { %p5407_p11 = scmp.ne.s32.totalorder %s6044_s10, %s5406_s22  ;;  %p5410_p12 = scmp.lt.u32.totalorder %s5406_s22, %s6044_s10 }
 0xdb2   :  { %p5412_p13 = pnand %p5410_p12, %p5407_p11 }
 0xdb4   :  { %5415 = shalt.err (!%p5412_p13)
}
 0xdb5   :  { %3164 = dma.vmem_to_hbm [thread:$0]  %s3159_s19, 256, %s6044_s10, [#allocation5], %s5428_s26, %s5428_s26, %s5429_s27  }
 0xdb6   :  { %5424 = dma.done.wait [#allocation5], 256  }
 0xdb7   :  { %5425 = vsyncadd [#allocation5], 4294967040 }
 0xdb8   :  { %3168 = vsyncpa [#allocation4], 1 }
 0xdb9   :  { %3169 = vsyncpa [#allocation7], 1 }
 0xdba   :  { %3170 = vsyncpa [#allocation10], 1 }
 0xdbb   :  { %3171 = vsyncpa [#allocation13], 1 }
 0xdbc   :  { %3172 = vsyncpa [#allocation5], 1 }

</bundles_post_ra>
